<compile_context>
chip_gen: v7x
topology: tpu7x:2x2x1
jax: 0.10.0
libtpu: 0.0.40
codegen_flags: <defaults>
</compile_context>

<pallas_src>
import functools

import jax
import jax.numpy as jnp
from jax import lax
from jax.experimental import pallas as pl
from jax.experimental.pallas import tpu as pltpu


def _round_up(x, m):
    return -(-x // m) * m


def _tpu_budgets():
    """(vmem_limit_bytes, row_cap) tuned per TPU generation."""
    vmem = None
    try:
        info = pltpu.get_tpu_info()
        for name in ("vmem_capacity_bytes", "vmem_size_bytes", "vmem_bytes"):
            v = getattr(info, name, None)
            if v:
                vmem = int(v)
                break
    except Exception:
        vmem = None
    if vmem is not None and vmem >= 96 * 1024 * 1024:
        # v5e / v6e: 128 MiB physical VMEM -> bigger tiles, bigger budget.
        return 96 * 1024 * 1024, 4096
    # v7x (64 MiB per TensorCore) or unknown: stay conservative.
    return 48 * 1024 * 1024, 2048


_VMEM_LIMIT, _ROW_CAP = _tpu_budgets()


# -----------------------------------------------------------------------------
# Conv kernel: one (image, row-tile) grid step of a KxK "same"-style conv.
# -----------------------------------------------------------------------------
def _conv_kernel(x_ref, w_ref, b_ref, o_ref, *, k, dilation, fold, relu):
    """
    k == 1 : x_ref is the output row tile's input      (1, TH, Wo, Cin)
    k  > 1 : x_ref is the whole zero-padded image      (1, Hp, Wp, Cin),
             resident in VMEM across the row-tile axis.
    w_ref  : (K*K*Cin, Cout) if fold else (K*K, Cin, Cout), bf16
    b_ref  : (1, Cout) f32
    o_ref  : (1, TH, Wo, Cout) bf16
    """
    th, wo, cout = o_ref.shape[1], o_ref.shape[2], o_ref.shape[3]
    cin = x_ref.shape[3]

    if k == 1:
        xcol = x_ref[0].reshape(th * wo, cin)
        acc = jnp.dot(xcol, w_ref[...], preferred_element_type=jnp.float32)
    else:
        span = dilation * (k - 1)
        row0 = pl.program_id(1) * th
        p2 = th & -th                      # largest power-of-two factor of th
        if p2 > 1:
            row0 = pl.multiple_of(row0, p2)
        slab = x_ref[0, pl.ds(row0, th + span)]        # (TH+span, Wp, Cin)

        def tap(kh, kw):
            return slab[kh * dilation:kh * dilation + th,
                        kw * dilation:kw * dilation + wo, :]

        if fold:
            # Cin <= 128: taps concatenated on the lane axis in VMEM -> one
            # deep (K*K*Cin) MXU contraction.
            xcol = jnp.concatenate(
                [tap(kh, kw) for kh in range(k) for kw in range(k)], axis=-1)
            xcol = xcol.reshape(th * wo, k * k * cin)
            acc = jnp.dot(xcol, w_ref[...], preferred_element_type=jnp.float32)
        else:
            # Cin >= 256: each tap already meets MXU depth; per-tap matmuls
            # accumulated in f32 avoid the big im2col VMEM temporary.
            acc = None
            t = 0
            for kh in range(k):
                for kw in range(k):
                    xt = tap(kh, kw).reshape(th * wo, cin)
                    d = jnp.dot(xt, w_ref[t],
                                preferred_element_type=jnp.float32)
                    acc = d if acc is None else acc + d
                    t += 1

    acc = acc + b_ref[...]
    if relu:
        acc = jnp.maximum(acc, 0.0)
    o_ref[0] = acc.reshape(th, wo, cout).astype(o_ref.dtype)


def _pick_tile_rows(n, ho, wo_r):
    """Pick (tile_rows, padded_output_height) with th*wo_r <= _ROW_CAP."""
    max_th = max(1, _ROW_CAP // wo_r)
    if ho <= max_th:
        th = ho
        if n == 1 and ho >= 2 and ho % 2 == 0:
            th = ho // 2        # keep >= 2 grid units for v7x's 2 TensorCores
        return th, ho
    best = 1
    for t in range(2, max_th + 1):
        if ho % t == 0:
            best = t
    if best > 1 and best * wo_r >= 256:
        return best, ho
    # No decent divisor: pad the output height, crop the garbage rows after.
    return max_th, _round_up(ho, max_th)


def _maybe_single_buffered(block_shape, index_map, single):
    """BlockSpec; requests single buffering for blocks that never re-DMA."""
    if single:
        try:
            return pl.BlockSpec(block_shape, index_map,
                                pipeline_mode=pl.Buffered(1))
        except Exception:     # pl.Buffered / pipeline_mode not available
            pass
    return pl.BlockSpec(block_shape, index_map)


def conv2d_pallas(x, w, b, *, dilation=1, padding=None, relu=True):
    """x: (N,H,W,Cin) NHWC; w: (K,K,Cin,Cout) HWIO; b: (Cout,). Returns bf16 NHWC."""
    k = w.shape[0]
    if padding is None:
        padding = dilation * (k - 1) // 2
    n, h, wd, cin = x.shape
    cout = w.shape[-1]
    span = dilation * (k - 1)
    ho = h + 2 * padding - span
    wo = wd + 2 * padding - span

    # Tiny-Cin first layer: build its im2col in the wrapper (3-channel tensor,
    # cheap) so the Pallas input block is lane-dense and the conv becomes 1x1.
    if k > 1 and cin < 16:
        xb = x.astype(jnp.bfloat16)
        xp = jnp.pad(xb, ((0, 0), (padding, padding), (padding, padding), (0, 0)))
        taps = [xp[:, kh * dilation:kh * dilation + ho,
                   kw * dilation:kw * dilation + wo, :]
                for kh in range(k) for kw in range(k)]
        xcol = jnp.concatenate(taps, axis=-1)        # (N, Ho, Wo, K*K*Cin)
        return conv2d_pallas(xcol, w.reshape(1, 1, k * k * cin, cout), b,
                             dilation=1, padding=0, relu=relu)

    # Round output width (and, if needed, height) up so in-kernel reshapes are
    # layout-trivial and th*wo_r is large; garbage columns/rows are computed
    # from extra zero padding and cropped after the call.
    wo_r = max(16, _round_up(wo, 16))
    extra_w = wo_r - wo
    th, ho_r = _pick_tile_rows(n, ho, wo_r)
    extra_h = ho_r - ho

    hp = h + 2 * padding + extra_h
    wp = wd + 2 * padding + extra_w
    xb = x.astype(jnp.bfloat16)
    if padding or extra_h or extra_w:
        xb = jnp.pad(xb, ((0, 0), (padding, padding + extra_h),
                          (padding, padding + extra_w), (0, 0)))

    fold = (k == 1) or (cin <= 128)
    wb = w.astype(jnp.bfloat16)
    wf = wb.reshape(k * k * cin, cout) if fold else wb.reshape(k * k, cin, cout)
    b2 = b.astype(jnp.float32).reshape(1, cout)
    w_index = (lambda ni, ri: (0, 0)) if fold else (lambda ni, ri: (0, 0, 0))

    if k == 1:
        # No halo: input can be row-tiled exactly like the output.
        x_shape = (1, th, wo_r, cin)
        x_index = lambda ni, ri: (ni, ri, 0, 0)
    else:
        # Whole padded image resident across row tiles (no re-DMA).
        x_shape = (1, hp, wp, cin)
        x_index = lambda ni, ri: (ni, 0, 0, 0)
    big_image = (k > 1) and (hp * wp * cin * 2 > _VMEM_LIMIT // 6)

    def _call(single_buffer_consts):
        return pl.pallas_call(
            functools.partial(_conv_kernel, k=k, dilation=dilation,
                              fold=fold, relu=relu),
            out_shape=jax.ShapeDtypeStruct((n, ho_r, wo_r, cout), jnp.bfloat16),
            grid=(n, ho_r // th),
            in_specs=[
                _maybe_single_buffered(x_shape, x_index,
                                       single_buffer_consts and big_image),
                _maybe_single_buffered(wf.shape, w_index, single_buffer_consts),
                _maybe_single_buffered((1, cout), lambda ni, ri: (0, 0),
                                       single_buffer_consts),
            ],
            out_specs=pl.BlockSpec((1, th, wo_r, cout),
                                   lambda ni, ri: (ni, ri, 0, 0)),
            compiler_params=pltpu.CompilerParams(
                dimension_semantics=("parallel", "parallel"),
                vmem_limit_bytes=_VMEM_LIMIT),
        )(xb, wf, b2)

    try:
        out = _call(True)
    except Exception:   # pipeline_mode=Buffered(1) unsupported -> default bufs
        out = _call(False)

    if extra_h or extra_w:
        out = out[:, :ho, :wo, :]
    return out


# -----------------------------------------------------------------------------
# Max-pool kernels
# -----------------------------------------------------------------------------
def _pool_out_size(length, kernel, stride, padding, ceil_mode):
    if ceil_mode:
        o = -(-(length + 2 * padding - kernel) // stride) + 1
        if (o - 1) * stride >= length + padding:
            o -= 1
    else:
        o = (length + 2 * padding - kernel) // stride + 1
    return o


def _pool2x2_kernel(x_ref, o_ref, *, c):
    # x_ref: (1, THo, 2, Wo, 2*C)   window positions folded into small dims
    # o_ref: (1, THo, Wo, C)
    m = None
    for i in range(2):
        rows = x_ref[0, :, i]                     # (THo, Wo, 2C)
        for j in range(2):
            v = rows[:, :, j * c:(j + 1) * c]     # lane-aligned (C mult of 128)
            m = v if m is None else jnp.maximum(m, v)
    o_ref[0] = m


def _pool_s1_kernel(x_ref, o_ref, *, kernel):
    # x_ref: (1, Ho+k-1, Wo+k-1, C); o_ref: (1, Ho, Wo, C); stride 1.
    ho, wo = o_ref.shape[1], o_ref.shape[2]
    m = None
    for kh in range(kernel):
        for kw in range(kernel):
            v = x_ref[0, kh:kh + ho, kw:kw + wo, :]
            m = v if m is None else jnp.maximum(m, v)
    o_ref[0] = m


def maxpool_pallas(x, kernel, stride, padding=0, ceil_mode=False):
    """Matches torch.nn.MaxPool2d semantics on NHWC input (implicit -inf pad)."""
    n, h, w, c = x.shape
    ho = _pool_out_size(h, kernel, stride, padding, ceil_mode)
    wo = _pool_out_size(w, kernel, stride, padding, ceil_mode)

    if kernel == 2 and stride == 2 and padding == 0:
        need_h, need_w = 2 * ho, 2 * wo
        xp = x[:, :min(h, need_h), :min(w, need_w), :]
        if need_h > h or need_w > w:   # ceil_mode trailing window
            xp = jnp.pad(xp, ((0, 0), (0, max(0, need_h - h)),
                              (0, max(0, need_w - w)), (0, 0)),
                         constant_values=-jnp.inf)
        # Free wrapper reshape: (N, 2Ho, 2Wo, C) -> (N, Ho, 2, Wo, 2C) so the
        # kernel needs no strided loads.
        xr = xp.reshape(n, ho, 2, wo, 2 * c)
        tho = 1
        for t in range(1, ho + 1):
            if ho % t == 0 and t * wo <= _ROW_CAP:
                tho = t
        return pl.pallas_call(
            functools.partial(_pool2x2_kernel, c=c),
            out_shape=jax.ShapeDtypeStruct((n, ho, wo, c), x.dtype),
            grid=(n, ho // tho),
            in_specs=[pl.BlockSpec((1, tho, 2, wo, 2 * c),
                                   lambda i, r: (i, r, 0, 0, 0))],
            out_specs=pl.BlockSpec((1, tho, wo, c), lambda i, r: (i, r, 0, 0)),
            compiler_params=pltpu.CompilerParams(
                dimension_semantics=("parallel", "parallel"),
                vmem_limit_bytes=_VMEM_LIMIT),
        )(xr)

    if stride == 1:
        xp = jnp.pad(x, ((0, 0), (padding, padding), (padding, padding), (0, 0)),
                     constant_values=-jnp.inf)
        return pl.pallas_call(
            functools.partial(_pool_s1_kernel, kernel=kernel),
            out_shape=jax.ShapeDtypeStruct((n, ho, wo, c), x.dtype),
            grid=(n,),
            in_specs=[pl.BlockSpec((1, h + 2 * padding, w + 2 * padding, c),
                                   lambda i: (i, 0, 0, 0))],
            out_specs=pl.BlockSpec((1, ho, wo, c), lambda i: (i, 0, 0, 0)),
            compiler_params=pltpu.CompilerParams(
                dimension_semantics=("parallel",),
                vmem_limit_bytes=_VMEM_LIMIT),
        )(xp)

    # TODO(synk): general kernel/stride max-pool (not needed by VGGBase).
    raise NotImplementedError("max-pool configuration not used by VGGBase")


# -----------------------------------------------------------------------------
# Pure-JAX reference (same bf16 data / f32 accumulation, correctness only)
# -----------------------------------------------------------------------------
def conv2d_ref(x, w, b, *, dilation=1, padding=None, relu=True):
    k = w.shape[0]
    if padding is None:
        padding = dilation * (k - 1) // 2
    out = lax.conv_general_dilated(
        x.astype(jnp.bfloat16), w.astype(jnp.bfloat16),
        window_strides=(1, 1),
        padding=((padding, padding), (padding, padding)),
        rhs_dilation=(dilation, dilation),
        dimension_numbers=('NHWC', 'HWIO', 'NHWC'),
        preferred_element_type=jnp.float32)
    out = out + b.astype(jnp.float32)
    if relu:
        out = jnp.maximum(out, 0.0)
    return out.astype(jnp.bfloat16)


def maxpool_ref(x, kernel, stride, padding=0, ceil_mode=False):
    n, h, w, c = x.shape
    ho = _pool_out_size(h, kernel, stride, padding, ceil_mode)
    wo = _pool_out_size(w, kernel, stride, padding, ceil_mode)
    pad_h = (padding, max(0, (ho - 1) * stride + kernel - h - padding))
    pad_w = (padding, max(0, (wo - 1) * stride + kernel - w - padding))
    return lax.reduce_window(
        x, jnp.array(-jnp.inf, x.dtype), lax.max,
        (1, kernel, kernel, 1), (1, stride, stride, 1),
        ((0, 0), pad_h, pad_w, (0, 0)))


# -----------------------------------------------------------------------------
# VGGBase forward (mirrors the PyTorch module)
# -----------------------------------------------------------------------------
_LAYER_SPECS = {
    'conv1_1': (3, 64, 3),    'conv1_2': (64, 64, 3),
    'conv2_1': (64, 128, 3),  'conv2_2': (128, 128, 3),
    'conv3_1': (128, 256, 3), 'conv3_2': (256, 256, 3), 'conv3_3': (256, 256, 3),
    'conv4_1': (256, 512, 3), 'conv4_2': (512, 512, 3), 'conv4_3': (512, 512, 3),
    'conv5_1': (512, 512, 3), 'conv5_2': (512, 512, 3), 'conv5_3': (512, 512, 3),
    'conv6':   (512, 1024, 3),
    'conv7':   (1024, 1024, 1),
}


def init_params(key):
    params = {}
    for name, (cin, cout, k) in _LAYER_SPECS.items():
        key, kw_key, kb_key = jax.random.split(key, 3)
        std = (2.0 / (k * k * cin)) ** 0.5
        w = jax.random.normal(kw_key, (k, k, cin, cout), jnp.float32) * std
        b = jax.random.normal(kb_key, (cout,), jnp.float32) * 0.01
        params[name] = (w, b)
    return params


def pad_params_lane_dense(params):
    """Zero-pad conv1_x / conv2_1 channel dims to 128 lanes.

    The padded output channels are exact zeros through bias+ReLU and max-pool
    and multiply zero weights in the next layer, so the network output is
    unchanged; every activation/store becomes lane-dense and conv1_2/conv2_1
    become fold-eligible (deep MXU contraction).
    """
    p = dict(params)

    def pad_wb(w, b, cin_to, cout_to):
        ci, co = w.shape[2], w.shape[3]
        w = jnp.pad(w, ((0, 0), (0, 0), (0, cin_to - ci), (0, cout_to - co)))
        b = jnp.pad(b, (0, cout_to - co))
        return w, b

    p['conv1_1'] = pad_wb(*params['conv1_1'], 3, 128)
    p['conv1_2'] = pad_wb(*params['conv1_2'], 128, 128)
    p['conv2_1'] = pad_wb(*params['conv2_1'], 128, 128)
    return p


def vgg_base_forward(image_nchw, params, conv_fn, pool_fn):
    """image_nchw: (N, 3, H, W). Returns (conv4_3_feats, conv7_feats) in NCHW f32."""
    x = jnp.transpose(image_nchw, (0, 2, 3, 1)).astype(jnp.bfloat16)  # -> NHWC

    x = conv_fn(x, *params['conv1_1'])
    x = conv_fn(x, *params['conv1_2'])
    x = pool_fn(x, 2, 2)
    x = conv_fn(x, *params['conv2_1'])
    x = conv_fn(x, *params['conv2_2'])
    x = pool_fn(x, 2, 2)
    x = conv_fn(x, *params['conv3_1'])
    x = conv_fn(x, *params['conv3_2'])
    x = conv_fn(x, *params['conv3_3'])
    x = pool_fn(x, 2, 2, ceil_mode=True)
    x = conv_fn(x, *params['conv4_1'])
    x = conv_fn(x, *params['conv4_2'])
    x = conv_fn(x, *params['conv4_3'])
    conv4_3_feats = x
    x = pool_fn(x, 2, 2)
    x = conv_fn(x, *params['conv5_1'])
    x = conv_fn(x, *params['conv5_2'])
    x = conv_fn(x, *params['conv5_3'])
    x = pool_fn(x, 3, 1, padding=1)
    x = conv_fn(x, *params['conv6'], dilation=6, padding=6)
    conv7_feats = conv_fn(x, *params['conv7'], padding=0)

    to_nchw = lambda t: jnp.transpose(t.astype(jnp.float32), (0, 3, 1, 2))
    return to_nchw(conv4_3_feats), to_nchw(conv7_feats)


# -----------------------------------------------------------------------------
# Main
# -----------------------------------------------------------------------------
if __name__ == "__main__":
    # Small shapes consistent with the module (original SSD uses 300x300).
    N, H, W = 2, 64, 64
    image = jax.random.normal(jax.random.PRNGKey(0), (N, 3, H, W), jnp.float32)
    params = init_params(jax.random.PRNGKey(1))
    params_tpu = pad_params_lane_dense(params)   # Pallas path only

    # Pallas forward.
    conv4_3, conv7 = vgg_base_forward(image, params_tpu,
                                      conv2d_pallas, maxpool_pallas)
    jax.block_until_ready((conv4_3, conv7))

    # Shapes: 64 -> 32 -> 16 -> 8 (conv4_3), then -> 4 through the tail (conv7).
    assert conv4_3.shape == (N, 512, H // 8, W // 8), conv4_3.shape
    assert conv7.shape == (N, 1024, H // 16, W // 16), conv7.shape

    # Pure-JAX reference with the ORIGINAL (unpadded) parameters.
    ref4, ref7 = vgg_base_forward(image, params, conv2d_ref, maxpool_ref)
    jax.block_until_ready((ref4, ref7))

    def _check(a, b, name):
        a32 = a.astype(jnp.float32)
        b32 = b.astype(jnp.float32)
        diff = float(jnp.max(jnp.abs(a32 - b32)))
        scale = float(jnp.max(jnp.abs(b32))) + 1.0
        assert diff <= 2e-2 * scale, f"{name} mismatch: {diff} (scale {scale})"

    _check(conv4_3, ref4, "conv4_3_feats")
    _check(conv7, ref7, "conv7_feats")

    print("KERNEL_OK")
</pallas_src>

<mosaic_0001>
module attributes {stable_mosaic.version = 11 : i64} {
  func.func @_conv_kernel(%arg0: i32, %arg1: i32, %arg2: memref<1x32x64x27xbf16, #tpu.memory_space<vmem>>, %arg3: memref<27x128xbf16, #tpu.memory_space<vmem>>, %arg4: memref<1x128xf32, #tpu.memory_space<vmem>>, %arg5: memref<1x32x64x128xbf16, #tpu.memory_space<vmem>>) attributes {dimension_semantics = [#tpu.dimension_semantics<parallel>, #tpu.dimension_semantics<parallel>], iteration_bounds = array<i64: 2, 2>, scalar_prefetch = 0 : i64, scratch_operands = 0 : i64, tpu.core_type = #tpu.core_type<tc>, window_params = [{transform_indices = @transform_0, window_bounds = array<i64: 1, 32, 64, 27>}, {pipeline_mode = #tpu.pipeline_mode<synchronous>, transform_indices = @transform_1, window_bounds = array<i64: 27, 128>}, {pipeline_mode = #tpu.pipeline_mode<synchronous>, transform_indices = @transform_2, window_bounds = array<i64: 1, 128>}, {transform_indices = @transform_3, window_bounds = array<i64: 1, 32, 64, 128>}]} {
    %c0 = arith.constant 0 : index
    %c0_0 = arith.constant 0 : index
    %c0_1 = arith.constant 0 : index
    %c0_2 = arith.constant 0 : index
    %0 = vector.load %arg2[%c0, %c0_0, %c0_1, %c0_2] : memref<1x32x64x27xbf16, #tpu.memory_space<vmem>>, vector<1x32x64x27xbf16>
    %1 = vector.shape_cast %0 : vector<1x32x64x27xbf16> to vector<32x64x27xbf16>
    %2 = vector.shape_cast %1 : vector<32x64x27xbf16> to vector<2048x27xbf16>
    %c0_3 = arith.constant 0 : index
    %c0_4 = arith.constant 0 : index
    %3 = vector.load %arg3[%c0_3, %c0_4] : memref<27x128xbf16, #tpu.memory_space<vmem>>, vector<27x128xbf16>
    %cst = arith.constant dense<0.000000e+00> : vector<2048x128xf32>
    %4 = tpu.matmul %2, %3, %cst {dimension_numbers = #tpu.dot_dimension_numbers<[1], [0], [0], [1], [0, 0, 1, 1], [], []>} : vector<2048x27xbf16>, vector<27x128xbf16>, vector<2048x128xf32> -> vector<2048x128xf32>
    %c0_5 = arith.constant 0 : index
    %c0_6 = arith.constant 0 : index
    %5 = vector.load %arg4[%c0_5, %c0_6] : memref<1x128xf32, #tpu.memory_space<vmem>>, vector<1x128xf32>
    %6 = vector.broadcast %5 : vector<1x128xf32> to vector<2048x128xf32>
    %7 = arith.addf %4, %6 : vector<2048x128xf32>
    %cst_7 = arith.constant 0.000000e+00 : f32
    %8 = vector.broadcast %cst_7 : f32 to vector<2048x128xf32>
    %9 = arith.maximumf %7, %8 : vector<2048x128xf32>
    %10 = vector.shape_cast %9 : vector<2048x128xf32> to vector<32x64x128xf32>
    %11 = arith.truncf %10 : vector<32x64x128xf32> to vector<32x64x128xbf16>
    %c0_8 = arith.constant 0 : index
    %c0_9 = arith.constant 0 : index
    %c0_10 = arith.constant 0 : index
    %c0_11 = arith.constant 0 : index
    %12 = vector.load %arg5[%c0_8, %c0_9, %c0_10, %c0_11] : memref<1x32x64x128xbf16, #tpu.memory_space<vmem>>, vector<1x32x64x128xbf16>
    %13 = vector.shape_cast %12 : vector<1x32x64x128xbf16> to vector<32x64x128xbf16>
    %14 = vector.shape_cast %11 : vector<32x64x128xbf16> to vector<1x32x64x128xbf16>
    tpu.vector_store %arg5[%c0_8, %c0_9, %c0_10, %c0_11], %14 {strides = array<i32>} : memref<1x32x64x128xbf16, #tpu.memory_space<vmem>>, vector<1x32x64x128xbf16>,
    return
  }
  func.func @transform_0(%arg0: i32, %arg1: i32) -> (i32, i32, i32, i32) {
    %c0_i32 = arith.constant 0 : i32
    %c0_i32_0 = arith.constant 0 : i32
    %c0_i32_1 = arith.constant 0 : i32
    return %arg0, %arg1, %c0_i32, %c0_i32_0 : i32, i32, i32, i32
  }
  func.func @transform_1(%arg0: i32, %arg1: i32) -> (i32, i32) {
    %c0_i32 = arith.constant 0 : i32
    %c0_i32_0 = arith.constant 0 : i32
    %c0_i32_1 = arith.constant 0 : i32
    return %c0_i32, %c0_i32_0 : i32, i32
  }
  func.func @transform_2(%arg0: i32, %arg1: i32) -> (i32, i32) {
    %c0_i32 = arith.constant 0 : i32
    %c0_i32_0 = arith.constant 0 : i32
    %c0_i32_1 = arith.constant 0 : i32
    return %c0_i32, %c0_i32_0 : i32, i32
  }
  func.func @transform_3(%arg0: i32, %arg1: i32) -> (i32, i32, i32, i32) {
    %c0_i32 = arith.constant 0 : i32
    %c0_i32_0 = arith.constant 0 : i32
    %c0_i32_1 = arith.constant 0 : i32
    return %arg0, %arg1, %c0_i32, %c0_i32_0 : i32, i32, i32, i32
  }
}

module attributes {stable_mosaic.version = 11 : i64} {
  func.func @_conv_kernel(%arg0: i32, %arg1: i32, %arg2: memref<1x32x64x27xbf16, #tpu.memory_space<vmem>>, %arg3: memref<27x128xbf16, #tpu.memory_space<vmem>>, %arg4: memref<1x128xf32, #tpu.memory_space<vmem>>, %arg5: memref<1x32x64x128xbf16, #tpu.memory_space<vmem>>) attributes {dimension_semantics = [#tpu.dimension_semantics<parallel>, #tpu.dimension_semantics<parallel>], iteration_bounds = array<i64: 2, 2>, scalar_prefetch = 0 : i64, scratch_operands = 0 : i64, tpu.core_type = #tpu.core_type<tc>, window_params = [{transform_indices = @transform_0, window_bounds = array<i64: 1, 32, 64, 27>}, {pipeline_mode = #tpu.pipeline_mode<synchronous>, transform_indices = @transform_1, window_bounds = array<i64: 27, 128>}, {pipeline_mode = #tpu.pipeline_mode<synchronous>, transform_indices = @transform_2, window_bounds = array<i64: 1, 128>}, {transform_indices = @transform_3, window_bounds = array<i64: 1, 32, 64, 128>}]} {
    %c0 = arith.constant 0 : index
    %c0_0 = arith.constant 0 : index
    %c0_1 = arith.constant 0 : index
    %c0_2 = arith.constant 0 : index
    %0 = vector.load %arg2[%c0, %c0_0, %c0_1, %c0_2] : memref<1x32x64x27xbf16, #tpu.memory_space<vmem>>, vector<1x32x64x27xbf16>
    %1 = vector.shape_cast %0 : vector<1x32x64x27xbf16> to vector<32x64x27xbf16>
    %2 = vector.shape_cast %1 : vector<32x64x27xbf16> to vector<2048x27xbf16>
    %c0_3 = arith.constant 0 : index
    %c0_4 = arith.constant 0 : index
    %3 = vector.load %arg3[%c0_3, %c0_4] : memref<27x128xbf16, #tpu.memory_space<vmem>>, vector<27x128xbf16>
    %cst = arith.constant dense<0.000000e+00> : vector<2048x128xf32>
    %4 = tpu.matmul %2, %3, %cst {dimension_numbers = #tpu.dot_dimension_numbers<[1], [0], [0], [1], [0, 0, 1, 1], [], []>} : vector<2048x27xbf16>, vector<27x128xbf16>, vector<2048x128xf32> -> vector<2048x128xf32>
    %c0_5 = arith.constant 0 : index
    %c0_6 = arith.constant 0 : index
    %5 = vector.load %arg4[%c0_5, %c0_6] : memref<1x128xf32, #tpu.memory_space<vmem>>, vector<1x128xf32>
    %6 = vector.broadcast %5 : vector<1x128xf32> to vector<2048x128xf32>
    %7 = arith.addf %4, %6 : vector<2048x128xf32>
    %cst_7 = arith.constant 0.000000e+00 : f32
    %8 = vector.broadcast %cst_7 : f32 to vector<2048x128xf32>
    %9 = arith.maximumf %7, %8 : vector<2048x128xf32>
    %10 = vector.shape_cast %9 : vector<2048x128xf32> to vector<32x64x128xf32>
    %11 = arith.truncf %10 : vector<32x64x128xf32> to vector<32x64x128xbf16>
    %c0_8 = arith.constant 0 : index
    %c0_9 = arith.constant 0 : index
    %c0_10 = arith.constant 0 : index
    %c0_11 = arith.constant 0 : index
    %12 = vector.load %arg5[%c0_8, %c0_9, %c0_10, %c0_11] : memref<1x32x64x128xbf16, #tpu.memory_space<vmem>>, vector<1x32x64x128xbf16>
    %13 = vector.shape_cast %12 : vector<1x32x64x128xbf16> to vector<32x64x128xbf16>
    %14 = vector.shape_cast %11 : vector<32x64x128xbf16> to vector<1x32x64x128xbf16>
    tpu.vector_store %arg5[%c0_8, %c0_9, %c0_10, %c0_11], %14 {strides = array<i32>} : memref<1x32x64x128xbf16, #tpu.memory_space<vmem>>, vector<1x32x64x128xbf16>,
    return
  }
  func.func @transform_0(%arg0: i32, %arg1: i32) -> (i32, i32, i32, i32) {
    %c0_i32 = arith.constant 0 : i32
    %c0_i32_0 = arith.constant 0 : i32
    %c0_i32_1 = arith.constant 0 : i32
    return %arg0, %arg1, %c0_i32, %c0_i32_0 : i32, i32, i32, i32
  }
  func.func @transform_1(%arg0: i32, %arg1: i32) -> (i32, i32) {
    %c0_i32 = arith.constant 0 : i32
    %c0_i32_0 = arith.constant 0 : i32
    %c0_i32_1 = arith.constant 0 : i32
    return %c0_i32, %c0_i32_0 : i32, i32
  }
  func.func @transform_2(%arg0: i32, %arg1: i32) -> (i32, i32) {
    %c0_i32 = arith.constant 0 : i32
    %c0_i32_0 = arith.constant 0 : i32
    %c0_i32_1 = arith.constant 0 : i32
    return %c0_i32, %c0_i32_0 : i32, i32
  }
  func.func @transform_3(%arg0: i32, %arg1: i32) -> (i32, i32, i32, i32) {
    %c0_i32 = arith.constant 0 : i32
    %c0_i32_0 = arith.constant 0 : i32
    %c0_i32_1 = arith.constant 0 : i32
    return %arg0, %arg1, %c0_i32, %c0_i32_0 : i32, i32, i32, i32
  }
}

</mosaic_0001>

<bundles_post_ra>
// kernel: tpu_custom_call.1
= control target key start
LH: loop header
LB: loop body
LE: loop exit
PB: predicated region body
PF: predicated region fallthrough
CT: control target
= control target key end

     0   :  { %8 = vsyncpa [#allocation3], 0  ;;  %s7284_s0 = inlined_call_operand.vmem [shape: bf16[2,64,64,27], index: 0, kind: input, shape index: {}]   ;;  %s7285_s1 = inlined_call_operand.vmem [shape: bf16[27,128], index: 1, kind: input, shape index: {}]   ;;  %s7286_s2 = inlined_call_operand.vmem [shape: f32[1,128], index: 2, kind: input, shape index: {}]   ;;  %s7287_s3 = inlined_call_operand.hbm [shape: bf16[2,64,64,128], index: 3, kind: output, shape index: {}]  }
   0x1   :  { %10 = vsyncpa [#allocation3 + $0x1], 0  ;;  %s6485_s12 = smov 0   ;;  %s6487_s13 = smov 0  }
   0x2   :  { %s6489_s14 = smov 0   ;;  %s6491_s15 = smov 0  }
   0x3   :  { %s6493_s16 = smov 0   ;;  %s6495_s17 = smov 0  }
   0x4   :  { %s6497_s18 = smov 0   ;;  %s6499_s19 = smov 0  }
   0x5 LB: > { %s4209_s20 = sadd.s32 4294967295, %s6459_s19   ;;  %s4210_s21 = sadd.s32 4294967294, %s6459_s19   ;;  %s6459_s19 = sphi %s6499_s19, %s16_s19   ;;  %s6455_s18 = sphi %s6497_s18, %s7296_s18   ;;  %s6451_s17 = sphi %s6495_s17, %s7295_s17   ;;  %s6447_s16 = sphi %s6493_s16, %s7294_s16   ;;  %s6443_s15 = sphi %s6491_s15, %s7293_s15   ;;  %s6439_s14 = sphi %s6489_s14, %s7292_s14   ;;  %s6435_s13 = sphi %s6487_s13, %s7291_s13   ;;  %s6431_s12 = sphi %s6485_s12, %s7290_s12  }
   0x6   : > { %s25_s22 = sadd.s32 1, %s6451_s17  ;;  %s28_s23 = sadd.s32 1, %s6455_s18 }
   0x7   : > { %p26_p0 = scmp.ge.s32.totalorder %s25_s22, 2  ;;  %p117_p1 = scmp.ne.s32.totalorder %s6439_s14, %s6435_s13 }
   0x8   : > { %p118_p2 = scmp.eq.s32.totalorder %s4209_s20, 3  ;;  %p123_p5 = scmp.ne.s32.totalorder %s6435_s13, %s6431_s12 }
   0x9   : > { %s7298_s22 = smov (%p26_p0, %s25_s22), 0  ;;  %s7300_s23 = smov (!%p26_p0, %s28_s23), %s6455_s18 }
   0xa   : > { %s103_s24 = ssub.s32 %s6451_s17, %s7298_s22  ;;  %p6536_p3 = por %p118_p2, %p117_p1 }
   0xb   : > { %p30_p4 = scmp.ge.s32.totalorder %s7300_s23, 2  ;;  %p124_p6 = scmp.eq.s32.totalorder %s4210_s21, 3 }
   0xc   : > { %p4213_p7 = scmp.ge.s32.totalorder %s6459_s19, 1  ;;  %p162_p9 = scmp.lt.s32.totalorder %s6459_s19, 5 }
   0xd   : > { %s7302_s23 = smov (%p30_p4, %s7300_s23), 0  ;;  %p6545_p8 = por %p124_p6, %p123_p5 }
   0xe   : > { %s102_s27 = ssub.s32 %s6455_s18, %s7302_s23  ;;  %s107_s28 = sadd.s32 1, %s6439_s14 }
   0xf   : > { %s104_s29 = sor.u32 %s103_s24, %s102_s27  ;;  %p163_p10 = pnand %p4213_p7, %p162_p9 }
  0x10   : > { %p105_p11 = scmp.eq.s32.totalorder %s104_s29, 0  ;;  %v6233_v0 = vld [vmem:[%s7285_s1] sm:$0xff] (!%p163_p10)   ;;  %vm1507_vm0 = vcmask (!%p163_p10), 1044480   ;;  %v6234_v1 = vld [vmem:[%s7285_s1 + $0x8] sm:$0x3f] (!%p163_p10)   ;;  %vm1508_vm1 = vcmask (!%p163_p10), 1045504  }
  0x11   : > { %166 = sbr.rel (%p163_p10) target bundleno = 517 (0x205), region = 32  ;;  %5895 = vmatprep.subr.bf16.mxu0 (!%p163_p10), %v6233_v0  ;;  %6155 = vmatprep.subr.bf16.mxu1 (!%p163_p10), %v6233_v0  ;;  %s4215_s8 = sshll.u32 (!%p163_p10), %s6443_s15, 5  ;;  %v6461_v2 = vmov (!%p163_p10), 65535   ;;  %vm1122_vm2 = vcmask (!%p163_p10), 220160  }
  0x12   : > { %s6554_s30 = scalar_select %p105_p11, %s6439_s14, %s107_s28  }
  0x13   : > { %p192_p12 = scmp.lt.s32.totalorder (!%p163_p10), %s6447_s16, 1  ;;  %5896 = vmatpush3.bf16.msra.mxu0 (!%p163_p10), %v6233_v0  ;;  %6157 = vmatpush3.bf16.msra.mxu1 (!%p163_p10), %v6233_v0  ;;  %v1509_v3 = vsel (!%p163_p10), %vm1507_vm0, 4294967295, %v6461_v2  ;;  %p194_p13 = scmp.lt.s32.totalorder (!%p163_p10), %s4215_s8, 63 }
  0x14   : > { %v1510_v4 = vsel (!%p163_p10), %vm1508_vm1, %v1509_v3, 0  ;;  %s188_s5 = sand.u32 (!%p163_p10), 1, %s6435_s13  }
  0x15   : > { %v1512_v5 = vand.u32 (!%p163_p10), %v6234_v1, %v1510_v4  ;;  %s4214_s6 = sshll.u32 (!%p163_p10), %s188_s5, 10  ;;  %s7232_s4 = scalar_lea.sflag (!%p163_p10), [#allocation3], %s188_s5 }
  0x16   : > { %s6814_s7 = scalar_lea.vmem (!%p163_p10), [#allocation2], %s4214_s6 }
  0x17   : > { %5897 = vmatprep.subr.bf16.mxu0 (!%p163_p10), %v1512_v5  ;;  %6156 = vmatprep.subr.bf16.mxu1 (!%p163_p10), %v1512_v5  ;;  %s4124_s24 = sshll.u32 (!%p163_p10), %s6814_s7, 4  ;;  %s7224_s24 = int_to_ptr.vmem [resolvable:$true] %s4124_s24 }
  0x18   : > { %s193_s9 = scalar_select %p192_p12, %s6447_s16, 1  ;;  %5898 = vmatpush3.bf16.msra.mxu0 %v1512_v5  ;;  %6158 = vmatpush3.bf16.msra.mxu1 %v1512_v5 }
  0x19   : > { %s7304_s8 = smov (!%p194_p13, %s4215_s8), 63  ;;  %s6365_s6 = scalar_lea.vmem %s7224_s24, 16384 }
  0x1a   : > { %s4217_s10 = sshll.u32 %s193_s9, 9  ;;  %s4216_s11 = sshll.u32 %s7304_s8, 3 }
  0x1b   : > { %s198_s20 = sadd.s32 %s4217_s10, %s4216_s11  ;;  %s4997_s10 = sshll.u32 %s6443_s15, 8 }
  0x1c   : > { %s4218_s21 = sshll.u32 %s198_s20, 2  ;;  %s4737_s11 = sshll.u32 %s6447_s16, 9 }
  0x1d   : > { %s6568_s28 = scalar_lea.vmem %s7284_s0, %s4218_s21  ;;  %s4121_s15 = sadd.s32 %s4997_s10, %s4737_s11 }
  0x1e   : > { %v6235_v6 = vld [vmem:[%s6568_s28] sm:$0xff]   ;;  %v6237_v8 = vld [vmem:[%s6568_s28 + $0x8] sm:$0xff]   ;;  %v6239_v10 = vld [vmem:[%s6568_s28 + $0x10] sm:$0xff]   ;;  %s4738_s16 = sshll.u32 %s4121_s15, 6  ;;  %p6366_p0 = scmp.ne.s32.totalorder %s7224_s24, %s6365_s6 }
  0x1f   : > { %v6236_v7 = vld [vmem:[%s6568_s28 + $0x200] sm:$0xff]   ;;  %5899 = vmatprep.mubr.msk.bf16.mxu0 %vm1122_vm2, %v6235_v6  ;;  %v6238_v9 = vld [vmem:[%s6568_s28 + $0x208] sm:$0xff]   ;;  %v6240_v11 = vld [vmem:[%s6568_s28 + $0x210] sm:$0xff]   ;;  %s7222_s29 = scalar_lea.hbm %s7287_s3, %s4738_s16  ;;  %s6462_s8 = smov [#allocation2]  }
  0x20   : > { %6027 = vmatprep.mubr.msk.bf16.mxu1 %vm1122_vm2, %v6236_v7  ;;  %5900 = vmatmul.mubr.msk.bf16.vlgmr.msra.gmra.mrb[0].mxu0 %vm1122_vm2, %v6237_v8  ;;  %v6241_v12 = vld [vmem:[%s6568_s28 + $0x18] sm:$0xff]   ;;  %v6243_v14 = vld [vmem:[%s6568_s28 + $0x20] sm:$0xff]   ;;  %v6245_v16 = vld [vmem:[%s6568_s28 + $0x28] sm:$0xff]   ;;  %p6367_p1 = pnand %p6366_p0, %p6536_p3  ;;  %s6369_s9 = sshll.u32 %s6462_s8, 4  ;;  %s6370_s9 = int_to_ptr.vmem [resolvable:$false] %s6369_s9 }
  0x21   : > { %6028 = vmatmul.mubr.msk.bf16.vlgmr.msra.gmra.mrb[0].mxu1 %vm1122_vm2, %v6238_v9  ;;  %5903 = vmatprep.mubr.msk.bf16.mxu0 %vm1122_vm2, %v6239_v10  ;;  %v6242_v13 = vld [vmem:[%s6568_s28 + $0x218] sm:$0xff]   ;;  %v6244_v15 = vld [vmem:[%s6568_s28 + $0x220] sm:$0xff]   ;;  %v6246_v17 = vld [vmem:[%s6568_s28 + $0x228] sm:$0xff]   ;;  %s6371_s10 = scalar_lea.vmem %s6370_s9, 32768  ;;  %p6372_p4 = scmp.lt.s32.totalorder %s7224_s24, %s6370_s9 }
  0x22   : > { %6031 = vmatprep.mubr.msk.bf16.mxu1 %vm1122_vm2, %v6240_v11  ;;  %v6247_v18 = vld [vmem:[%s6568_s28 + $0x30] sm:$0xff]   ;;  %v6249_v20 = vld [vmem:[%s6568_s28 + $0x38] sm:$0xff]   ;;  %v6251_v22 = vld [vmem:[%s6568_s28 + $0x40] sm:$0xff]   ;;  %p6368_p2 = pneg %p6367_p1  ;;  %p6373_p5 = scmp.lt.s32.totalorder %s6371_s10, %s6365_s6 }
  0x23   : > { %v6248_v19 = vld [vmem:[%s6568_s28 + $0x230] sm:$0xff]   ;;  %v6250_v21 = vld [vmem:[%s6568_s28 + $0x238] sm:$0xff]   ;;  %v6252_v23 = vld [vmem:[%s6568_s28 + $0x240] sm:$0xff]  }
  0x24   : > { %v6253_v24 = vld [vmem:[%s6568_s28 + $0x48] sm:$0xff]   ;;  %v6255_v26 = vld [vmem:[%s6568_s28 + $0x50] sm:$0xff]   ;;  %v6257_v28 = vld [vmem:[%s6568_s28 + $0x58] sm:$0xff]   ;;  %p6374_p6 = por %p6373_p5, %p6372_p4 }
  0x25   : > { %v6254_v25 = vld [vmem:[%s6568_s28 + $0x248] sm:$0xff]   ;;  %v6256_v27 = vld [vmem:[%s6568_s28 + $0x250] sm:$0xff]   ;;  %v6258_v29 = vld [vmem:[%s6568_s28 + $0x258] sm:$0xff]  }
  0x26   : > { %v6259_v30 = vld [vmem:[%s6568_s28 + $0x60] sm:$0xff]   ;;  %v6261_v32 = vld [vmem:[%s6568_s28 + $0x68] sm:$0xff]   ;;  %v6263_v34 = vld [vmem:[%s6568_s28 + $0x70] sm:$0xff]   ;;  %p6375_p7 = pnand %p6374_p6, %p6368_p2 }
  0x27   : > { %v6260_v31 = vld [vmem:[%s6568_s28 + $0x260] sm:$0xff]   ;;  %v6262_v33 = vld [vmem:[%s6568_s28 + $0x268] sm:$0xff]   ;;  %v6264_v35 = vld [vmem:[%s6568_s28 + $0x270] sm:$0xff]  }
  0x28   : > { %5904 = vmatmul.mubr.msk.bf16.gmra.mrb[4].mxu0 %vm1122_vm2, %v6241_v12  ;;  %v6265_v36 = vld [vmem:[%s6568_s28 + $0x78] sm:$0xff]   ;;  %v6267_v38 = vld [vmem:[%s6568_s28 + $0x80] sm:$0xff]   ;;  %v6269_v40 = vld [vmem:[%s6568_s28 + $0x88] sm:$0xff]  }
  0x29   : > { %6032 = vmatmul.mubr.msk.bf16.gmra.mrb[4].mxu1 %vm1122_vm2, %v6242_v13  ;;  %5907 = vmatprep.mubr.msk.bf16.mxu0 %vm1122_vm2, %v6243_v14  ;;  %v6266_v37 = vld [vmem:[%s6568_s28 + $0x278] sm:$0xff]   ;;  %v6268_v39 = vld [vmem:[%s6568_s28 + $0x280] sm:$0xff]   ;;  %v6270_v41 = vld [vmem:[%s6568_s28 + $0x288] sm:$0xff]  }
  0x2a   : > { %6035 = vmatprep.mubr.msk.bf16.mxu1 %vm1122_vm2, %v6244_v15  ;;  %v6271_v42 = vld [vmem:[%s6568_s28 + $0x90] sm:$0xff]   ;;  %v6273_v44 = vld [vmem:[%s6568_s28 + $0x98] sm:$0xff]   ;;  %v6275_v46 = vld [vmem:[%s6568_s28 + $0xa0] sm:$0xff]  }
  0x2b   : > { %v6272_v43 = vld [vmem:[%s6568_s28 + $0x290] sm:$0xff]   ;;  %v6274_v45 = vld [vmem:[%s6568_s28 + $0x298] sm:$0xff]   ;;  %v6276_v47 = vld [vmem:[%s6568_s28 + $0x2a0] sm:$0xff]  }
  0x2c   : > { %v6277_v48 = vld [vmem:[%s6568_s28 + $0xa8] sm:$0xff]   ;;  %v6279_v50 = vld [vmem:[%s6568_s28 + $0xb0] sm:$0xff]   ;;  %v6281_v52 = vld [vmem:[%s6568_s28 + $0xb8] sm:$0xff]  }
  0x2d   : > { %v6278_v49 = vld [vmem:[%s6568_s28 + $0x2a8] sm:$0xff]   ;;  %v6280_v51 = vld [vmem:[%s6568_s28 + $0x2b0] sm:$0xff]   ;;  %v6282_v53 = vld [vmem:[%s6568_s28 + $0x2b8] sm:$0xff]  }
  0x2e   : > { %v6283_v54 = vld [vmem:[%s6568_s28 + $0xc0] sm:$0xff]   ;;  %v6285_v56 = vld [vmem:[%s6568_s28 + $0xc8] sm:$0xff]   ;;  %v6287_v58 = vld [vmem:[%s6568_s28 + $0xd0] sm:$0xff]  }
  0x2f   : > { %v6284_v55 = vld [vmem:[%s6568_s28 + $0x2c0] sm:$0xff]   ;;  %v6286_v57 = vld [vmem:[%s6568_s28 + $0x2c8] sm:$0xff]   ;;  %v6288_v59 = vld [vmem:[%s6568_s28 + $0x2d0] sm:$0xff]  }
  0x30   : > { %5908 = vmatmul.mubr.msk.bf16.gmra.mrb[8].mxu0 %vm1122_vm2, %v6245_v16  ;;  %v6289_v60 = vld [vmem:[%s6568_s28 + $0xd8] sm:$0xff]   ;;  %v6291_v62 = vld [vmem:[%s6568_s28 + $0xe0] sm:$0xff]   ;;  %v6293_v0 = vld [vmem:[%s6568_s28 + $0xe8] sm:$0xff]  }
  0x31   : > { %6036 = vmatmul.mubr.msk.bf16.gmra.mrb[8].mxu1 %vm1122_vm2, %v6246_v17  ;;  %5911 = vmatprep.mubr.msk.bf16.mxu0 %vm1122_vm2, %v6247_v18  ;;  %v6290_v61 = vld [vmem:[%s6568_s28 + $0x2d8] sm:$0xff]   ;;  %v6292_v63 = vld [vmem:[%s6568_s28 + $0x2e0] sm:$0xff]   ;;  %v6294_v1 = vld [vmem:[%s6568_s28 + $0x2e8] sm:$0xff]  }
  0x32   : > { %6039 = vmatprep.mubr.msk.bf16.mxu1 %vm1122_vm2, %v6248_v19  ;;  %v6295_v2 = vld [vmem:[%s6568_s28 + $0xf0] sm:$0xff]   ;;  %v6297_v4 = vld [vmem:[%s6568_s28 + $0xf8] sm:$0xff]   ;;  %v6299_v6 = vld [vmem:[%s6568_s28 + $0x100] sm:$0xff]  }
  0x33   : > { %v6296_v3 = vld [vmem:[%s6568_s28 + $0x2f0] sm:$0xff]   ;;  %v6298_v5 = vld [vmem:[%s6568_s28 + $0x2f8] sm:$0xff]   ;;  %v6300_v7 = vld [vmem:[%s6568_s28 + $0x300] sm:$0xff]  }
  0x34   : > { %v6301_v8 = vld [vmem:[%s6568_s28 + $0x108] sm:$0xff]   ;;  %v6303_v10 = vld [vmem:[%s6568_s28 + $0x110] sm:$0xff]   ;;  %v6305_v12 = vld [vmem:[%s6568_s28 + $0x118] sm:$0xff]  }
  0x35   : > { %v6302_v9 = vld [vmem:[%s6568_s28 + $0x308] sm:$0xff]   ;;  %v6304_v11 = vld [vmem:[%s6568_s28 + $0x310] sm:$0xff]   ;;  %v6306_v13 = vld [vmem:[%s6568_s28 + $0x318] sm:$0xff]  }
  0x36   : > { %v6307_v14 = vld [vmem:[%s6568_s28 + $0x120] sm:$0xff]   ;;  %v6309_v16 = vld [vmem:[%s6568_s28 + $0x128] sm:$0xff]   ;;  %v6311_v18 = vld [vmem:[%s6568_s28 + $0x130] sm:$0xff]  }
  0x37   : > { %v6308_v15 = vld [vmem:[%s6568_s28 + $0x320] sm:$0xff]   ;;  %v6310_v17 = vld [vmem:[%s6568_s28 + $0x328] sm:$0xff]   ;;  %v6312_v19 = vld [vmem:[%s6568_s28 + $0x330] sm:$0xff]  }
  0x38   : > { %5912 = vmatmul.mubr.msk.bf16.gmra.mrb[12].mxu0 %vm1122_vm2, %v6249_v20  ;;  %v6313_v20 = vld [vmem:[%s6568_s28 + $0x138] sm:$0xff]  }
  0x39   : > { %6040 = vmatmul.mubr.msk.bf16.gmra.mrb[12].mxu1 %vm1122_vm2, %v6250_v21  ;;  %5915 = vmatprep.mubr.msk.bf16.mxu0 %vm1122_vm2, %v6251_v22  ;;  %v6314_v21 = vld [vmem:[%s6568_s28 + $0x338] sm:$0xff]   ;;  %v6315_v22 = vld [vmem:[%s6568_s28 + $0x140] sm:$0xff]  }
  0x3a   : > { %6043 = vmatprep.mubr.msk.bf16.mxu1 %vm1122_vm2, %v6252_v23  ;;  %v6316_v23 = vld [vmem:[%s6568_s28 + $0x340] sm:$0xff]  }
  0x40   : > { %5916 = vmatmul.mubr.msk.bf16.gmra.mrb[16].mxu0 %vm1122_vm2, %v6253_v24  ;;  %v6317_v24 = vld [vmem:[%s6568_s28 + $0x148] sm:$0xff]  }
  0x41   : > { %6044 = vmatmul.mubr.msk.bf16.gmra.mrb[16].mxu1 %vm1122_vm2, %v6254_v25  ;;  %5919 = vmatprep.mubr.msk.bf16.mxu0 %vm1122_vm2, %v6255_v26  ;;  %v6318_v25 = vld [vmem:[%s6568_s28 + $0x348] sm:$0xff]   ;;  %v6319_v26 = vld [vmem:[%s6568_s28 + $0x150] sm:$0xff]  }
  0x42   : > { %6047 = vmatprep.mubr.msk.bf16.mxu1 %vm1122_vm2, %v6256_v27  ;;  %v6320_v27 = vld [vmem:[%s6568_s28 + $0x350] sm:$0xff]  }
  0x48   : > { %5920 = vmatmul.mubr.msk.bf16.gmra.mrb[20].mxu0 %vm1122_vm2, %v6257_v28  ;;  %v6321_v28 = vld [vmem:[%s6568_s28 + $0x158] sm:$0xff]  }
  0x49   : > { %6048 = vmatmul.mubr.msk.bf16.gmra.mrb[20].mxu1 %vm1122_vm2, %v6258_v29  ;;  %5923 = vmatprep.mubr.msk.bf16.mxu0 %vm1122_vm2, %v6259_v30  ;;  %v6322_v29 = vld [vmem:[%s6568_s28 + $0x358] sm:$0xff]   ;;  %v6323_v30 = vld [vmem:[%s6568_s28 + $0x160] sm:$0xff]  }
  0x4a   : > { %6051 = vmatprep.mubr.msk.bf16.mxu1 %vm1122_vm2, %v6260_v31  ;;  %v6324_v31 = vld [vmem:[%s6568_s28 + $0x360] sm:$0xff]  }
  0x50   : > { %5924 = vmatmul.mubr.msk.bf16.gmra.mrb[24].mxu0 %vm1122_vm2, %v6261_v32  ;;  %v6325_v32 = vld [vmem:[%s6568_s28 + $0x168] sm:$0xff]  }
  0x51   : > { %6052 = vmatmul.mubr.msk.bf16.gmra.mrb[24].mxu1 %vm1122_vm2, %v6262_v33  ;;  %5927 = vmatprep.mubr.msk.bf16.mxu0 %vm1122_vm2, %v6263_v34  ;;  %v6326_v33 = vld [vmem:[%s6568_s28 + $0x368] sm:$0xff]   ;;  %v6327_v34 = vld [vmem:[%s6568_s28 + $0x170] sm:$0xff]  }
  0x52   : > { %6055 = vmatprep.mubr.msk.bf16.mxu1 %vm1122_vm2, %v6264_v35  ;;  %v6328_v35 = vld [vmem:[%s6568_s28 + $0x370] sm:$0xff]  }
  0x58   : > { %5928 = vmatmul.mubr.msk.bf16.gmra.mrb[28].mxu0 %vm1122_vm2, %v6265_v36  ;;  %v6329_v36 = vld [vmem:[%s6568_s28 + $0x178] sm:$0xff]  }
  0x59   : > { %6056 = vmatmul.mubr.msk.bf16.gmra.mrb[28].mxu1 %vm1122_vm2, %v6266_v37  ;;  %5931 = vmatprep.mubr.msk.bf16.mxu0 %vm1122_vm2, %v6267_v38  ;;  %v6330_v37 = vld [vmem:[%s6568_s28 + $0x378] sm:$0xff]   ;;  %v6331_v38 = vld [vmem:[%s6568_s28 + $0x180] sm:$0xff]  }
  0x5a   : > { %6059 = vmatprep.mubr.msk.bf16.mxu1 %vm1122_vm2, %v6268_v39  ;;  %v6332_v39 = vld [vmem:[%s6568_s28 + $0x380] sm:$0xff]  }
  0x60   : > { %5932 = vmatmul.mubr.msk.bf16.gmra.mrb[32].mxu0 %vm1122_vm2, %v6269_v40  ;;  %v6333_v40 = vld [vmem:[%s6568_s28 + $0x188] sm:$0xff]  }
  0x61   : > { %6060 = vmatmul.mubr.msk.bf16.gmra.mrb[32].mxu1 %vm1122_vm2, %v6270_v41  ;;  %5935 = vmatprep.mubr.msk.bf16.mxu0 %vm1122_vm2, %v6271_v42  ;;  %v6334_v41 = vld [vmem:[%s6568_s28 + $0x388] sm:$0xff]   ;;  %v6335_v42 = vld [vmem:[%s6568_s28 + $0x190] sm:$0xff]  }
  0x62   : > { %6063 = vmatprep.mubr.msk.bf16.mxu1 %vm1122_vm2, %v6272_v43  ;;  %v6336_v43 = vld [vmem:[%s6568_s28 + $0x390] sm:$0xff]  }
  0x68   : > { %5936 = vmatmul.mubr.msk.bf16.gmra.mrb[36].mxu0 %vm1122_vm2, %v6273_v44  ;;  %v6337_v44 = vld [vmem:[%s6568_s28 + $0x198] sm:$0xff]  }
  0x69   : > { %6064 = vmatmul.mubr.msk.bf16.gmra.mrb[36].mxu1 %vm1122_vm2, %v6274_v45  ;;  %5939 = vmatprep.mubr.msk.bf16.mxu0 %vm1122_vm2, %v6275_v46  ;;  %v6338_v45 = vld [vmem:[%s6568_s28 + $0x398] sm:$0xff]   ;;  %v6339_v46 = vld [vmem:[%s6568_s28 + $0x1a0] sm:$0xff]  }
  0x6a   : > { %6067 = vmatprep.mubr.msk.bf16.mxu1 %vm1122_vm2, %v6276_v47  ;;  %v6340_v47 = vld [vmem:[%s6568_s28 + $0x3a0] sm:$0xff]  }
  0x70   : > { %5940 = vmatmul.mubr.msk.bf16.gmra.mrb[40].mxu0 %vm1122_vm2, %v6277_v48  ;;  %v6341_v48 = vld [vmem:[%s6568_s28 + $0x1a8] sm:$0xff]  }
  0x71   : > { %6068 = vmatmul.mubr.msk.bf16.gmra.mrb[40].mxu1 %vm1122_vm2, %v6278_v49  ;;  %5943 = vmatprep.mubr.msk.bf16.mxu0 %vm1122_vm2, %v6279_v50  ;;  %v6342_v49 = vld [vmem:[%s6568_s28 + $0x3a8] sm:$0xff]   ;;  %v6343_v50 = vld [vmem:[%s6568_s28 + $0x1b0] sm:$0xff]  }
  0x72   : > { %6071 = vmatprep.mubr.msk.bf16.mxu1 %vm1122_vm2, %v6280_v51  ;;  %v6344_v51 = vld [vmem:[%s6568_s28 + $0x3b0] sm:$0xff]  }
  0x78   : > { %5944 = vmatmul.mubr.msk.bf16.gmra.mrb[44].mxu0 %vm1122_vm2, %v6281_v52  ;;  %v6791_v52 = vld [vmem:[%s7286_s2] ss:$0 sm:$0xff] }
  0x79   : > { %6072 = vmatmul.mubr.msk.bf16.gmra.mrb[44].mxu1 %vm1122_vm2, %v6282_v53  ;;  %5947 = vmatprep.mubr.msk.bf16.mxu0 %vm1122_vm2, %v6283_v54 }
  0x7a   : > { %6075 = vmatprep.mubr.msk.bf16.mxu1 %vm1122_vm2, %v6284_v55 }
  0x80   : > { %5948 = vmatmul.mubr.msk.bf16.gmra.mrb[48].mxu0 %vm1122_vm2, %v6285_v56 }
  0x81   : > { %6076 = vmatmul.mubr.msk.bf16.gmra.mrb[48].mxu1 %vm1122_vm2, %v6286_v57  ;;  %5951 = vmatprep.mubr.msk.bf16.mxu0 %vm1122_vm2, %v6287_v58  ;;  %v6345_v57 = vld [vmem:[%s6568_s28 + $0x1b8] sm:$0xff]  }
  0x82   : > { %6079 = vmatprep.mubr.msk.bf16.mxu1 %vm1122_vm2, %v6288_v59 }
  0x88   : > { %5952 = vmatmul.mubr.msk.bf16.gmra.mrb[52].mxu0 %vm1122_vm2, %v6289_v60 }
  0x89   : > { %6080 = vmatmul.mubr.msk.bf16.gmra.mrb[52].mxu1 %vm1122_vm2, %v6290_v61  ;;  %5955 = vmatprep.mubr.msk.bf16.mxu0 %vm1122_vm2, %v6291_v62  ;;  %v6346_v62 = vld [vmem:[%s6568_s28 + $0x3b8] sm:$0xff]  }
  0x8a   : > { %6083 = vmatprep.mubr.msk.bf16.mxu1 %vm1122_vm2, %v6292_v63  ;;  %v6347_v63 = vld [vmem:[%s6568_s28 + $0x1c0] sm:$0xff]  }
  0x90   : > { %5956 = vmatmul.mubr.msk.bf16.gmra.mrb[56].mxu0 %vm1122_vm2, %v6293_v0 }
  0x91   : > { %6084 = vmatmul.mubr.msk.bf16.gmra.mrb[56].mxu1 %vm1122_vm2, %v6294_v1  ;;  %5959 = vmatprep.mubr.msk.bf16.mxu0 %vm1122_vm2, %v6295_v2 }
  0x92   : > { %6087 = vmatprep.mubr.msk.bf16.mxu1 %vm1122_vm2, %v6296_v3 }
  0x98   : > { %5960 = vmatmul.mubr.msk.bf16.gmra.mrb[60].mxu0 %vm1122_vm2, %v6297_v4  ;;  %v6348_v4 = vld [vmem:[%s6568_s28 + $0x3c0] sm:$0xff]  }
  0x99   : > { %6088 = vmatmul.mubr.msk.bf16.gmra.mrb[60].mxu1 %vm1122_vm2, %v6298_v5  ;;  %5963 = vmatprep.mubr.msk.bf16.mxu0 %vm1122_vm2, %v6299_v6 }
  0x9a   : > { %6091 = vmatprep.mubr.msk.bf16.mxu1 %vm1122_vm2, %v6300_v7 }
  0xa0   : > { %5964 = vmatmul.mubr.msk.bf16.gmra.mrb[64].mxu0 %vm1122_vm2, %v6301_v8 }
  0xa1   : > { %6092 = vmatmul.mubr.msk.bf16.gmra.mrb[64].mxu1 %vm1122_vm2, %v6302_v9  ;;  %5967 = vmatprep.mubr.msk.bf16.mxu0 %vm1122_vm2, %v6303_v10 }
  0xa2   : > { %6095 = vmatprep.mubr.msk.bf16.mxu1 %vm1122_vm2, %v6304_v11 }
  0xa8   : > { %5968 = vmatmul.mubr.msk.bf16.gmra.mrb[68].mxu0 %vm1122_vm2, %v6305_v12 }
  0xa9   : > { %6096 = vmatmul.mubr.msk.bf16.gmra.mrb[68].mxu1 %vm1122_vm2, %v6306_v13  ;;  %5971 = vmatprep.mubr.msk.bf16.mxu0 %vm1122_vm2, %v6307_v14 }
  0xaa   : > { %6099 = vmatprep.mubr.msk.bf16.mxu1 %vm1122_vm2, %v6308_v15 }
  0xb0   : > { %5972 = vmatmul.mubr.msk.bf16.gmra.mrb[72].mxu0 %vm1122_vm2, %v6309_v16 }
  0xb1   : > { %6100 = vmatmul.mubr.msk.bf16.gmra.mrb[72].mxu1 %vm1122_vm2, %v6310_v17  ;;  %5975 = vmatprep.mubr.msk.bf16.mxu0 %vm1122_vm2, %v6311_v18 }
  0xb2   : > { %6103 = vmatprep.mubr.msk.bf16.mxu1 %vm1122_vm2, %v6312_v19 }
  0xb8   : > { %5976 = vmatmul.mubr.msk.bf16.gmra.mrb[76].mxu0 %vm1122_vm2, %v6313_v20 }
  0xb9   : > { %6104 = vmatmul.mubr.msk.bf16.gmra.mrb[76].mxu1 %vm1122_vm2, %v6314_v21  ;;  %5979 = vmatprep.mubr.msk.bf16.mxu0 %vm1122_vm2, %v6315_v22 }
  0xba   : > { %6107 = vmatprep.mubr.msk.bf16.mxu1 %vm1122_vm2, %v6316_v23 }
  0xc0   : > { %5980 = vmatmul.mubr.msk.bf16.gmra.mrb[80].mxu0 %vm1122_vm2, %v6317_v24 }
  0xc1   : > { %6108 = vmatmul.mubr.msk.bf16.gmra.mrb[80].mxu1 %vm1122_vm2, %v6318_v25  ;;  %5983 = vmatprep.mubr.msk.bf16.mxu0 %vm1122_vm2, %v6319_v26  ;;  %v6349_v25 = vld [vmem:[%s6568_s28 + $0x1c8] sm:$0xff]  }
  0xc2   : > { %6111 = vmatprep.mubr.msk.bf16.mxu1 %vm1122_vm2, %v6320_v27 }
  0xc8   : > { %5984 = vmatmul.mubr.msk.bf16.gmra.mrb[84].mxu0 %vm1122_vm2, %v6321_v28 }
  0xc9   : > { %6112 = vmatmul.mubr.msk.bf16.gmra.mrb[84].mxu1 %vm1122_vm2, %v6322_v29  ;;  %5987 = vmatprep.mubr.msk.bf16.mxu0 %vm1122_vm2, %v6323_v30  ;;  %v6350_v30 = vld [vmem:[%s6568_s28 + $0x3c8] sm:$0xff]  }
  0xca   : > { %6115 = vmatprep.mubr.msk.bf16.mxu1 %vm1122_vm2, %v6324_v31  ;;  %v6351_v31 = vld [vmem:[%s6568_s28 + $0x1d0] sm:$0xff]  }
  0xd0   : > { %5988 = vmatmul.mubr.msk.bf16.gmra.mrb[88].mxu0 %vm1122_vm2, %v6325_v32 }
  0xd1   : > { %6116 = vmatmul.mubr.msk.bf16.gmra.mrb[88].mxu1 %vm1122_vm2, %v6326_v33  ;;  %5991 = vmatprep.mubr.msk.bf16.mxu0 %vm1122_vm2, %v6327_v34 }
  0xd2   : > { %6119 = vmatprep.mubr.msk.bf16.mxu1 %vm1122_vm2, %v6328_v35 }
  0xd8   : > { %5992 = vmatmul.mubr.msk.bf16.gmra.mrb[92].mxu0 %vm1122_vm2, %v6329_v36  ;;  %v6352_v36 = vld [vmem:[%s6568_s28 + $0x3d0] sm:$0xff]  }
  0xd9   : > { %6120 = vmatmul.mubr.msk.bf16.gmra.mrb[92].mxu1 %vm1122_vm2, %v6330_v37  ;;  %5995 = vmatprep.mubr.msk.bf16.mxu0 %vm1122_vm2, %v6331_v38 }
  0xda   : > { %6123 = vmatprep.mubr.msk.bf16.mxu1 %vm1122_vm2, %v6332_v39 }
  0xe0   : > { %5996 = vmatmul.mubr.msk.bf16.gmra.mrb[96].mxu0 %vm1122_vm2, %v6333_v40 }
  0xe1   : > { %6124 = vmatmul.mubr.msk.bf16.gmra.mrb[96].mxu1 %vm1122_vm2, %v6334_v41  ;;  %5999 = vmatprep.mubr.msk.bf16.mxu0 %vm1122_vm2, %v6335_v42 }
  0xe2   : > { %6127 = vmatprep.mubr.msk.bf16.mxu1 %vm1122_vm2, %v6336_v43 }
  0xe8   : > { %6000 = vmatmul.mubr.msk.bf16.gmra.mrb[100].mxu0 %vm1122_vm2, %v6337_v44 }
  0xe9   : > { %6128 = vmatmul.mubr.msk.bf16.gmra.mrb[100].mxu1 %vm1122_vm2, %v6338_v45  ;;  %6003 = vmatprep.mubr.msk.bf16.mxu0 %vm1122_vm2, %v6339_v46 }
  0xea   : > { %6131 = vmatprep.mubr.msk.bf16.mxu1 %vm1122_vm2, %v6340_v47 }
  0xf0   : > { %6004 = vmatmul.mubr.msk.bf16.gmra.mrb[104].mxu0 %vm1122_vm2, %v6341_v48 }
  0xf1   : > { %6132 = vmatmul.mubr.msk.bf16.gmra.mrb[104].mxu1 %vm1122_vm2, %v6342_v49  ;;  %6007 = vmatprep.mubr.msk.bf16.mxu0 %vm1122_vm2, %v6343_v50 }
  0xf2   : > { %6135 = vmatprep.mubr.msk.bf16.mxu1 %vm1122_vm2, %v6344_v51 }
  0xf3   : > { %v5901_v53 = vpop.f32.mrb[0].mxu0 }
  0xf4   : > { %v1557_v54 = vadd.f32 %v5901_v53, %v6791_v52  ;;  %v6029_v55 = vpop.f32.mrb[0].mxu1  ;;  %v1548_v56 = vpop.f32.mrb[1].mxu0 }
  0xf5   : > { %v2069_v58 = vadd.f32 %v6029_v55, %v6791_v52  ;;  %v1549_v59 = vadd.f32 %v6791_v52, %v1548_v56  ;;  %v2060_v60 = vpop.f32.mrb[1].mxu1  ;;  %v5902_v61 = vpop.f32.mrb[2].mxu0 }
  0xf6   : > { %v2061_v0 = vadd.f32 %v6791_v52, %v2060_v60  ;;  %v1560_v1 = vadd.f32 %v5902_v61, %v6791_v52  ;;  %v6030_v2 = vpop.f32.mrb[2].mxu1  ;;  %v1551_v3 = vpop.f32.mrb[3].mxu0  ;;  %v2573_v8 = vmax.f32 %v1557_v54, 0.0 }
  0xf7   : > { %v2072_v5 = vadd.f32 %v6030_v2, %v6791_v52  ;;  %v1552_v6 = vadd.f32 %v6791_v52, %v1551_v3  ;;  %v2063_v7 = vpop.f32.mrb[3].mxu1  ;;  %v2701_v11 = vmax.f32 %v2069_v58, 0.0  ;;  %v2571_v12 = vmax.f32 %v1549_v59, 0.0  ;;  %v6353_v58 = vld [vmem:[%s6568_s28 + $0x1d8] sm:$0xff]  }
  0xf8   : > { %v2574_v9 = vmax.f32 %v1560_v1, 0.0  ;;  %v2064_v10 = vadd.f32 %v6791_v52, %v2063_v7  ;;  %6008 = vmatmul.mubr.msk.bf16.gmra.mrb[108].mxu0 %vm1122_vm2, %v6345_v57  ;;  %v2699_v15 = vmax.f32 %v2061_v0, 0.0  ;;  %v6355_v0 = vld [vmem:[%s6568_s28 + $0x1e0] sm:$0xff]  }
  0xf9   : > { %v2702_v13 = vmax.f32 %v2072_v5, 0.0  ;;  %v2572_v14 = vmax.f32 %v1552_v6, 0.0  ;;  %6136 = vmatmul.mubr.msk.bf16.gmra.mrb[108].mxu1 %vm1122_vm2, %v6346_v62  ;;  %6011 = vmatprep.mubr.msk.bf16.mxu0 %vm1122_vm2, %v6347_v63  ;;  %v6354_v63 = vld [vmem:[%s6568_s28 + $0x3d8] sm:$0xff]   ;;  %v6356_v5 = vld [vmem:[%s6568_s28 + $0x3e0] sm:$0xff]  }
  0xfa   : > { %v5006_v16 = vpack.c.bf16 %v2574_v9, %v2573_v8  ;;  %v2700_v17 = vmax.f32 %v2064_v10, 0.0  ;;  %6139 = vmatprep.mubr.msk.bf16.mxu1 %vm1122_vm2, %v6348_v4 }
  0xfb   : > { %v5326_v18 = vpack.c.bf16 %v2702_v13, %v2701_v11  ;;  %v5001_v19 = vpack.c.bf16 %v2572_v14, %v2571_v12  ;;  %v5905_v20 = vpop.f32.mrb[4].mxu0 }
  0xfc   : > { %5638 = vst [vmem:[%s6814_s7 + $0x8] sm:$0xff] %v5006_v16   ;;  %v5321_v21 = vpack.c.bf16 %v2700_v17, %v2699_v15  ;;  %v1573_v22 = vadd.f32 %v5905_v20, %v6791_v52  ;;  %v6033_v23 = vpop.f32.mrb[4].mxu1  ;;  %v1564_v24 = vpop.f32.mrb[5].mxu0 }
  0xfd   : > { %5702 = vst [vmem:[%s6814_s7 + $0x208] sm:$0xff] %v5326_v18   ;;  %5002 = vst [vmem:[%s6814_s7] sm:$0xff] %v5001_v19   ;;  %v2085_v26 = vadd.f32 %v6033_v23, %v6791_v52  ;;  %v1565_v27 = vadd.f32 %v6791_v52, %v1564_v24  ;;  %v2076_v28 = vpop.f32.mrb[5].mxu1  ;;  %v5906_v29 = vpop.f32.mrb[6].mxu0 }
  0xfe   : > { %5701 = vst [vmem:[%s6814_s7 + $0x200] sm:$0xff] %v5321_v21   ;;  %v2077_v32 = vadd.f32 %v6791_v52, %v2076_v28  ;;  %v1576_v33 = vadd.f32 %v5906_v29, %v6791_v52  ;;  %v6034_v34 = vpop.f32.mrb[6].mxu1  ;;  %v1567_v35 = vpop.f32.mrb[7].mxu0  ;;  %v2577_v40 = vmax.f32 %v1573_v22, 0.0 }
  0xff   : > { %v2088_v37 = vadd.f32 %v6034_v34, %v6791_v52  ;;  %v1568_v38 = vadd.f32 %v6791_v52, %v1567_v35  ;;  %v2079_v39 = vpop.f32.mrb[7].mxu1  ;;  %v2705_v43 = vmax.f32 %v2085_v26, 0.0  ;;  %v2575_v44 = vmax.f32 %v1565_v27, 0.0  ;;  %v6357_v26 = vld [vmem:[%s6568_s28 + $0x1e8] sm:$0xff]  }
 0x100   : > { %v2578_v41 = vmax.f32 %v1576_v33, 0.0  ;;  %v2080_v42 = vadd.f32 %v6791_v52, %v2079_v39  ;;  %6012 = vmatmul.mubr.msk.bf16.gmra.mrb[112].mxu0 %vm1122_vm2, %v6349_v25  ;;  %v2703_v47 = vmax.f32 %v2077_v32, 0.0  ;;  %v6359_v32 = vld [vmem:[%s6568_s28 + $0x1f0] sm:$0xff]  }
 0x101   : > { %v2706_v45 = vmax.f32 %v2088_v37, 0.0  ;;  %v2576_v46 = vmax.f32 %v1568_v38, 0.0  ;;  %6140 = vmatmul.mubr.msk.bf16.gmra.mrb[112].mxu1 %vm1122_vm2, %v6350_v30  ;;  %6015 = vmatprep.mubr.msk.bf16.mxu0 %vm1122_vm2, %v6351_v31  ;;  %v6358_v31 = vld [vmem:[%s6568_s28 + $0x3e8] sm:$0xff]   ;;  %v6360_v37 = vld [vmem:[%s6568_s28 + $0x3f0] sm:$0xff]  }
 0x102   : > { %v5016_v48 = vpack.c.bf16 %v2578_v41, %v2577_v40  ;;  %v2704_v49 = vmax.f32 %v2080_v42, 0.0  ;;  %6143 = vmatprep.mubr.msk.bf16.mxu1 %vm1122_vm2, %v6352_v36 }
 0x103   : > { %v5336_v50 = vpack.c.bf16 %v2706_v45, %v2705_v43  ;;  %v5011_v51 = vpack.c.bf16 %v2576_v46, %v2575_v44  ;;  %v5909_v53 = vpop.f32.mrb[8].mxu0 }
 0x104   : > { %5640 = vst [vmem:[%s6814_s7 + $0x18] sm:$0xff] %v5016_v48   ;;  %v5331_v54 = vpack.c.bf16 %v2704_v49, %v2703_v47  ;;  %v1589_v55 = vadd.f32 %v5909_v53, %v6791_v52  ;;  %v6037_v56 = vpop.f32.mrb[8].mxu1  ;;  %v1580_v57 = vpop.f32.mrb[9].mxu0 }
 0x105   : > { %5704 = vst [vmem:[%s6814_s7 + $0x218] sm:$0xff] %v5336_v50   ;;  %5639 = vst [vmem:[%s6814_s7 + $0x10] sm:$0xff] %v5011_v51   ;;  %v2101_v59 = vadd.f32 %v6037_v56, %v6791_v52  ;;  %v1581_v60 = vadd.f32 %v6791_v52, %v1580_v57  ;;  %v2092_v61 = vpop.f32.mrb[9].mxu1  ;;  %v5910_v62 = vpop.f32.mrb[10].mxu0 }
 0x106   : > { %5703 = vst [vmem:[%s6814_s7 + $0x210] sm:$0xff] %v5331_v54   ;;  %v2093_v1 = vadd.f32 %v6791_v52, %v2092_v61  ;;  %v1592_v2 = vadd.f32 %v5910_v62, %v6791_v52  ;;  %v6038_v3 = vpop.f32.mrb[10].mxu1  ;;  %v1583_v4 = vpop.f32.mrb[11].mxu0  ;;  %v2581_v9 = vmax.f32 %v1589_v55, 0.0 }
 0x107   : > { %v2104_v6 = vadd.f32 %v6038_v3, %v6791_v52  ;;  %v1584_v7 = vadd.f32 %v6791_v52, %v1583_v4  ;;  %v2095_v8 = vpop.f32.mrb[11].mxu1  ;;  %v2709_v12 = vmax.f32 %v2101_v59, 0.0  ;;  %v2579_v13 = vmax.f32 %v1581_v60, 0.0  ;;  %v6361_v59 = vld [vmem:[%s6568_s28 + $0x1f8] sm:$0xff]  }
 0x108   : > { %v2582_v10 = vmax.f32 %v1592_v2, 0.0  ;;  %v2096_v11 = vadd.f32 %v6791_v52, %v2095_v8  ;;  %6016 = vmatmul.mubr.msk.bf16.gmra.mrb[116].mxu0 %vm1122_vm2, %v6353_v58  ;;  %v2707_v16 = vmax.f32 %v2093_v1, 0.0 }
 0x109   : > { %v2710_v14 = vmax.f32 %v2104_v6, 0.0  ;;  %v2580_v15 = vmax.f32 %v1584_v7, 0.0  ;;  %6144 = vmatmul.mubr.msk.bf16.gmra.mrb[116].mxu1 %vm1122_vm2, %v6354_v63  ;;  %6019 = vmatprep.mubr.msk.bf16.mxu0 %vm1122_vm2, %v6355_v0  ;;  %v6362_v0 = vld [vmem:[%s6568_s28 + $0x3f8] sm:$0xff]  }
 0x10a   : > { %v5026_v17 = vpack.c.bf16 %v2582_v10, %v2581_v9  ;;  %v2708_v18 = vmax.f32 %v2096_v11, 0.0  ;;  %6147 = vmatprep.mubr.msk.bf16.mxu1 %vm1122_vm2, %v6356_v5 }
 0x10b   : > { %v5346_v19 = vpack.c.bf16 %v2710_v14, %v2709_v12  ;;  %v5021_v20 = vpack.c.bf16 %v2580_v15, %v2579_v13  ;;  %v5913_v21 = vpop.f32.mrb[12].mxu0 }
 0x10c   : > { %5642 = vst [vmem:[%s6814_s7 + $0x28] sm:$0xff] %v5026_v17   ;;  %v5341_v22 = vpack.c.bf16 %v2708_v18, %v2707_v16  ;;  %v1605_v23 = vadd.f32 %v5913_v21, %v6791_v52  ;;  %v6041_v24 = vpop.f32.mrb[12].mxu1  ;;  %v1596_v25 = vpop.f32.mrb[13].mxu0 }
 0x10d   : > { %5706 = vst [vmem:[%s6814_s7 + $0x228] sm:$0xff] %v5346_v19   ;;  %5641 = vst [vmem:[%s6814_s7 + $0x20] sm:$0xff] %v5021_v20   ;;  %v2117_v27 = vadd.f32 %v6041_v24, %v6791_v52  ;;  %v1597_v28 = vadd.f32 %v6791_v52, %v1596_v25  ;;  %v2108_v29 = vpop.f32.mrb[13].mxu1  ;;  %v5914_v30 = vpop.f32.mrb[14].mxu0 }
 0x10e   : > { %5705 = vst [vmem:[%s6814_s7 + $0x220] sm:$0xff] %v5341_v22   ;;  %v2109_v33 = vadd.f32 %v6791_v52, %v2108_v29  ;;  %v1608_v34 = vadd.f32 %v5914_v30, %v6791_v52  ;;  %v6042_v35 = vpop.f32.mrb[14].mxu1  ;;  %v1599_v36 = vpop.f32.mrb[15].mxu0  ;;  %v2585_v41 = vmax.f32 %v1605_v23, 0.0 }
 0x10f   : > { %v2120_v38 = vadd.f32 %v6042_v35, %v6791_v52  ;;  %v1600_v39 = vadd.f32 %v6791_v52, %v1599_v36  ;;  %v2111_v40 = vpop.f32.mrb[15].mxu1  ;;  %v2713_v44 = vmax.f32 %v2117_v27, 0.0  ;;  %v2583_v45 = vmax.f32 %v1597_v28, 0.0 }
 0x110   : > { %v2586_v42 = vmax.f32 %v1608_v34, 0.0  ;;  %v2112_v43 = vadd.f32 %v6791_v52, %v2111_v40  ;;  %6020 = vmatmul.mubr.msk.bf16.gmra.mrb[120].mxu0 %vm1122_vm2, %v6357_v26  ;;  %v2711_v48 = vmax.f32 %v2109_v33, 0.0 }
 0x111   : > { %v2714_v46 = vmax.f32 %v2120_v38, 0.0  ;;  %v2584_v47 = vmax.f32 %v1600_v39, 0.0  ;;  %6148 = vmatmul.mubr.msk.bf16.gmra.mrb[120].mxu1 %vm1122_vm2, %v6358_v31  ;;  %6023 = vmatprep.mubr.msk.bf16.mxu0 %vm1122_vm2, %v6359_v32 }
 0x112   : > { %v5036_v49 = vpack.c.bf16 %v2586_v42, %v2585_v41  ;;  %v2712_v50 = vmax.f32 %v2112_v43, 0.0  ;;  %6151 = vmatprep.mubr.msk.bf16.mxu1 %vm1122_vm2, %v6360_v37 }
 0x113   : > { %v5356_v51 = vpack.c.bf16 %v2714_v46, %v2713_v44  ;;  %v5031_v53 = vpack.c.bf16 %v2584_v47, %v2583_v45  ;;  %v5917_v54 = vpop.f32.mrb[16].mxu0 }
 0x114   : > { %5644 = vst [vmem:[%s6814_s7 + $0x38] sm:$0xff] %v5036_v49   ;;  %v5351_v55 = vpack.c.bf16 %v2712_v50, %v2711_v48  ;;  %v1621_v56 = vadd.f32 %v5917_v54, %v6791_v52  ;;  %v6045_v57 = vpop.f32.mrb[16].mxu1  ;;  %v1612_v58 = vpop.f32.mrb[17].mxu0 }
 0x115   : > { %5708 = vst [vmem:[%s6814_s7 + $0x238] sm:$0xff] %v5356_v51   ;;  %5643 = vst [vmem:[%s6814_s7 + $0x30] sm:$0xff] %v5031_v53   ;;  %v2133_v60 = vadd.f32 %v6045_v57, %v6791_v52  ;;  %v1613_v61 = vadd.f32 %v6791_v52, %v1612_v58  ;;  %v2124_v62 = vpop.f32.mrb[17].mxu1  ;;  %v5918_v63 = vpop.f32.mrb[18].mxu0 }
 0x116   : > { %5707 = vst [vmem:[%s6814_s7 + $0x230] sm:$0xff] %v5351_v55   ;;  %v2125_v1 = vadd.f32 %v6791_v52, %v2124_v62  ;;  %v1624_v2 = vadd.f32 %v5918_v63, %v6791_v52  ;;  %v6046_v3 = vpop.f32.mrb[18].mxu1  ;;  %v1615_v4 = vpop.f32.mrb[19].mxu0  ;;  %v2589_v8 = vmax.f32 %v1621_v56, 0.0 }
 0x117   : > { %v2136_v5 = vadd.f32 %v6046_v3, %v6791_v52  ;;  %v1616_v6 = vadd.f32 %v6791_v52, %v1615_v4  ;;  %v2127_v7 = vpop.f32.mrb[19].mxu1  ;;  %v2717_v11 = vmax.f32 %v2133_v60, 0.0  ;;  %v2587_v12 = vmax.f32 %v1613_v61, 0.0 }
 0x118   : > { %v2590_v9 = vmax.f32 %v1624_v2, 0.0  ;;  %v2128_v10 = vadd.f32 %v6791_v52, %v2127_v7  ;;  %6024 = vmatmul.mubr.msk.bf16.gmra.mrb[124].mxu0 %vm1122_vm2, %v6361_v59  ;;  %v2715_v15 = vmax.f32 %v2125_v1, 0.0 }
 0x119   : > { %v2718_v13 = vmax.f32 %v2136_v5, 0.0  ;;  %v2588_v14 = vmax.f32 %v1616_v6, 0.0  ;;  %6152 = vmatmul.mubr.msk.bf16.gmra.mrb[124].mxu1 %vm1122_vm2, %v6362_v0 }
 0x11a   : > { %v5046_v16 = vpack.c.bf16 %v2590_v9, %v2589_v8  ;;  %v2716_v17 = vmax.f32 %v2128_v10, 0.0 }
 0x11b   : > { %v5366_v18 = vpack.c.bf16 %v2718_v13, %v2717_v11  ;;  %v5041_v19 = vpack.c.bf16 %v2588_v14, %v2587_v12  ;;  %v5921_v20 = vpop.f32.mrb[20].mxu0 }
 0x11c   : > { %5646 = vst [vmem:[%s6814_s7 + $0x48] sm:$0xff] %v5046_v16   ;;  %v5361_v21 = vpack.c.bf16 %v2716_v17, %v2715_v15  ;;  %v1637_v22 = vadd.f32 %v5921_v20, %v6791_v52  ;;  %v6049_v23 = vpop.f32.mrb[20].mxu1  ;;  %v1628_v24 = vpop.f32.mrb[21].mxu0 }
 0x11d   : > { %5710 = vst [vmem:[%s6814_s7 + $0x248] sm:$0xff] %v5366_v18   ;;  %5645 = vst [vmem:[%s6814_s7 + $0x40] sm:$0xff] %v5041_v19   ;;  %v2149_v25 = vadd.f32 %v6049_v23, %v6791_v52  ;;  %v1629_v26 = vadd.f32 %v6791_v52, %v1628_v24  ;;  %v2140_v27 = vpop.f32.mrb[21].mxu1  ;;  %v5922_v28 = vpop.f32.mrb[22].mxu0 }
 0x11e   : > { %5709 = vst [vmem:[%s6814_s7 + $0x240] sm:$0xff] %v5361_v21   ;;  %v2141_v29 = vadd.f32 %v6791_v52, %v2140_v27  ;;  %v1640_v30 = vadd.f32 %v5922_v28, %v6791_v52  ;;  %v6050_v31 = vpop.f32.mrb[22].mxu1  ;;  %v1631_v32 = vpop.f32.mrb[23].mxu0  ;;  %v2593_v36 = vmax.f32 %v1637_v22, 0.0 }
 0x11f   : > { %v2152_v33 = vadd.f32 %v6050_v31, %v6791_v52  ;;  %v1632_v34 = vadd.f32 %v6791_v52, %v1631_v32  ;;  %v2143_v35 = vpop.f32.mrb[23].mxu1  ;;  %v2721_v39 = vmax.f32 %v2149_v25, 0.0  ;;  %v2591_v40 = vmax.f32 %v1629_v26, 0.0 }
 0x120   : > { %v2594_v37 = vmax.f32 %v1640_v30, 0.0  ;;  %v2144_v38 = vadd.f32 %v6791_v52, %v2143_v35  ;;  %v2719_v43 = vmax.f32 %v2141_v29, 0.0 }
 0x121   : > { %v2722_v41 = vmax.f32 %v2152_v33, 0.0  ;;  %v2592_v42 = vmax.f32 %v1632_v34, 0.0 }
 0x122   : > { %v5056_v44 = vpack.c.bf16 %v2594_v37, %v2593_v36  ;;  %v2720_v45 = vmax.f32 %v2144_v38, 0.0 }
 0x123   : > { %v5376_v46 = vpack.c.bf16 %v2722_v41, %v2721_v39  ;;  %v5051_v47 = vpack.c.bf16 %v2592_v42, %v2591_v40  ;;  %v5925_v48 = vpop.f32.mrb[24].mxu0 }
 0x124   : > { %5648 = vst [vmem:[%s6814_s7 + $0x58] sm:$0xff] %v5056_v44   ;;  %v5371_v49 = vpack.c.bf16 %v2720_v45, %v2719_v43  ;;  %v1653_v50 = vadd.f32 %v5925_v48, %v6791_v52  ;;  %v6053_v51 = vpop.f32.mrb[24].mxu1  ;;  %v1644_v53 = vpop.f32.mrb[25].mxu0 }
 0x125   : > { %5712 = vst [vmem:[%s6814_s7 + $0x258] sm:$0xff] %v5376_v46   ;;  %5647 = vst [vmem:[%s6814_s7 + $0x50] sm:$0xff] %v5051_v47   ;;  %v2165_v54 = vadd.f32 %v6053_v51, %v6791_v52  ;;  %v1645_v55 = vadd.f32 %v6791_v52, %v1644_v53  ;;  %v2156_v56 = vpop.f32.mrb[25].mxu1  ;;  %v5926_v57 = vpop.f32.mrb[26].mxu0 }
 0x126   : > { %5711 = vst [vmem:[%s6814_s7 + $0x250] sm:$0xff] %v5371_v49   ;;  %v2157_v58 = vadd.f32 %v6791_v52, %v2156_v56  ;;  %v1656_v59 = vadd.f32 %v5926_v57, %v6791_v52  ;;  %v6054_v60 = vpop.f32.mrb[26].mxu1  ;;  %v1647_v61 = vpop.f32.mrb[27].mxu0  ;;  %v2597_v1 = vmax.f32 %v1653_v50, 0.0 }
 0x127   : > { %v2168_v62 = vadd.f32 %v6054_v60, %v6791_v52  ;;  %v1648_v63 = vadd.f32 %v6791_v52, %v1647_v61  ;;  %v2159_v0 = vpop.f32.mrb[27].mxu1  ;;  %v2725_v4 = vmax.f32 %v2165_v54, 0.0  ;;  %v2595_v5 = vmax.f32 %v1645_v55, 0.0 }
 0x128   : > { %v2598_v2 = vmax.f32 %v1656_v59, 0.0  ;;  %v2160_v3 = vadd.f32 %v6791_v52, %v2159_v0  ;;  %v2723_v8 = vmax.f32 %v2157_v58, 0.0 }
 0x129   : > { %v2726_v6 = vmax.f32 %v2168_v62, 0.0  ;;  %v2596_v7 = vmax.f32 %v1648_v63, 0.0 }
 0x12a   : > { %v5066_v9 = vpack.c.bf16 %v2598_v2, %v2597_v1  ;;  %v2724_v10 = vmax.f32 %v2160_v3, 0.0 }
 0x12b   : > { %v5386_v11 = vpack.c.bf16 %v2726_v6, %v2725_v4  ;;  %v5061_v12 = vpack.c.bf16 %v2596_v7, %v2595_v5  ;;  %v5929_v13 = vpop.f32.mrb[28].mxu0 }
 0x12c   : > { %5650 = vst [vmem:[%s6814_s7 + $0x68] sm:$0xff] %v5066_v9   ;;  %v5381_v14 = vpack.c.bf16 %v2724_v10, %v2723_v8  ;;  %v1669_v15 = vadd.f32 %v5929_v13, %v6791_v52  ;;  %v6057_v16 = vpop.f32.mrb[28].mxu1  ;;  %v1660_v17 = vpop.f32.mrb[29].mxu0 }
 0x12d   : > { %5714 = vst [vmem:[%s6814_s7 + $0x268] sm:$0xff] %v5386_v11   ;;  %5649 = vst [vmem:[%s6814_s7 + $0x60] sm:$0xff] %v5061_v12   ;;  %v2181_v18 = vadd.f32 %v6057_v16, %v6791_v52  ;;  %v1661_v19 = vadd.f32 %v6791_v52, %v1660_v17  ;;  %v2172_v20 = vpop.f32.mrb[29].mxu1  ;;  %v5930_v21 = vpop.f32.mrb[30].mxu0 }
 0x12e   : > { %5713 = vst [vmem:[%s6814_s7 + $0x260] sm:$0xff] %v5381_v14   ;;  %v2173_v22 = vadd.f32 %v6791_v52, %v2172_v20  ;;  %v1672_v23 = vadd.f32 %v5930_v21, %v6791_v52  ;;  %v6058_v24 = vpop.f32.mrb[30].mxu1  ;;  %v1663_v25 = vpop.f32.mrb[31].mxu0  ;;  %v2601_v29 = vmax.f32 %v1669_v15, 0.0 }
 0x12f   : > { %v2184_v26 = vadd.f32 %v6058_v24, %v6791_v52  ;;  %v1664_v27 = vadd.f32 %v6791_v52, %v1663_v25  ;;  %v2175_v28 = vpop.f32.mrb[31].mxu1  ;;  %v2729_v32 = vmax.f32 %v2181_v18, 0.0  ;;  %v2599_v33 = vmax.f32 %v1661_v19, 0.0 }
 0x130   : > { %v2602_v30 = vmax.f32 %v1672_v23, 0.0  ;;  %v2176_v31 = vadd.f32 %v6791_v52, %v2175_v28  ;;  %v2727_v36 = vmax.f32 %v2173_v22, 0.0 }
 0x131   : > { %v2730_v34 = vmax.f32 %v2184_v26, 0.0  ;;  %v2600_v35 = vmax.f32 %v1664_v27, 0.0 }
 0x132   : > { %v5076_v37 = vpack.c.bf16 %v2602_v30, %v2601_v29  ;;  %v2728_v38 = vmax.f32 %v2176_v31, 0.0 }
 0x133   : > { %v5396_v39 = vpack.c.bf16 %v2730_v34, %v2729_v32  ;;  %v5071_v40 = vpack.c.bf16 %v2600_v35, %v2599_v33  ;;  %v5933_v41 = vpop.f32.mrb[32].mxu0 }
 0x134   : > { %5652 = vst [vmem:[%s6814_s7 + $0x78] sm:$0xff] %v5076_v37   ;;  %v5391_v42 = vpack.c.bf16 %v2728_v38, %v2727_v36  ;;  %v1685_v43 = vadd.f32 %v5933_v41, %v6791_v52  ;;  %v6061_v44 = vpop.f32.mrb[32].mxu1  ;;  %v1676_v45 = vpop.f32.mrb[33].mxu0 }
 0x135   : > { %5716 = vst [vmem:[%s6814_s7 + $0x278] sm:$0xff] %v5396_v39   ;;  %5651 = vst [vmem:[%s6814_s7 + $0x70] sm:$0xff] %v5071_v40   ;;  %v2197_v46 = vadd.f32 %v6061_v44, %v6791_v52  ;;  %v1677_v47 = vadd.f32 %v6791_v52, %v1676_v45  ;;  %v2188_v48 = vpop.f32.mrb[33].mxu1  ;;  %v5934_v49 = vpop.f32.mrb[34].mxu0 }
 0x136   : > { %5715 = vst [vmem:[%s6814_s7 + $0x270] sm:$0xff] %v5391_v42   ;;  %v2189_v50 = vadd.f32 %v6791_v52, %v2188_v48  ;;  %v1688_v51 = vadd.f32 %v5934_v49, %v6791_v52  ;;  %v6062_v53 = vpop.f32.mrb[34].mxu1  ;;  %v1679_v54 = vpop.f32.mrb[35].mxu0  ;;  %v2605_v58 = vmax.f32 %v1685_v43, 0.0 }
 0x137   : > { %v2200_v55 = vadd.f32 %v6062_v53, %v6791_v52  ;;  %v1680_v56 = vadd.f32 %v6791_v52, %v1679_v54  ;;  %v2191_v57 = vpop.f32.mrb[35].mxu1  ;;  %v2733_v61 = vmax.f32 %v2197_v46, 0.0  ;;  %v2603_v62 = vmax.f32 %v1677_v47, 0.0 }
 0x138   : > { %v2606_v59 = vmax.f32 %v1688_v51, 0.0  ;;  %v2192_v60 = vadd.f32 %v6791_v52, %v2191_v57  ;;  %v2731_v1 = vmax.f32 %v2189_v50, 0.0 }
 0x139   : > { %v2734_v63 = vmax.f32 %v2200_v55, 0.0  ;;  %v2604_v0 = vmax.f32 %v1680_v56, 0.0 }
 0x13a   : > { %v5086_v2 = vpack.c.bf16 %v2606_v59, %v2605_v58  ;;  %v2732_v3 = vmax.f32 %v2192_v60, 0.0 }
 0x13b   : > { %v5406_v4 = vpack.c.bf16 %v2734_v63, %v2733_v61  ;;  %v5081_v5 = vpack.c.bf16 %v2604_v0, %v2603_v62  ;;  %v5937_v6 = vpop.f32.mrb[36].mxu0 }
 0x13c   : > { %5654 = vst [vmem:[%s6814_s7 + $0x88] sm:$0xff] %v5086_v2   ;;  %v5401_v7 = vpack.c.bf16 %v2732_v3, %v2731_v1  ;;  %v1701_v8 = vadd.f32 %v5937_v6, %v6791_v52  ;;  %v6065_v9 = vpop.f32.mrb[36].mxu1  ;;  %v1692_v10 = vpop.f32.mrb[37].mxu0 }
 0x13d   : > { %5718 = vst [vmem:[%s6814_s7 + $0x288] sm:$0xff] %v5406_v4   ;;  %5653 = vst [vmem:[%s6814_s7 + $0x80] sm:$0xff] %v5081_v5   ;;  %v2213_v11 = vadd.f32 %v6065_v9, %v6791_v52  ;;  %v1693_v12 = vadd.f32 %v6791_v52, %v1692_v10  ;;  %v2204_v13 = vpop.f32.mrb[37].mxu1  ;;  %v5938_v14 = vpop.f32.mrb[38].mxu0 }
 0x13e   : > { %5717 = vst [vmem:[%s6814_s7 + $0x280] sm:$0xff] %v5401_v7   ;;  %v2205_v15 = vadd.f32 %v6791_v52, %v2204_v13  ;;  %v1704_v16 = vadd.f32 %v5938_v14, %v6791_v52  ;;  %v6066_v17 = vpop.f32.mrb[38].mxu1  ;;  %v1695_v18 = vpop.f32.mrb[39].mxu0  ;;  %v2609_v22 = vmax.f32 %v1701_v8, 0.0 }
 0x13f   : > { %v2216_v19 = vadd.f32 %v6066_v17, %v6791_v52  ;;  %v1696_v20 = vadd.f32 %v6791_v52, %v1695_v18  ;;  %v2207_v21 = vpop.f32.mrb[39].mxu1  ;;  %v2737_v25 = vmax.f32 %v2213_v11, 0.0  ;;  %v2607_v26 = vmax.f32 %v1693_v12, 0.0 }
 0x140   : > { %v2610_v23 = vmax.f32 %v1704_v16, 0.0  ;;  %v2208_v24 = vadd.f32 %v6791_v52, %v2207_v21  ;;  %v2735_v29 = vmax.f32 %v2205_v15, 0.0 }
 0x141   : > { %v2738_v27 = vmax.f32 %v2216_v19, 0.0  ;;  %v2608_v28 = vmax.f32 %v1696_v20, 0.0 }
 0x142   : > { %v5096_v30 = vpack.c.bf16 %v2610_v23, %v2609_v22  ;;  %v2736_v31 = vmax.f32 %v2208_v24, 0.0 }
 0x143   : > { %v5416_v32 = vpack.c.bf16 %v2738_v27, %v2737_v25  ;;  %v5091_v33 = vpack.c.bf16 %v2608_v28, %v2607_v26  ;;  %v5941_v34 = vpop.f32.mrb[40].mxu0 }
 0x144   : > { %5656 = vst [vmem:[%s6814_s7 + $0x98] sm:$0xff] %v5096_v30   ;;  %v5411_v35 = vpack.c.bf16 %v2736_v31, %v2735_v29  ;;  %v1717_v36 = vadd.f32 %v5941_v34, %v6791_v52  ;;  %v6069_v37 = vpop.f32.mrb[40].mxu1  ;;  %v1708_v38 = vpop.f32.mrb[41].mxu0 }
 0x145   : > { %5720 = vst [vmem:[%s6814_s7 + $0x298] sm:$0xff] %v5416_v32   ;;  %5655 = vst [vmem:[%s6814_s7 + $0x90] sm:$0xff] %v5091_v33   ;;  %v2229_v39 = vadd.f32 %v6069_v37, %v6791_v52  ;;  %v1709_v40 = vadd.f32 %v6791_v52, %v1708_v38  ;;  %v2220_v41 = vpop.f32.mrb[41].mxu1  ;;  %v5942_v42 = vpop.f32.mrb[42].mxu0 }
 0x146   : > { %5719 = vst [vmem:[%s6814_s7 + $0x290] sm:$0xff] %v5411_v35   ;;  %v2221_v43 = vadd.f32 %v6791_v52, %v2220_v41  ;;  %v1720_v44 = vadd.f32 %v5942_v42, %v6791_v52  ;;  %v6070_v45 = vpop.f32.mrb[42].mxu1  ;;  %v1711_v46 = vpop.f32.mrb[43].mxu0  ;;  %v2613_v50 = vmax.f32 %v1717_v36, 0.0 }
 0x147   : > { %v2232_v47 = vadd.f32 %v6070_v45, %v6791_v52  ;;  %v1712_v48 = vadd.f32 %v6791_v52, %v1711_v46  ;;  %v2223_v49 = vpop.f32.mrb[43].mxu1  ;;  %v2741_v54 = vmax.f32 %v2229_v39, 0.0  ;;  %v2611_v55 = vmax.f32 %v1709_v40, 0.0 }
 0x148   : > { %v2614_v51 = vmax.f32 %v1720_v44, 0.0  ;;  %v2224_v53 = vadd.f32 %v6791_v52, %v2223_v49  ;;  %v2739_v58 = vmax.f32 %v2221_v43, 0.0 }
 0x149   : > { %v2742_v56 = vmax.f32 %v2232_v47, 0.0  ;;  %v2612_v57 = vmax.f32 %v1712_v48, 0.0 }
 0x14a   : > { %v5106_v59 = vpack.c.bf16 %v2614_v51, %v2613_v50  ;;  %v2740_v60 = vmax.f32 %v2224_v53, 0.0 }
 0x14b   : > { %v5426_v61 = vpack.c.bf16 %v2742_v56, %v2741_v54  ;;  %v5101_v62 = vpack.c.bf16 %v2612_v57, %v2611_v55  ;;  %v5945_v63 = vpop.f32.mrb[44].mxu0 }
 0x14c   : > { %5658 = vst [vmem:[%s6814_s7 + $0xa8] sm:$0xff] %v5106_v59   ;;  %v5421_v0 = vpack.c.bf16 %v2740_v60, %v2739_v58  ;;  %v1733_v1 = vadd.f32 %v5945_v63, %v6791_v52  ;;  %v6073_v2 = vpop.f32.mrb[44].mxu1  ;;  %v1724_v3 = vpop.f32.mrb[45].mxu0 }
 0x14d   : > { %5722 = vst [vmem:[%s6814_s7 + $0x2a8] sm:$0xff] %v5426_v61   ;;  %5657 = vst [vmem:[%s6814_s7 + $0xa0] sm:$0xff] %v5101_v62   ;;  %v2245_v4 = vadd.f32 %v6073_v2, %v6791_v52  ;;  %v1725_v5 = vadd.f32 %v6791_v52, %v1724_v3  ;;  %v2236_v6 = vpop.f32.mrb[45].mxu1  ;;  %v5946_v7 = vpop.f32.mrb[46].mxu0 }
 0x14e   : > { %5721 = vst [vmem:[%s6814_s7 + $0x2a0] sm:$0xff] %v5421_v0   ;;  %v2237_v8 = vadd.f32 %v6791_v52, %v2236_v6  ;;  %v1736_v9 = vadd.f32 %v5946_v7, %v6791_v52  ;;  %v6074_v10 = vpop.f32.mrb[46].mxu1  ;;  %v1727_v11 = vpop.f32.mrb[47].mxu0  ;;  %v2617_v15 = vmax.f32 %v1733_v1, 0.0 }
 0x14f   : > { %v2248_v12 = vadd.f32 %v6074_v10, %v6791_v52  ;;  %v1728_v13 = vadd.f32 %v6791_v52, %v1727_v11  ;;  %v2239_v14 = vpop.f32.mrb[47].mxu1  ;;  %v2745_v18 = vmax.f32 %v2245_v4, 0.0  ;;  %v2615_v19 = vmax.f32 %v1725_v5, 0.0 }
 0x150   : > { %v2618_v16 = vmax.f32 %v1736_v9, 0.0  ;;  %v2240_v17 = vadd.f32 %v6791_v52, %v2239_v14  ;;  %v2743_v22 = vmax.f32 %v2237_v8, 0.0 }
 0x151   : > { %v2746_v20 = vmax.f32 %v2248_v12, 0.0  ;;  %v2616_v21 = vmax.f32 %v1728_v13, 0.0 }
 0x152   : > { %v5116_v23 = vpack.c.bf16 %v2618_v16, %v2617_v15  ;;  %v2744_v24 = vmax.f32 %v2240_v17, 0.0 }
 0x153   : > { %v5436_v25 = vpack.c.bf16 %v2746_v20, %v2745_v18  ;;  %v5111_v26 = vpack.c.bf16 %v2616_v21, %v2615_v19  ;;  %v5949_v27 = vpop.f32.mrb[48].mxu0 }
 0x154   : > { %5660 = vst [vmem:[%s6814_s7 + $0xb8] sm:$0xff] %v5116_v23   ;;  %v5431_v28 = vpack.c.bf16 %v2744_v24, %v2743_v22  ;;  %v1749_v29 = vadd.f32 %v5949_v27, %v6791_v52  ;;  %v6077_v30 = vpop.f32.mrb[48].mxu1  ;;  %v1740_v31 = vpop.f32.mrb[49].mxu0 }
 0x155   : > { %5724 = vst [vmem:[%s6814_s7 + $0x2b8] sm:$0xff] %v5436_v25   ;;  %5659 = vst [vmem:[%s6814_s7 + $0xb0] sm:$0xff] %v5111_v26   ;;  %v2261_v32 = vadd.f32 %v6077_v30, %v6791_v52  ;;  %v1741_v33 = vadd.f32 %v6791_v52, %v1740_v31  ;;  %v2252_v34 = vpop.f32.mrb[49].mxu1  ;;  %v5950_v35 = vpop.f32.mrb[50].mxu0 }
 0x156   : > { %5723 = vst [vmem:[%s6814_s7 + $0x2b0] sm:$0xff] %v5431_v28   ;;  %v2253_v36 = vadd.f32 %v6791_v52, %v2252_v34  ;;  %v1752_v37 = vadd.f32 %v5950_v35, %v6791_v52  ;;  %v6078_v38 = vpop.f32.mrb[50].mxu1  ;;  %v1743_v39 = vpop.f32.mrb[51].mxu0  ;;  %v2621_v43 = vmax.f32 %v1749_v29, 0.0 }
 0x157   : > { %v2264_v40 = vadd.f32 %v6078_v38, %v6791_v52  ;;  %v1744_v41 = vadd.f32 %v6791_v52, %v1743_v39  ;;  %v2255_v42 = vpop.f32.mrb[51].mxu1  ;;  %v2749_v46 = vmax.f32 %v2261_v32, 0.0  ;;  %v2619_v47 = vmax.f32 %v1741_v33, 0.0 }
 0x158   : > { %v2622_v44 = vmax.f32 %v1752_v37, 0.0  ;;  %v2256_v45 = vadd.f32 %v6791_v52, %v2255_v42  ;;  %v2747_v50 = vmax.f32 %v2253_v36, 0.0 }
 0x159   : > { %v2750_v48 = vmax.f32 %v2264_v40, 0.0  ;;  %v2620_v49 = vmax.f32 %v1744_v41, 0.0 }
 0x15a   : > { %v5126_v51 = vpack.c.bf16 %v2622_v44, %v2621_v43  ;;  %v2748_v53 = vmax.f32 %v2256_v45, 0.0 }
 0x15b   : > { %v5446_v54 = vpack.c.bf16 %v2750_v48, %v2749_v46  ;;  %v5121_v55 = vpack.c.bf16 %v2620_v49, %v2619_v47  ;;  %v5953_v56 = vpop.f32.mrb[52].mxu0 }
 0x15c   : > { %5662 = vst [vmem:[%s6814_s7 + $0xc8] sm:$0xff] %v5126_v51   ;;  %v5441_v57 = vpack.c.bf16 %v2748_v53, %v2747_v50  ;;  %v1765_v58 = vadd.f32 %v5953_v56, %v6791_v52  ;;  %v6081_v59 = vpop.f32.mrb[52].mxu1  ;;  %v1756_v60 = vpop.f32.mrb[53].mxu0  ;;  %v7016_v50 = vld [vmem:[%s7286_s2] ss:$0 sm:$0xff] }
 0x15d   : > { %5726 = vst [vmem:[%s6814_s7 + $0x2c8] sm:$0xff] %v5446_v54   ;;  %5661 = vst [vmem:[%s6814_s7 + $0xc0] sm:$0xff] %v5121_v55   ;;  %v2277_v61 = vadd.f32 %v6081_v59, %v6791_v52  ;;  %v1757_v62 = vadd.f32 %v6791_v52, %v1756_v60  ;;  %v2268_v63 = vpop.f32.mrb[53].mxu1  ;;  %v5954_v0 = vpop.f32.mrb[54].mxu0 }
 0x15e   : > { %5725 = vst [vmem:[%s6814_s7 + $0x2c0] sm:$0xff] %v5441_v57   ;;  %v2269_v1 = vadd.f32 %v6791_v52, %v2268_v63  ;;  %v1768_v2 = vadd.f32 %v5954_v0, %v6791_v52  ;;  %v6082_v3 = vpop.f32.mrb[54].mxu1  ;;  %v1759_v4 = vpop.f32.mrb[55].mxu0  ;;  %v2625_v8 = vmax.f32 %v1765_v58, 0.0 }
 0x15f   : > { %v2280_v5 = vadd.f32 %v6082_v3, %v6791_v52  ;;  %v1760_v6 = vadd.f32 %v6791_v52, %v1759_v4  ;;  %v2271_v7 = vpop.f32.mrb[55].mxu1  ;;  %v2753_v11 = vmax.f32 %v2277_v61, 0.0  ;;  %v2623_v12 = vmax.f32 %v1757_v62, 0.0 }
 0x160   : > { %v2626_v9 = vmax.f32 %v1768_v2, 0.0  ;;  %v2272_v10 = vadd.f32 %v6791_v52, %v2271_v7  ;;  %v2751_v15 = vmax.f32 %v2269_v1, 0.0 }
 0x161   : > { %v2754_v13 = vmax.f32 %v2280_v5, 0.0  ;;  %v2624_v14 = vmax.f32 %v1760_v6, 0.0 }
 0x162   : > { %v5136_v16 = vpack.c.bf16 %v2626_v9, %v2625_v8  ;;  %v2752_v17 = vmax.f32 %v2272_v10, 0.0 }
 0x163   : > { %v5456_v18 = vpack.c.bf16 %v2754_v13, %v2753_v11  ;;  %v5131_v19 = vpack.c.bf16 %v2624_v14, %v2623_v12  ;;  %v5957_v20 = vpop.f32.mrb[56].mxu0 }
 0x164   : > { %5664 = vst [vmem:[%s6814_s7 + $0xd8] sm:$0xff] %v5136_v16   ;;  %v5451_v21 = vpack.c.bf16 %v2752_v17, %v2751_v15  ;;  %v1781_v22 = vadd.f32 %v5957_v20, %v6791_v52  ;;  %v6085_v23 = vpop.f32.mrb[56].mxu1  ;;  %v1772_v24 = vpop.f32.mrb[57].mxu0 }
 0x165   : > { %5728 = vst [vmem:[%s6814_s7 + $0x2d8] sm:$0xff] %v5456_v18   ;;  %5663 = vst [vmem:[%s6814_s7 + $0xd0] sm:$0xff] %v5131_v19   ;;  %v2293_v25 = vadd.f32 %v6085_v23, %v6791_v52  ;;  %v1773_v26 = vadd.f32 %v6791_v52, %v1772_v24  ;;  %v2284_v27 = vpop.f32.mrb[57].mxu1  ;;  %v5958_v28 = vpop.f32.mrb[58].mxu0 }
 0x166   : > { %5727 = vst [vmem:[%s6814_s7 + $0x2d0] sm:$0xff] %v5451_v21   ;;  %v2285_v29 = vadd.f32 %v6791_v52, %v2284_v27  ;;  %v1784_v30 = vadd.f32 %v5958_v28, %v6791_v52  ;;  %v6086_v31 = vpop.f32.mrb[58].mxu1  ;;  %v1775_v32 = vpop.f32.mrb[59].mxu0  ;;  %v2629_v36 = vmax.f32 %v1781_v22, 0.0 }
 0x167   : > { %v2296_v33 = vadd.f32 %v6086_v31, %v6791_v52  ;;  %v1776_v34 = vadd.f32 %v6791_v52, %v1775_v32  ;;  %v2287_v35 = vpop.f32.mrb[59].mxu1  ;;  %v2757_v39 = vmax.f32 %v2293_v25, 0.0  ;;  %v2627_v40 = vmax.f32 %v1773_v26, 0.0 }
 0x168   : > { %v2630_v37 = vmax.f32 %v1784_v30, 0.0  ;;  %v2288_v38 = vadd.f32 %v6791_v52, %v2287_v35  ;;  %v2755_v43 = vmax.f32 %v2285_v29, 0.0 }
 0x169   : > { %v2758_v41 = vmax.f32 %v2296_v33, 0.0  ;;  %v2628_v42 = vmax.f32 %v1776_v34, 0.0 }
 0x16a   : > { %v5146_v44 = vpack.c.bf16 %v2630_v37, %v2629_v36  ;;  %v2756_v45 = vmax.f32 %v2288_v38, 0.0 }
 0x16b   : > { %v5466_v46 = vpack.c.bf16 %v2758_v41, %v2757_v39  ;;  %v5141_v47 = vpack.c.bf16 %v2628_v42, %v2627_v40  ;;  %v5961_v48 = vpop.f32.mrb[60].mxu0 }
 0x16c   : > { %5666 = vst [vmem:[%s6814_s7 + $0xe8] sm:$0xff] %v5146_v44   ;;  %v5461_v49 = vpack.c.bf16 %v2756_v45, %v2755_v43  ;;  %v1797_v52 = vadd.f32 %v7016_v50, %v5961_v48  ;;  %v6089_v51 = vpop.f32.mrb[60].mxu1  ;;  %v1788_v53 = vpop.f32.mrb[61].mxu0 }
 0x16d   : > { %5730 = vst [vmem:[%s6814_s7 + $0x2e8] sm:$0xff] %v5466_v46   ;;  %5665 = vst [vmem:[%s6814_s7 + $0xe0] sm:$0xff] %v5141_v47   ;;  %v2309_v54 = vadd.f32 %v7016_v50, %v6089_v51  ;;  %v1789_v55 = vadd.f32 %v7016_v50, %v1788_v53  ;;  %v2300_v56 = vpop.f32.mrb[61].mxu1  ;;  %v5962_v57 = vpop.f32.mrb[62].mxu0 }
 0x16e   : > { %5729 = vst [vmem:[%s6814_s7 + $0x2e0] sm:$0xff] %v5461_v49   ;;  %v2301_v58 = vadd.f32 %v7016_v50, %v2300_v56  ;;  %v1800_v59 = vadd.f32 %v7016_v50, %v5962_v57  ;;  %v6090_v60 = vpop.f32.mrb[62].mxu1  ;;  %v1791_v61 = vpop.f32.mrb[63].mxu0  ;;  %v2633_v1 = vmax.f32 %v1797_v52, 0.0 }
 0x16f   : > { %v2312_v62 = vadd.f32 %v7016_v50, %v6090_v60  ;;  %v1792_v63 = vadd.f32 %v7016_v50, %v1791_v61  ;;  %v2303_v0 = vpop.f32.mrb[63].mxu1  ;;  %v2761_v4 = vmax.f32 %v2309_v54, 0.0  ;;  %v2631_v5 = vmax.f32 %v1789_v55, 0.0 }
 0x170   : > { %v2634_v2 = vmax.f32 %v1800_v59, 0.0  ;;  %v2304_v3 = vadd.f32 %v7016_v50, %v2303_v0  ;;  %v2759_v8 = vmax.f32 %v2301_v58, 0.0 }
 0x171   : > { %v2762_v6 = vmax.f32 %v2312_v62, 0.0  ;;  %v2632_v7 = vmax.f32 %v1792_v63, 0.0 }
 0x172   : > { %v5156_v9 = vpack.c.bf16 %v2634_v2, %v2633_v1  ;;  %v2760_v10 = vmax.f32 %v2304_v3, 0.0 }
 0x173   : > { %v5476_v11 = vpack.c.bf16 %v2762_v6, %v2761_v4  ;;  %v5151_v12 = vpack.c.bf16 %v2632_v7, %v2631_v5  ;;  %v5965_v13 = vpop.f32.mrb[64].mxu0 }
 0x174   : > { %5668 = vst [vmem:[%s6814_s7 + $0xf8] sm:$0xff] %v5156_v9   ;;  %v5471_v14 = vpack.c.bf16 %v2760_v10, %v2759_v8  ;;  %v1813_v15 = vadd.f32 %v7016_v50, %v5965_v13  ;;  %v6093_v16 = vpop.f32.mrb[64].mxu1  ;;  %v1804_v17 = vpop.f32.mrb[65].mxu0 }
 0x175   : > { %5732 = vst [vmem:[%s6814_s7 + $0x2f8] sm:$0xff] %v5476_v11   ;;  %5667 = vst [vmem:[%s6814_s7 + $0xf0] sm:$0xff] %v5151_v12   ;;  %v2325_v18 = vadd.f32 %v7016_v50, %v6093_v16  ;;  %v1805_v19 = vadd.f32 %v7016_v50, %v1804_v17  ;;  %v2316_v20 = vpop.f32.mrb[65].mxu1  ;;  %v5966_v21 = vpop.f32.mrb[66].mxu0 }
 0x176   : > { %5731 = vst [vmem:[%s6814_s7 + $0x2f0] sm:$0xff] %v5471_v14   ;;  %v2317_v22 = vadd.f32 %v7016_v50, %v2316_v20  ;;  %v1816_v23 = vadd.f32 %v7016_v50, %v5966_v21  ;;  %v6094_v24 = vpop.f32.mrb[66].mxu1  ;;  %v1807_v25 = vpop.f32.mrb[67].mxu0  ;;  %v2637_v29 = vmax.f32 %v1813_v15, 0.0 }
 0x177   : > { %v2328_v26 = vadd.f32 %v7016_v50, %v6094_v24  ;;  %v1808_v27 = vadd.f32 %v7016_v50, %v1807_v25  ;;  %v2319_v28 = vpop.f32.mrb[67].mxu1  ;;  %v2765_v32 = vmax.f32 %v2325_v18, 0.0  ;;  %v2635_v33 = vmax.f32 %v1805_v19, 0.0 }
 0x178   : > { %v2638_v30 = vmax.f32 %v1816_v23, 0.0  ;;  %v2320_v31 = vadd.f32 %v7016_v50, %v2319_v28  ;;  %v2763_v36 = vmax.f32 %v2317_v22, 0.0 }
 0x179   : > { %v2766_v34 = vmax.f32 %v2328_v26, 0.0  ;;  %v2636_v35 = vmax.f32 %v1808_v27, 0.0 }
 0x17a   : > { %v5166_v37 = vpack.c.bf16 %v2638_v30, %v2637_v29  ;;  %v2764_v38 = vmax.f32 %v2320_v31, 0.0 }
 0x17b   : > { %v5486_v39 = vpack.c.bf16 %v2766_v34, %v2765_v32  ;;  %v5161_v40 = vpack.c.bf16 %v2636_v35, %v2635_v33  ;;  %v5969_v41 = vpop.f32.mrb[68].mxu0 }
 0x17c   : > { %5670 = vst [vmem:[%s6814_s7 + $0x108] sm:$0xff] %v5166_v37   ;;  %v5481_v42 = vpack.c.bf16 %v2764_v38, %v2763_v36  ;;  %v1829_v43 = vadd.f32 %v7016_v50, %v5969_v41  ;;  %v6097_v44 = vpop.f32.mrb[68].mxu1  ;;  %v1820_v45 = vpop.f32.mrb[69].mxu0 }
 0x17d   : > { %5734 = vst [vmem:[%s6814_s7 + $0x308] sm:$0xff] %v5486_v39   ;;  %5669 = vst [vmem:[%s6814_s7 + $0x100] sm:$0xff] %v5161_v40   ;;  %v2341_v46 = vadd.f32 %v7016_v50, %v6097_v44  ;;  %v1821_v47 = vadd.f32 %v7016_v50, %v1820_v45  ;;  %v2332_v48 = vpop.f32.mrb[69].mxu1  ;;  %v5970_v49 = vpop.f32.mrb[70].mxu0 }
 0x17e   : > { %5733 = vst [vmem:[%s6814_s7 + $0x300] sm:$0xff] %v5481_v42   ;;  %v2333_v52 = vadd.f32 %v7016_v50, %v2332_v48  ;;  %v1832_v51 = vadd.f32 %v7016_v50, %v5970_v49  ;;  %v6098_v53 = vpop.f32.mrb[70].mxu1  ;;  %v1823_v54 = vpop.f32.mrb[71].mxu0  ;;  %v2641_v58 = vmax.f32 %v1829_v43, 0.0 }
 0x17f   : > { %v2344_v55 = vadd.f32 %v7016_v50, %v6098_v53  ;;  %v1824_v56 = vadd.f32 %v7016_v50, %v1823_v54  ;;  %v2335_v57 = vpop.f32.mrb[71].mxu1  ;;  %v2769_v61 = vmax.f32 %v2341_v46, 0.0  ;;  %v2639_v62 = vmax.f32 %v1821_v47, 0.0 }
 0x180   : > { %v2642_v59 = vmax.f32 %v1832_v51, 0.0  ;;  %v2336_v60 = vadd.f32 %v7016_v50, %v2335_v57  ;;  %v2767_v1 = vmax.f32 %v2333_v52, 0.0 }
 0x181   : > { %v2770_v63 = vmax.f32 %v2344_v55, 0.0  ;;  %v2640_v0 = vmax.f32 %v1824_v56, 0.0 }
 0x182   : > { %v5176_v2 = vpack.c.bf16 %v2642_v59, %v2641_v58  ;;  %v2768_v3 = vmax.f32 %v2336_v60, 0.0 }
 0x183   : > { %v5496_v4 = vpack.c.bf16 %v2770_v63, %v2769_v61  ;;  %v5171_v5 = vpack.c.bf16 %v2640_v0, %v2639_v62  ;;  %v5973_v6 = vpop.f32.mrb[72].mxu0 }
 0x184   : > { %5672 = vst [vmem:[%s6814_s7 + $0x118] sm:$0xff] %v5176_v2   ;;  %v5491_v7 = vpack.c.bf16 %v2768_v3, %v2767_v1  ;;  %v1845_v8 = vadd.f32 %v7016_v50, %v5973_v6  ;;  %v6101_v9 = vpop.f32.mrb[72].mxu1  ;;  %v1836_v10 = vpop.f32.mrb[73].mxu0 }
 0x185   : > { %5736 = vst [vmem:[%s6814_s7 + $0x318] sm:$0xff] %v5496_v4   ;;  %5671 = vst [vmem:[%s6814_s7 + $0x110] sm:$0xff] %v5171_v5   ;;  %v2357_v11 = vadd.f32 %v7016_v50, %v6101_v9  ;;  %v1837_v12 = vadd.f32 %v7016_v50, %v1836_v10  ;;  %v2348_v13 = vpop.f32.mrb[73].mxu1  ;;  %v5974_v14 = vpop.f32.mrb[74].mxu0 }
 0x186   : > { %5735 = vst [vmem:[%s6814_s7 + $0x310] sm:$0xff] %v5491_v7   ;;  %v2349_v15 = vadd.f32 %v7016_v50, %v2348_v13  ;;  %v1848_v16 = vadd.f32 %v7016_v50, %v5974_v14  ;;  %v6102_v17 = vpop.f32.mrb[74].mxu1  ;;  %v1839_v18 = vpop.f32.mrb[75].mxu0  ;;  %v2645_v22 = vmax.f32 %v1845_v8, 0.0 }
 0x187   : > { %v2360_v19 = vadd.f32 %v7016_v50, %v6102_v17  ;;  %v1840_v20 = vadd.f32 %v7016_v50, %v1839_v18  ;;  %v2351_v21 = vpop.f32.mrb[75].mxu1  ;;  %v2773_v25 = vmax.f32 %v2357_v11, 0.0  ;;  %v2643_v26 = vmax.f32 %v1837_v12, 0.0 }
 0x188   : > { %v2646_v23 = vmax.f32 %v1848_v16, 0.0  ;;  %v2352_v24 = vadd.f32 %v7016_v50, %v2351_v21  ;;  %v2771_v29 = vmax.f32 %v2349_v15, 0.0 }
 0x189   : > { %v2774_v27 = vmax.f32 %v2360_v19, 0.0  ;;  %v2644_v28 = vmax.f32 %v1840_v20, 0.0 }
 0x18a   : > { %v5186_v30 = vpack.c.bf16 %v2646_v23, %v2645_v22  ;;  %v2772_v31 = vmax.f32 %v2352_v24, 0.0 }
 0x18b   : > { %v5506_v32 = vpack.c.bf16 %v2774_v27, %v2773_v25  ;;  %v5181_v33 = vpack.c.bf16 %v2644_v28, %v2643_v26  ;;  %v5977_v34 = vpop.f32.mrb[76].mxu0 }
 0x18c   : > { %5674 = vst [vmem:[%s6814_s7 + $0x128] sm:$0xff] %v5186_v30   ;;  %v5501_v35 = vpack.c.bf16 %v2772_v31, %v2771_v29  ;;  %v1861_v36 = vadd.f32 %v7016_v50, %v5977_v34  ;;  %v6105_v37 = vpop.f32.mrb[76].mxu1  ;;  %v1852_v38 = vpop.f32.mrb[77].mxu0 }
 0x18d   : > { %5738 = vst [vmem:[%s6814_s7 + $0x328] sm:$0xff] %v5506_v32   ;;  %5673 = vst [vmem:[%s6814_s7 + $0x120] sm:$0xff] %v5181_v33   ;;  %v2373_v39 = vadd.f32 %v7016_v50, %v6105_v37  ;;  %v1853_v40 = vadd.f32 %v7016_v50, %v1852_v38  ;;  %v2364_v41 = vpop.f32.mrb[77].mxu1  ;;  %v5978_v42 = vpop.f32.mrb[78].mxu0 }
 0x18e   : > { %5737 = vst [vmem:[%s6814_s7 + $0x320] sm:$0xff] %v5501_v35   ;;  %v2365_v43 = vadd.f32 %v7016_v50, %v2364_v41  ;;  %v1864_v44 = vadd.f32 %v7016_v50, %v5978_v42  ;;  %v6106_v45 = vpop.f32.mrb[78].mxu1  ;;  %v1855_v46 = vpop.f32.mrb[79].mxu0  ;;  %v2649_v52 = vmax.f32 %v1861_v36, 0.0 }
 0x18f   : > { %v2376_v47 = vadd.f32 %v7016_v50, %v6106_v45  ;;  %v1856_v48 = vadd.f32 %v7016_v50, %v1855_v46  ;;  %v2367_v49 = vpop.f32.mrb[79].mxu1  ;;  %v2777_v54 = vmax.f32 %v2373_v39, 0.0  ;;  %v2647_v55 = vmax.f32 %v1853_v40, 0.0 }
 0x190   : > { %v2650_v51 = vmax.f32 %v1864_v44, 0.0  ;;  %v2368_v53 = vadd.f32 %v7016_v50, %v2367_v49  ;;  %v2775_v58 = vmax.f32 %v2365_v43, 0.0 }
 0x191   : > { %v2778_v56 = vmax.f32 %v2376_v47, 0.0  ;;  %v2648_v57 = vmax.f32 %v1856_v48, 0.0 }
 0x192   : > { %v5196_v59 = vpack.c.bf16 %v2650_v51, %v2649_v52  ;;  %v2776_v60 = vmax.f32 %v2368_v53, 0.0 }
 0x193   : > { %v5516_v61 = vpack.c.bf16 %v2778_v56, %v2777_v54  ;;  %v5191_v62 = vpack.c.bf16 %v2648_v57, %v2647_v55  ;;  %v5981_v63 = vpop.f32.mrb[80].mxu0 }
 0x194   : > { %5676 = vst [vmem:[%s6814_s7 + $0x138] sm:$0xff] %v5196_v59   ;;  %v5511_v0 = vpack.c.bf16 %v2776_v60, %v2775_v58  ;;  %v1877_v1 = vadd.f32 %v7016_v50, %v5981_v63  ;;  %v6109_v2 = vpop.f32.mrb[80].mxu1  ;;  %v1868_v3 = vpop.f32.mrb[81].mxu0 }
 0x195   : > { %5740 = vst [vmem:[%s6814_s7 + $0x338] sm:$0xff] %v5516_v61   ;;  %5675 = vst [vmem:[%s6814_s7 + $0x130] sm:$0xff] %v5191_v62   ;;  %v2389_v4 = vadd.f32 %v7016_v50, %v6109_v2  ;;  %v1869_v5 = vadd.f32 %v7016_v50, %v1868_v3  ;;  %v2380_v6 = vpop.f32.mrb[81].mxu1  ;;  %v5982_v7 = vpop.f32.mrb[82].mxu0 }
 0x196   : > { %5739 = vst [vmem:[%s6814_s7 + $0x330] sm:$0xff] %v5511_v0   ;;  %v2381_v8 = vadd.f32 %v7016_v50, %v2380_v6  ;;  %v1880_v9 = vadd.f32 %v7016_v50, %v5982_v7  ;;  %v6110_v10 = vpop.f32.mrb[82].mxu1  ;;  %v1871_v11 = vpop.f32.mrb[83].mxu0  ;;  %v2653_v15 = vmax.f32 %v1877_v1, 0.0 }
 0x197   : > { %v2392_v12 = vadd.f32 %v7016_v50, %v6110_v10  ;;  %v1872_v13 = vadd.f32 %v7016_v50, %v1871_v11  ;;  %v2383_v14 = vpop.f32.mrb[83].mxu1  ;;  %v2781_v18 = vmax.f32 %v2389_v4, 0.0  ;;  %v2651_v19 = vmax.f32 %v1869_v5, 0.0 }
 0x198   : > { %v2654_v16 = vmax.f32 %v1880_v9, 0.0  ;;  %v2384_v17 = vadd.f32 %v7016_v50, %v2383_v14  ;;  %v2779_v22 = vmax.f32 %v2381_v8, 0.0 }
 0x199   : > { %v2782_v20 = vmax.f32 %v2392_v12, 0.0  ;;  %v2652_v21 = vmax.f32 %v1872_v13, 0.0 }
 0x19a   : > { %v5206_v23 = vpack.c.bf16 %v2654_v16, %v2653_v15  ;;  %v2780_v24 = vmax.f32 %v2384_v17, 0.0 }
 0x19b   : > { %v5526_v25 = vpack.c.bf16 %v2782_v20, %v2781_v18  ;;  %v5201_v26 = vpack.c.bf16 %v2652_v21, %v2651_v19  ;;  %v5985_v27 = vpop.f32.mrb[84].mxu0 }
 0x19c   : > { %5678 = vst [vmem:[%s6814_s7 + $0x148] sm:$0xff] %v5206_v23   ;;  %v5521_v28 = vpack.c.bf16 %v2780_v24, %v2779_v22  ;;  %v1893_v29 = vadd.f32 %v7016_v50, %v5985_v27  ;;  %v6113_v30 = vpop.f32.mrb[84].mxu1  ;;  %v1884_v31 = vpop.f32.mrb[85].mxu0 }
 0x19d   : > { %5742 = vst [vmem:[%s6814_s7 + $0x348] sm:$0xff] %v5526_v25   ;;  %5677 = vst [vmem:[%s6814_s7 + $0x140] sm:$0xff] %v5201_v26   ;;  %v2405_v32 = vadd.f32 %v7016_v50, %v6113_v30  ;;  %v1885_v33 = vadd.f32 %v7016_v50, %v1884_v31  ;;  %v2396_v34 = vpop.f32.mrb[85].mxu1  ;;  %v5986_v35 = vpop.f32.mrb[86].mxu0 }
 0x19e   : > { %5741 = vst [vmem:[%s6814_s7 + $0x340] sm:$0xff] %v5521_v28   ;;  %v2397_v36 = vadd.f32 %v7016_v50, %v2396_v34  ;;  %v1896_v37 = vadd.f32 %v7016_v50, %v5986_v35  ;;  %v6114_v38 = vpop.f32.mrb[86].mxu1  ;;  %v1887_v39 = vpop.f32.mrb[87].mxu0  ;;  %v2657_v43 = vmax.f32 %v1893_v29, 0.0 }
 0x19f   : > { %v2408_v40 = vadd.f32 %v7016_v50, %v6114_v38  ;;  %v1888_v41 = vadd.f32 %v7016_v50, %v1887_v39  ;;  %v2399_v42 = vpop.f32.mrb[87].mxu1  ;;  %v2785_v46 = vmax.f32 %v2405_v32, 0.0  ;;  %v2655_v47 = vmax.f32 %v1885_v33, 0.0 }
 0x1a0   : > { %v2658_v44 = vmax.f32 %v1896_v37, 0.0  ;;  %v2400_v45 = vadd.f32 %v7016_v50, %v2399_v42  ;;  %v2783_v52 = vmax.f32 %v2397_v36, 0.0 }
 0x1a1   : > { %v2786_v48 = vmax.f32 %v2408_v40, 0.0  ;;  %v2656_v49 = vmax.f32 %v1888_v41, 0.0 }
 0x1a2   : > { %v5216_v51 = vpack.c.bf16 %v2658_v44, %v2657_v43  ;;  %v2784_v53 = vmax.f32 %v2400_v45, 0.0 }
 0x1a3   : > { %v5536_v54 = vpack.c.bf16 %v2786_v48, %v2785_v46  ;;  %v5211_v55 = vpack.c.bf16 %v2656_v49, %v2655_v47  ;;  %v5989_v56 = vpop.f32.mrb[88].mxu0 }
 0x1a4   : > { %5680 = vst [vmem:[%s6814_s7 + $0x158] sm:$0xff] %v5216_v51   ;;  %v5531_v57 = vpack.c.bf16 %v2784_v53, %v2783_v52  ;;  %v1909_v58 = vadd.f32 %v7016_v50, %v5989_v56  ;;  %v6117_v59 = vpop.f32.mrb[88].mxu1  ;;  %v1900_v60 = vpop.f32.mrb[89].mxu0 }
 0x1a5   : > { %5744 = vst [vmem:[%s6814_s7 + $0x358] sm:$0xff] %v5536_v54   ;;  %5679 = vst [vmem:[%s6814_s7 + $0x150] sm:$0xff] %v5211_v55   ;;  %v2421_v61 = vadd.f32 %v7016_v50, %v6117_v59  ;;  %v1901_v62 = vadd.f32 %v7016_v50, %v1900_v60  ;;  %v2412_v63 = vpop.f32.mrb[89].mxu1  ;;  %v5990_v0 = vpop.f32.mrb[90].mxu0 }
 0x1a6   : > { %5743 = vst [vmem:[%s6814_s7 + $0x350] sm:$0xff] %v5531_v57   ;;  %v2413_v1 = vadd.f32 %v7016_v50, %v2412_v63  ;;  %v1912_v2 = vadd.f32 %v7016_v50, %v5990_v0  ;;  %v6118_v3 = vpop.f32.mrb[90].mxu1  ;;  %v1903_v4 = vpop.f32.mrb[91].mxu0  ;;  %v2661_v8 = vmax.f32 %v1909_v58, 0.0 }
 0x1a7   : > { %v2424_v5 = vadd.f32 %v7016_v50, %v6118_v3  ;;  %v1904_v6 = vadd.f32 %v7016_v50, %v1903_v4  ;;  %v2415_v7 = vpop.f32.mrb[91].mxu1  ;;  %v2789_v11 = vmax.f32 %v2421_v61, 0.0  ;;  %v2659_v12 = vmax.f32 %v1901_v62, 0.0 }
 0x1a8   : > { %v2662_v9 = vmax.f32 %v1912_v2, 0.0  ;;  %v2416_v10 = vadd.f32 %v7016_v50, %v2415_v7  ;;  %v2787_v15 = vmax.f32 %v2413_v1, 0.0 }
 0x1a9   : > { %v2790_v13 = vmax.f32 %v2424_v5, 0.0  ;;  %v2660_v14 = vmax.f32 %v1904_v6, 0.0 }
 0x1aa   : > { %v5226_v16 = vpack.c.bf16 %v2662_v9, %v2661_v8  ;;  %v2788_v17 = vmax.f32 %v2416_v10, 0.0 }
 0x1ab   : > { %v5546_v18 = vpack.c.bf16 %v2790_v13, %v2789_v11  ;;  %v5221_v19 = vpack.c.bf16 %v2660_v14, %v2659_v12  ;;  %v5993_v20 = vpop.f32.mrb[92].mxu0 }
 0x1ac   : > { %5682 = vst [vmem:[%s6814_s7 + $0x168] sm:$0xff] %v5226_v16   ;;  %v5541_v21 = vpack.c.bf16 %v2788_v17, %v2787_v15  ;;  %v1925_v22 = vadd.f32 %v7016_v50, %v5993_v20  ;;  %v6121_v23 = vpop.f32.mrb[92].mxu1  ;;  %v1916_v24 = vpop.f32.mrb[93].mxu0 }
 0x1ad   : > { %5746 = vst [vmem:[%s6814_s7 + $0x368] sm:$0xff] %v5546_v18   ;;  %5681 = vst [vmem:[%s6814_s7 + $0x160] sm:$0xff] %v5221_v19   ;;  %v2437_v25 = vadd.f32 %v7016_v50, %v6121_v23  ;;  %v1917_v26 = vadd.f32 %v7016_v50, %v1916_v24  ;;  %v2428_v27 = vpop.f32.mrb[93].mxu1  ;;  %v5994_v28 = vpop.f32.mrb[94].mxu0 }
 0x1ae   : > { %5745 = vst [vmem:[%s6814_s7 + $0x360] sm:$0xff] %v5541_v21   ;;  %v2429_v29 = vadd.f32 %v7016_v50, %v2428_v27  ;;  %v1928_v30 = vadd.f32 %v7016_v50, %v5994_v28  ;;  %v6122_v31 = vpop.f32.mrb[94].mxu1  ;;  %v1919_v32 = vpop.f32.mrb[95].mxu0  ;;  %v2665_v36 = vmax.f32 %v1925_v22, 0.0 }
 0x1af   : > { %v2440_v33 = vadd.f32 %v7016_v50, %v6122_v31  ;;  %v1920_v34 = vadd.f32 %v7016_v50, %v1919_v32  ;;  %v2431_v35 = vpop.f32.mrb[95].mxu1  ;;  %v2793_v39 = vmax.f32 %v2437_v25, 0.0  ;;  %v2663_v40 = vmax.f32 %v1917_v26, 0.0 }
 0x1b0   : > { %v2666_v37 = vmax.f32 %v1928_v30, 0.0  ;;  %v2432_v38 = vadd.f32 %v7016_v50, %v2431_v35  ;;  %v2791_v43 = vmax.f32 %v2429_v29, 0.0 }
 0x1b1   : > { %v2794_v41 = vmax.f32 %v2440_v33, 0.0  ;;  %v2664_v42 = vmax.f32 %v1920_v34, 0.0 }
 0x1b2   : > { %v5236_v44 = vpack.c.bf16 %v2666_v37, %v2665_v36  ;;  %v2792_v45 = vmax.f32 %v2432_v38, 0.0 }
 0x1b3   : > { %v5556_v46 = vpack.c.bf16 %v2794_v41, %v2793_v39  ;;  %v5231_v47 = vpack.c.bf16 %v2664_v42, %v2663_v40  ;;  %v5997_v48 = vpop.f32.mrb[96].mxu0 }
 0x1b4   : > { %5684 = vst [vmem:[%s6814_s7 + $0x178] sm:$0xff] %v5236_v44   ;;  %v5551_v49 = vpack.c.bf16 %v2792_v45, %v2791_v43  ;;  %v1941_v52 = vadd.f32 %v7016_v50, %v5997_v48  ;;  %v6125_v51 = vpop.f32.mrb[96].mxu1  ;;  %v1932_v53 = vpop.f32.mrb[97].mxu0 }
 0x1b5   : > { %5748 = vst [vmem:[%s6814_s7 + $0x378] sm:$0xff] %v5556_v46   ;;  %5683 = vst [vmem:[%s6814_s7 + $0x170] sm:$0xff] %v5231_v47   ;;  %v2453_v54 = vadd.f32 %v7016_v50, %v6125_v51  ;;  %v1933_v55 = vadd.f32 %v7016_v50, %v1932_v53  ;;  %v2444_v56 = vpop.f32.mrb[97].mxu1  ;;  %v5998_v57 = vpop.f32.mrb[98].mxu0 }
 0x1b6   : > { %5747 = vst [vmem:[%s6814_s7 + $0x370] sm:$0xff] %v5551_v49   ;;  %v2445_v58 = vadd.f32 %v7016_v50, %v2444_v56  ;;  %v1944_v59 = vadd.f32 %v7016_v50, %v5998_v57  ;;  %v6126_v60 = vpop.f32.mrb[98].mxu1  ;;  %v1935_v61 = vpop.f32.mrb[99].mxu0  ;;  %v2669_v1 = vmax.f32 %v1941_v52, 0.0 }
 0x1b7   : > { %v2456_v62 = vadd.f32 %v7016_v50, %v6126_v60  ;;  %v1936_v63 = vadd.f32 %v7016_v50, %v1935_v61  ;;  %v2447_v0 = vpop.f32.mrb[99].mxu1  ;;  %v2797_v4 = vmax.f32 %v2453_v54, 0.0  ;;  %v2667_v5 = vmax.f32 %v1933_v55, 0.0 }
 0x1b8   : > { %v2670_v2 = vmax.f32 %v1944_v59, 0.0  ;;  %v2448_v3 = vadd.f32 %v7016_v50, %v2447_v0  ;;  %v2795_v8 = vmax.f32 %v2445_v58, 0.0 }
 0x1b9   : > { %v2798_v6 = vmax.f32 %v2456_v62, 0.0  ;;  %v2668_v7 = vmax.f32 %v1936_v63, 0.0 }
 0x1ba   : > { %v5246_v9 = vpack.c.bf16 %v2670_v2, %v2669_v1  ;;  %v2796_v10 = vmax.f32 %v2448_v3, 0.0 }
 0x1bb   : > { %v5566_v11 = vpack.c.bf16 %v2798_v6, %v2797_v4  ;;  %v5241_v12 = vpack.c.bf16 %v2668_v7, %v2667_v5  ;;  %v6001_v13 = vpop.f32.mrb[100].mxu0 }
 0x1bc   : > { %5686 = vst [vmem:[%s6814_s7 + $0x188] sm:$0xff] %v5246_v9   ;;  %v5561_v14 = vpack.c.bf16 %v2796_v10, %v2795_v8  ;;  %v1957_v15 = vadd.f32 %v7016_v50, %v6001_v13  ;;  %v6129_v16 = vpop.f32.mrb[100].mxu1  ;;  %v1948_v17 = vpop.f32.mrb[101].mxu0 }
 0x1bd   : > { %5750 = vst [vmem:[%s6814_s7 + $0x388] sm:$0xff] %v5566_v11   ;;  %5685 = vst [vmem:[%s6814_s7 + $0x180] sm:$0xff] %v5241_v12   ;;  %v2469_v18 = vadd.f32 %v7016_v50, %v6129_v16  ;;  %v1949_v19 = vadd.f32 %v7016_v50, %v1948_v17  ;;  %v2460_v20 = vpop.f32.mrb[101].mxu1  ;;  %v6002_v21 = vpop.f32.mrb[102].mxu0 }
 0x1be   : > { %5749 = vst [vmem:[%s6814_s7 + $0x380] sm:$0xff] %v5561_v14   ;;  %v2461_v22 = vadd.f32 %v7016_v50, %v2460_v20  ;;  %v1960_v23 = vadd.f32 %v7016_v50, %v6002_v21  ;;  %v6130_v24 = vpop.f32.mrb[102].mxu1  ;;  %v1951_v25 = vpop.f32.mrb[103].mxu0  ;;  %v2673_v29 = vmax.f32 %v1957_v15, 0.0 }
 0x1bf   : > { %v2472_v26 = vadd.f32 %v7016_v50, %v6130_v24  ;;  %v1952_v27 = vadd.f32 %v7016_v50, %v1951_v25  ;;  %v2463_v28 = vpop.f32.mrb[103].mxu1  ;;  %v2801_v32 = vmax.f32 %v2469_v18, 0.0  ;;  %v2671_v33 = vmax.f32 %v1949_v19, 0.0 }
 0x1c0   : > { %v2674_v30 = vmax.f32 %v1960_v23, 0.0  ;;  %v2464_v31 = vadd.f32 %v7016_v50, %v2463_v28  ;;  %v2799_v36 = vmax.f32 %v2461_v22, 0.0 }
 0x1c1   : > { %v2802_v34 = vmax.f32 %v2472_v26, 0.0  ;;  %v2672_v35 = vmax.f32 %v1952_v27, 0.0 }
 0x1c2   : > { %v5256_v37 = vpack.c.bf16 %v2674_v30, %v2673_v29  ;;  %v2800_v38 = vmax.f32 %v2464_v31, 0.0 }
 0x1c3   : > { %v5576_v39 = vpack.c.bf16 %v2802_v34, %v2801_v32  ;;  %v5251_v40 = vpack.c.bf16 %v2672_v35, %v2671_v33  ;;  %v6005_v41 = vpop.f32.mrb[104].mxu0 }
 0x1c4   : > { %5688 = vst [vmem:[%s6814_s7 + $0x198] sm:$0xff] %v5256_v37   ;;  %v5571_v42 = vpack.c.bf16 %v2800_v38, %v2799_v36  ;;  %v1973_v43 = vadd.f32 %v7016_v50, %v6005_v41  ;;  %v6133_v44 = vpop.f32.mrb[104].mxu1  ;;  %v1964_v45 = vpop.f32.mrb[105].mxu0 }
 0x1c5   : > { %5752 = vst [vmem:[%s6814_s7 + $0x398] sm:$0xff] %v5576_v39   ;;  %5687 = vst [vmem:[%s6814_s7 + $0x190] sm:$0xff] %v5251_v40   ;;  %v2485_v46 = vadd.f32 %v7016_v50, %v6133_v44  ;;  %v1965_v47 = vadd.f32 %v7016_v50, %v1964_v45  ;;  %v2476_v48 = vpop.f32.mrb[105].mxu1  ;;  %v6006_v49 = vpop.f32.mrb[106].mxu0 }
 0x1c6   : > { %5751 = vst [vmem:[%s6814_s7 + $0x390] sm:$0xff] %v5571_v42   ;;  %v2477_v52 = vadd.f32 %v7016_v50, %v2476_v48  ;;  %v1976_v51 = vadd.f32 %v7016_v50, %v6006_v49  ;;  %v6134_v53 = vpop.f32.mrb[106].mxu1  ;;  %v1967_v54 = vpop.f32.mrb[107].mxu0  ;;  %v2677_v58 = vmax.f32 %v1973_v43, 0.0 }
 0x1c7   : > { %v2488_v55 = vadd.f32 %v7016_v50, %v6134_v53  ;;  %v1968_v56 = vadd.f32 %v7016_v50, %v1967_v54  ;;  %v2479_v57 = vpop.f32.mrb[107].mxu1  ;;  %v2805_v61 = vmax.f32 %v2485_v46, 0.0  ;;  %v2675_v62 = vmax.f32 %v1965_v47, 0.0 }
 0x1c8   : > { %v2678_v59 = vmax.f32 %v1976_v51, 0.0  ;;  %v2480_v60 = vadd.f32 %v7016_v50, %v2479_v57  ;;  %v2803_v1 = vmax.f32 %v2477_v52, 0.0 }
 0x1c9   : > { %v2806_v63 = vmax.f32 %v2488_v55, 0.0  ;;  %v2676_v0 = vmax.f32 %v1968_v56, 0.0 }
 0x1ca   : > { %v5266_v2 = vpack.c.bf16 %v2678_v59, %v2677_v58  ;;  %v2804_v3 = vmax.f32 %v2480_v60, 0.0 }
 0x1cb   : > { %v5586_v4 = vpack.c.bf16 %v2806_v63, %v2805_v61  ;;  %v5261_v5 = vpack.c.bf16 %v2676_v0, %v2675_v62  ;;  %v6009_v6 = vpop.f32.mrb[108].mxu0 }
 0x1cc   : > { %5690 = vst [vmem:[%s6814_s7 + $0x1a8] sm:$0xff] %v5266_v2   ;;  %v5581_v7 = vpack.c.bf16 %v2804_v3, %v2803_v1  ;;  %v1989_v8 = vadd.f32 %v7016_v50, %v6009_v6  ;;  %v6137_v9 = vpop.f32.mrb[108].mxu1  ;;  %v1980_v10 = vpop.f32.mrb[109].mxu0 }
 0x1cd   : > { %5754 = vst [vmem:[%s6814_s7 + $0x3a8] sm:$0xff] %v5586_v4   ;;  %5689 = vst [vmem:[%s6814_s7 + $0x1a0] sm:$0xff] %v5261_v5   ;;  %v2501_v11 = vadd.f32 %v7016_v50, %v6137_v9  ;;  %v1981_v12 = vadd.f32 %v7016_v50, %v1980_v10  ;;  %v2492_v13 = vpop.f32.mrb[109].mxu1  ;;  %v6010_v14 = vpop.f32.mrb[110].mxu0 }
 0x1ce   : > { %5753 = vst [vmem:[%s6814_s7 + $0x3a0] sm:$0xff] %v5581_v7   ;;  %v2493_v15 = vadd.f32 %v7016_v50, %v2492_v13  ;;  %v1992_v16 = vadd.f32 %v7016_v50, %v6010_v14  ;;  %v6138_v17 = vpop.f32.mrb[110].mxu1  ;;  %v1983_v18 = vpop.f32.mrb[111].mxu0  ;;  %v2681_v22 = vmax.f32 %v1989_v8, 0.0 }
 0x1cf   : > { %v2504_v19 = vadd.f32 %v7016_v50, %v6138_v17  ;;  %v1984_v20 = vadd.f32 %v7016_v50, %v1983_v18  ;;  %v2495_v21 = vpop.f32.mrb[111].mxu1  ;;  %v2809_v25 = vmax.f32 %v2501_v11, 0.0  ;;  %v2679_v26 = vmax.f32 %v1981_v12, 0.0 }
 0x1d0   : > { %v2682_v23 = vmax.f32 %v1992_v16, 0.0  ;;  %v2496_v24 = vadd.f32 %v7016_v50, %v2495_v21  ;;  %v2807_v29 = vmax.f32 %v2493_v15, 0.0 }
 0x1d1   : > { %v2810_v27 = vmax.f32 %v2504_v19, 0.0  ;;  %v2680_v28 = vmax.f32 %v1984_v20, 0.0 }
 0x1d2   : > { %v5276_v30 = vpack.c.bf16 %v2682_v23, %v2681_v22  ;;  %v2808_v31 = vmax.f32 %v2496_v24, 0.0 }
 0x1d3   : > { %v5596_v32 = vpack.c.bf16 %v2810_v27, %v2809_v25  ;;  %v5271_v33 = vpack.c.bf16 %v2680_v28, %v2679_v26  ;;  %v6013_v34 = vpop.f32.mrb[112].mxu0 }
 0x1d4   : > { %5692 = vst [vmem:[%s6814_s7 + $0x1b8] sm:$0xff] %v5276_v30   ;;  %v5591_v35 = vpack.c.bf16 %v2808_v31, %v2807_v29  ;;  %v2005_v36 = vadd.f32 %v7016_v50, %v6013_v34  ;;  %v6141_v37 = vpop.f32.mrb[112].mxu1  ;;  %v1996_v38 = vpop.f32.mrb[113].mxu0 }
 0x1d5   : > { %5756 = vst [vmem:[%s6814_s7 + $0x3b8] sm:$0xff] %v5596_v32   ;;  %5691 = vst [vmem:[%s6814_s7 + $0x1b0] sm:$0xff] %v5271_v33   ;;  %v2517_v39 = vadd.f32 %v7016_v50, %v6141_v37  ;;  %v1997_v40 = vadd.f32 %v7016_v50, %v1996_v38  ;;  %v2508_v41 = vpop.f32.mrb[113].mxu1  ;;  %v6014_v42 = vpop.f32.mrb[114].mxu0 }
 0x1d6   : > { %5755 = vst [vmem:[%s6814_s7 + $0x3b0] sm:$0xff] %v5591_v35   ;;  %v2509_v43 = vadd.f32 %v7016_v50, %v2508_v41  ;;  %v2008_v44 = vadd.f32 %v7016_v50, %v6014_v42  ;;  %v6142_v45 = vpop.f32.mrb[114].mxu1  ;;  %v1999_v46 = vpop.f32.mrb[115].mxu0  ;;  %v2685_v52 = vmax.f32 %v2005_v36, 0.0 }
 0x1d7   : > { %v2520_v47 = vadd.f32 %v7016_v50, %v6142_v45  ;;  %v2000_v48 = vadd.f32 %v7016_v50, %v1999_v46  ;;  %v2511_v49 = vpop.f32.mrb[115].mxu1  ;;  %v2813_v54 = vmax.f32 %v2517_v39, 0.0  ;;  %v2683_v55 = vmax.f32 %v1997_v40, 0.0 }
 0x1d8   : > { %v2686_v51 = vmax.f32 %v2008_v44, 0.0  ;;  %v2512_v53 = vadd.f32 %v7016_v50, %v2511_v49  ;;  %v2811_v58 = vmax.f32 %v2509_v43, 0.0 }
 0x1d9   : > { %v2814_v56 = vmax.f32 %v2520_v47, 0.0  ;;  %v2684_v57 = vmax.f32 %v2000_v48, 0.0 }
 0x1da   : > { %v5286_v59 = vpack.c.bf16 %v2686_v51, %v2685_v52  ;;  %v2812_v60 = vmax.f32 %v2512_v53, 0.0 }
 0x1db   : > { %v5606_v61 = vpack.c.bf16 %v2814_v56, %v2813_v54  ;;  %v5281_v62 = vpack.c.bf16 %v2684_v57, %v2683_v55  ;;  %v6017_v63 = vpop.f32.mrb[116].mxu0 }
 0x1dc   : > { %5694 = vst [vmem:[%s6814_s7 + $0x1c8] sm:$0xff] %v5286_v59   ;;  %v5601_v0 = vpack.c.bf16 %v2812_v60, %v2811_v58  ;;  %v2021_v1 = vadd.f32 %v7016_v50, %v6017_v63  ;;  %v6145_v2 = vpop.f32.mrb[116].mxu1  ;;  %v2012_v3 = vpop.f32.mrb[117].mxu0 }
 0x1dd   : > { %5758 = vst [vmem:[%s6814_s7 + $0x3c8] sm:$0xff] %v5606_v61   ;;  %5693 = vst [vmem:[%s6814_s7 + $0x1c0] sm:$0xff] %v5281_v62   ;;  %v2533_v4 = vadd.f32 %v7016_v50, %v6145_v2  ;;  %v2013_v5 = vadd.f32 %v7016_v50, %v2012_v3  ;;  %v2524_v6 = vpop.f32.mrb[117].mxu1  ;;  %v6018_v7 = vpop.f32.mrb[118].mxu0 }
 0x1de   : > { %5757 = vst [vmem:[%s6814_s7 + $0x3c0] sm:$0xff] %v5601_v0   ;;  %v2525_v8 = vadd.f32 %v7016_v50, %v2524_v6  ;;  %v2024_v9 = vadd.f32 %v7016_v50, %v6018_v7  ;;  %v6146_v10 = vpop.f32.mrb[118].mxu1  ;;  %v2015_v11 = vpop.f32.mrb[119].mxu0  ;;  %v2689_v15 = vmax.f32 %v2021_v1, 0.0 }
 0x1df   : > { %v2536_v12 = vadd.f32 %v7016_v50, %v6146_v10  ;;  %v2016_v13 = vadd.f32 %v7016_v50, %v2015_v11  ;;  %v2527_v14 = vpop.f32.mrb[119].mxu1  ;;  %v2817_v18 = vmax.f32 %v2533_v4, 0.0  ;;  %v2687_v19 = vmax.f32 %v2013_v5, 0.0 }
 0x1e0   : > { %v2690_v16 = vmax.f32 %v2024_v9, 0.0  ;;  %v2528_v17 = vadd.f32 %v7016_v50, %v2527_v14  ;;  %v2815_v22 = vmax.f32 %v2525_v8, 0.0 }
 0x1e1   : > { %v2818_v20 = vmax.f32 %v2536_v12, 0.0  ;;  %v2688_v21 = vmax.f32 %v2016_v13, 0.0 }
 0x1e2   : > { %v5296_v23 = vpack.c.bf16 %v2690_v16, %v2689_v15  ;;  %v2816_v24 = vmax.f32 %v2528_v17, 0.0 }
 0x1e3   : > { %v5616_v25 = vpack.c.bf16 %v2818_v20, %v2817_v18  ;;  %v5291_v26 = vpack.c.bf16 %v2688_v21, %v2687_v19  ;;  %v6021_v27 = vpop.f32.mrb[120].mxu0 }
 0x1e4   : > { %5696 = vst [vmem:[%s6814_s7 + $0x1d8] sm:$0xff] %v5296_v23   ;;  %v5611_v28 = vpack.c.bf16 %v2816_v24, %v2815_v22  ;;  %v2037_v29 = vadd.f32 %v7016_v50, %v6021_v27  ;;  %v6149_v30 = vpop.f32.mrb[120].mxu1  ;;  %v2028_v31 = vpop.f32.mrb[121].mxu0 }
 0x1e5   : > { %5760 = vst [vmem:[%s6814_s7 + $0x3d8] sm:$0xff] %v5616_v25   ;;  %5695 = vst [vmem:[%s6814_s7 + $0x1d0] sm:$0xff] %v5291_v26   ;;  %v2549_v32 = vadd.f32 %v7016_v50, %v6149_v30  ;;  %v2029_v33 = vadd.f32 %v7016_v50, %v2028_v31  ;;  %v2540_v34 = vpop.f32.mrb[121].mxu1  ;;  %v6022_v35 = vpop.f32.mrb[122].mxu0 }
 0x1e6   : > { %5759 = vst [vmem:[%s6814_s7 + $0x3d0] sm:$0xff] %v5611_v28   ;;  %v2541_v36 = vadd.f32 %v7016_v50, %v2540_v34  ;;  %v2040_v37 = vadd.f32 %v7016_v50, %v6022_v35  ;;  %v6150_v38 = vpop.f32.mrb[122].mxu1  ;;  %v2031_v39 = vpop.f32.mrb[123].mxu0  ;;  %v2693_v43 = vmax.f32 %v2037_v29, 0.0 }
 0x1e7   : > { %v2552_v40 = vadd.f32 %v7016_v50, %v6150_v38  ;;  %v2032_v41 = vadd.f32 %v7016_v50, %v2031_v39  ;;  %v2543_v42 = vpop.f32.mrb[123].mxu1  ;;  %v2821_v46 = vmax.f32 %v2549_v32, 0.0  ;;  %v2691_v47 = vmax.f32 %v2029_v33, 0.0 }
 0x1e8   : > { %v2694_v44 = vmax.f32 %v2040_v37, 0.0  ;;  %v2544_v45 = vadd.f32 %v7016_v50, %v2543_v42  ;;  %v2819_v52 = vmax.f32 %v2541_v36, 0.0  ;;  %v6364_v50 = vld [vmem:[%s7286_s2] ss:$0 sm:$0xff] }
 0x1e9   : > { %v2822_v48 = vmax.f32 %v2552_v40, 0.0  ;;  %v2692_v49 = vmax.f32 %v2032_v41, 0.0 }
 0x1ea   : > { %v5306_v51 = vpack.c.bf16 %v2694_v44, %v2693_v43  ;;  %v2820_v53 = vmax.f32 %v2544_v45, 0.0 }
 0x1eb   : > { %v5626_v54 = vpack.c.bf16 %v2822_v48, %v2821_v46  ;;  %v5301_v55 = vpack.c.bf16 %v2692_v49, %v2691_v47  ;;  %v6025_v56 = vpop.f32.mrb[124].mxu0 }
 0x1ec   : > { %5698 = vst [vmem:[%s6814_s7 + $0x1e8] sm:$0xff] %v5306_v51   ;;  %v5621_v57 = vpack.c.bf16 %v2820_v53, %v2819_v52  ;;  %v2053_v58 = vadd.f32 %v6364_v50, %v6025_v56  ;;  %v6153_v59 = vpop.f32.mrb[124].mxu1  ;;  %v2044_v60 = vpop.f32.mrb[125].mxu0 }
 0x1ed   : > { %5762 = vst [vmem:[%s6814_s7 + $0x3e8] sm:$0xff] %v5626_v54   ;;  %5697 = vst [vmem:[%s6814_s7 + $0x1e0] sm:$0xff] %v5301_v55   ;;  %v2565_v61 = vadd.f32 %v6364_v50, %v6153_v59  ;;  %v2045_v62 = vadd.f32 %v6364_v50, %v2044_v60  ;;  %v2556_v63 = vpop.f32.mrb[125].mxu1  ;;  %v6026_v0 = vpop.f32.mrb[126].mxu0 }
 0x1ee   : > { %5761 = vst [vmem:[%s6814_s7 + $0x3e0] sm:$0xff] %v5621_v57   ;;  %v2557_v1 = vadd.f32 %v6364_v50, %v2556_v63  ;;  %v2056_v2 = vadd.f32 %v6364_v50, %v6026_v0  ;;  %v6154_v3 = vpop.f32.mrb[126].mxu1  ;;  %v2047_v4 = vpop.f32.mrb[127].mxu0  ;;  %v2697_v8 = vmax.f32 %v2053_v58, 0.0 }
 0x1ef   : > { %v2568_v5 = vadd.f32 %v6364_v50, %v6154_v3  ;;  %v2048_v6 = vadd.f32 %v6364_v50, %v2047_v4  ;;  %v2559_v7 = vpop.f32.mrb[127].mxu1  ;;  %v2825_v11 = vmax.f32 %v2565_v61, 0.0  ;;  %v2695_v12 = vmax.f32 %v2045_v62, 0.0 }
 0x1f0   : > { %v2698_v9 = vmax.f32 %v2056_v2, 0.0  ;;  %v2560_v10 = vadd.f32 %v6364_v50, %v2559_v7  ;;  %v2823_v15 = vmax.f32 %v2557_v1, 0.0 }
 0x1f1   : > { %v2826_v13 = vmax.f32 %v2568_v5, 0.0  ;;  %v2696_v14 = vmax.f32 %v2048_v6, 0.0 }
 0x1f2   : > { %v5316_v16 = vpack.c.bf16 %v2698_v9, %v2697_v8  ;;  %v2824_v17 = vmax.f32 %v2560_v10, 0.0 }
 0x1f3   : > { %v5636_v18 = vpack.c.bf16 %v2826_v13, %v2825_v11  ;;  %v5311_v19 = vpack.c.bf16 %v2696_v14, %v2695_v12 }
 0x1f4   : > { %5700 = vst [vmem:[%s6814_s7 + $0x1f8] sm:$0xff] %v5316_v16   ;;  %v5631_v20 = vpack.c.bf16 %v2824_v17, %v2823_v15 }
 0x1f5   : > { %5764 = vst [vmem:[%s6814_s7 + $0x3f8] sm:$0xff] %v5636_v18   ;;  %5699 = vst [vmem:[%s6814_s7 + $0x1f0] sm:$0xff] %v5311_v19  }
 0x1f6   : > { %5763 = vst [vmem:[%s6814_s7 + $0x3f0] sm:$0xff] %v5631_v20  }
 0x1f7   : > { %6378 = shalt.err (!%p6375_p7)
}
 0x1f8   : > { %s6379_s5 = scalar_lea.hbm %s7222_s29, 16384  ;;  %s6383_s20 = scalar_lea.hbm %s7287_s3, 65536 }
 0x1f9   : > { %p6380_p9 = scmp.ne.s32.totalorder %s7222_s29, %s6379_s5  ;;  %p6384_p12 = scmp.lt.u32.totalorder %s7222_s29, %s7287_s3 }
 0x1fa   : > { %p6385_p13 = scmp.lt.u32.totalorder %s6383_s20, %s6379_s5  ;;  %p6387_p1 = scmp.lt.u32.totalorder %s6379_s5, %s7222_s29 }
 0x1fb   : > { %p6381_p10 = pnand %p6380_p9, %p6536_p3 }
 0x1fc   : > { %p6386_p0 = por %p6385_p13, %p6384_p12 }
 0x1fd   : > { %p6382_p11 = pneg %p6381_p10 }
 0x1fe   : > { %p6388_p2 = por %p6387_p1, %p6386_p0 }
 0x200   : > { %p6389_p4 = pnand %p6388_p2, %p6382_p11 }
 0x202   : > { %6392 = shalt.err (!%p6389_p4)
}
 0x203   : > { %s6463_s16 = smov 64   ;;  %s6464_s27 = smov 4  }
 0x204   : > { %6159 = dma.vmem_to_hbm [thread:$0]  (%p6536_p3), %s7224_s24, 16384, %s7222_s29, %s7232_s4, %s6463_s16, %s6463_s16, %s6464_s27  }
 0x205 PF: > { %p6165_p5 = scmp.ge.s32.totalorder %s6459_s19, 2  ;;  %s4139_s28 = sand.u32 1, %s6431_s12  }
 0x206   : > { %s4140_s6 = scalar_lea.sflag [#allocation3], %s4139_s28 }
 0x207   : > { %p6162_p6 = pnand %p6165_p5, %p6545_p8 }
 0x209   : > { %6426 = dma.done.wait (!%p6162_p6), %s4140_s6, 16384  }
 0x20a   : > { %6428 = vsyncadd (!%p6162_p6), %s4140_s6, 4294950912  ;;  %s16_s19 = sadd.s32 1, %s6459_s19   ;;  %s7290_s12 = smov %s6435_s13 }
 0x20b   : > { %p13_p7 = scmp.ge.s32.totalorder %s16_s19, 6   ;;  %s7291_s13 = smov %s6439_s14 }
 0x20c   : > { %s7292_s14 = smov %s6554_s30  ;;  %s7293_s15 = smov %s6451_s17 }
 0x20d   : > { %s7294_s16 = smov %s6455_s18  ;;  %s7295_s17 = smov %s7298_s22 }
 0x20e   : > { %s7296_s18 = smov %s7302_s23  ;;  %15 = sbr.rel (!%p13_p7) target bundleno = 5 (0x5), region = 67 }
 0x215   :  { %4145 = vsyncpa [#allocation3], 1 }
 0x216   :  { %4147 = vsyncpa [#allocation3 + $0x1], 1 }

// kernel: tpu_custom_call.1
= control target key start
LH: loop header
LB: loop body
LE: loop exit
PB: predicated region body
PF: predicated region fallthrough
CT: control target
= control target key end

     0   :  { %8 = vsyncpa [#allocation3], 0  ;;  %s7284_s0 = inlined_call_operand.vmem [shape: bf16[2,64,64,27], index: 0, kind: input, shape index: {}]   ;;  %s7285_s1 = inlined_call_operand.vmem [shape: bf16[27,128], index: 1, kind: input, shape index: {}]   ;;  %s7286_s2 = inlined_call_operand.vmem [shape: f32[1,128], index: 2, kind: input, shape index: {}]   ;;  %s7287_s3 = inlined_call_operand.hbm [shape: bf16[2,64,64,128], index: 3, kind: output, shape index: {}]  }
   0x1   :  { %10 = vsyncpa [#allocation3 + $0x1], 0  ;;  %s6485_s12 = smov 0   ;;  %s6487_s13 = smov 0  }
   0x2   :  { %s6489_s14 = smov 0   ;;  %s6491_s15 = smov 0  }
   0x3   :  { %s6493_s16 = smov 0   ;;  %s6495_s17 = smov 0  }
   0x4   :  { %s6497_s18 = smov 0   ;;  %s6499_s19 = smov 0  }
   0x5 LB: > { %s4209_s20 = sadd.s32 4294967295, %s6459_s19   ;;  %s4210_s21 = sadd.s32 4294967294, %s6459_s19   ;;  %s6459_s19 = sphi %s6499_s19, %s16_s19   ;;  %s6455_s18 = sphi %s6497_s18, %s7296_s18   ;;  %s6451_s17 = sphi %s6495_s17, %s7295_s17   ;;  %s6447_s16 = sphi %s6493_s16, %s7294_s16   ;;  %s6443_s15 = sphi %s6491_s15, %s7293_s15   ;;  %s6439_s14 = sphi %s6489_s14, %s7292_s14   ;;  %s6435_s13 = sphi %s6487_s13, %s7291_s13   ;;  %s6431_s12 = sphi %s6485_s12, %s7290_s12  }
   0x6   : > { %s25_s22 = sadd.s32 1, %s6451_s17  ;;  %s28_s23 = sadd.s32 1, %s6455_s18 }
   0x7   : > { %p26_p0 = scmp.ge.s32.totalorder %s25_s22, 2  ;;  %p117_p1 = scmp.ne.s32.totalorder %s6439_s14, %s6435_s13 }
   0x8   : > { %p118_p2 = scmp.eq.s32.totalorder %s4209_s20, 3  ;;  %p123_p5 = scmp.ne.s32.totalorder %s6435_s13, %s6431_s12 }
   0x9   : > { %s7298_s22 = smov (%p26_p0, %s25_s22), 0  ;;  %s7300_s23 = smov (!%p26_p0, %s28_s23), %s6455_s18 }
   0xa   : > { %s103_s24 = ssub.s32 %s6451_s17, %s7298_s22  ;;  %p6536_p3 = por %p118_p2, %p117_p1 }
   0xb   : > { %p30_p4 = scmp.ge.s32.totalorder %s7300_s23, 2  ;;  %p124_p6 = scmp.eq.s32.totalorder %s4210_s21, 3 }
   0xc   : > { %p4213_p7 = scmp.ge.s32.totalorder %s6459_s19, 1  ;;  %p162_p9 = scmp.lt.s32.totalorder %s6459_s19, 5 }
   0xd   : > { %s7302_s23 = smov (%p30_p4, %s7300_s23), 0  ;;  %p6545_p8 = por %p124_p6, %p123_p5 }
   0xe   : > { %s102_s27 = ssub.s32 %s6455_s18, %s7302_s23  ;;  %s107_s28 = sadd.s32 1, %s6439_s14 }
   0xf   : > { %s104_s29 = sor.u32 %s103_s24, %s102_s27  ;;  %p163_p10 = pnand %p4213_p7, %p162_p9 }
  0x10   : > { %p105_p11 = scmp.eq.s32.totalorder %s104_s29, 0  ;;  %v6233_v0 = vld [vmem:[%s7285_s1] sm:$0xff] (!%p163_p10)   ;;  %vm1507_vm0 = vcmask (!%p163_p10), 1044480   ;;  %v6234_v1 = vld [vmem:[%s7285_s1 + $0x8] sm:$0x3f] (!%p163_p10)   ;;  %vm1508_vm1 = vcmask (!%p163_p10), 1045504  }
  0x11   : > { %166 = sbr.rel (%p163_p10) target bundleno = 517 (0x205), region = 32  ;;  %5895 = vmatprep.subr.bf16.mxu0 (!%p163_p10), %v6233_v0  ;;  %6155 = vmatprep.subr.bf16.mxu1 (!%p163_p10), %v6233_v0  ;;  %s4215_s8 = sshll.u32 (!%p163_p10), %s6443_s15, 5  ;;  %v6461_v2 = vmov (!%p163_p10), 65535   ;;  %vm1122_vm2 = vcmask (!%p163_p10), 220160  }
  0x12   : > { %s6554_s30 = scalar_select %p105_p11, %s6439_s14, %s107_s28  }
  0x13   : > { %p192_p12 = scmp.lt.s32.totalorder (!%p163_p10), %s6447_s16, 1  ;;  %5896 = vmatpush3.bf16.msra.mxu0 (!%p163_p10), %v6233_v0  ;;  %6157 = vmatpush3.bf16.msra.mxu1 (!%p163_p10), %v6233_v0  ;;  %v1509_v3 = vsel (!%p163_p10), %vm1507_vm0, 4294967295, %v6461_v2  ;;  %p194_p13 = scmp.lt.s32.totalorder (!%p163_p10), %s4215_s8, 63 }
  0x14   : > { %v1510_v4 = vsel (!%p163_p10), %vm1508_vm1, %v1509_v3, 0  ;;  %s188_s5 = sand.u32 (!%p163_p10), 1, %s6435_s13  }
  0x15   : > { %v1512_v5 = vand.u32 (!%p163_p10), %v6234_v1, %v1510_v4  ;;  %s4214_s6 = sshll.u32 (!%p163_p10), %s188_s5, 10  ;;  %s7232_s4 = scalar_lea.sflag (!%p163_p10), [#allocation3], %s188_s5 }
  0x16   : > { %s6814_s7 = scalar_lea.vmem (!%p163_p10), [#allocation2], %s4214_s6 }
  0x17   : > { %5897 = vmatprep.subr.bf16.mxu0 (!%p163_p10), %v1512_v5  ;;  %6156 = vmatprep.subr.bf16.mxu1 (!%p163_p10), %v1512_v5  ;;  %s4124_s24 = sshll.u32 (!%p163_p10), %s6814_s7, 4  ;;  %s7224_s24 = int_to_ptr.vmem [resolvable:$true] %s4124_s24 }
  0x18   : > { %s193_s9 = scalar_select %p192_p12, %s6447_s16, 1  ;;  %5898 = vmatpush3.bf16.msra.mxu0 %v1512_v5  ;;  %6158 = vmatpush3.bf16.msra.mxu1 %v1512_v5 }
  0x19   : > { %s7304_s8 = smov (!%p194_p13, %s4215_s8), 63  ;;  %s6365_s6 = scalar_lea.vmem %s7224_s24, 16384 }
  0x1a   : > { %s4217_s10 = sshll.u32 %s193_s9, 9  ;;  %s4216_s11 = sshll.u32 %s7304_s8, 3 }
  0x1b   : > { %s198_s20 = sadd.s32 %s4217_s10, %s4216_s11  ;;  %s4997_s10 = sshll.u32 %s6443_s15, 8 }
  0x1c   : > { %s4218_s21 = sshll.u32 %s198_s20, 2  ;;  %s4737_s11 = sshll.u32 %s6447_s16, 9 }
  0x1d   : > { %s6568_s28 = scalar_lea.vmem %s7284_s0, %s4218_s21  ;;  %s4121_s15 = sadd.s32 %s4997_s10, %s4737_s11 }
  0x1e   : > { %v6235_v6 = vld [vmem:[%s6568_s28] sm:$0xff]   ;;  %v6237_v8 = vld [vmem:[%s6568_s28 + $0x8] sm:$0xff]   ;;  %v6239_v10 = vld [vmem:[%s6568_s28 + $0x10] sm:$0xff]   ;;  %s4738_s16 = sshll.u32 %s4121_s15, 6  ;;  %p6366_p0 = scmp.ne.s32.totalorder %s7224_s24, %s6365_s6 }
  0x1f   : > { %v6236_v7 = vld [vmem:[%s6568_s28 + $0x200] sm:$0xff]   ;;  %5899 = vmatprep.mubr.msk.bf16.mxu0 %vm1122_vm2, %v6235_v6  ;;  %v6238_v9 = vld [vmem:[%s6568_s28 + $0x208] sm:$0xff]   ;;  %v6240_v11 = vld [vmem:[%s6568_s28 + $0x210] sm:$0xff]   ;;  %s7222_s29 = scalar_lea.hbm %s7287_s3, %s4738_s16  ;;  %s6462_s8 = smov [#allocation2]  }
  0x20   : > { %6027 = vmatprep.mubr.msk.bf16.mxu1 %vm1122_vm2, %v6236_v7  ;;  %5900 = vmatmul.mubr.msk.bf16.vlgmr.msra.gmra.mrb[0].mxu0 %vm1122_vm2, %v6237_v8  ;;  %v6241_v12 = vld [vmem:[%s6568_s28 + $0x18] sm:$0xff]   ;;  %v6243_v14 = vld [vmem:[%s6568_s28 + $0x20] sm:$0xff]   ;;  %v6245_v16 = vld [vmem:[%s6568_s28 + $0x28] sm:$0xff]   ;;  %p6367_p1 = pnand %p6366_p0, %p6536_p3  ;;  %s6369_s9 = sshll.u32 %s6462_s8, 4  ;;  %s6370_s9 = int_to_ptr.vmem [resolvable:$false] %s6369_s9 }
  0x21   : > { %6028 = vmatmul.mubr.msk.bf16.vlgmr.msra.gmra.mrb[0].mxu1 %vm1122_vm2, %v6238_v9  ;;  %5903 = vmatprep.mubr.msk.bf16.mxu0 %vm1122_vm2, %v6239_v10  ;;  %v6242_v13 = vld [vmem:[%s6568_s28 + $0x218] sm:$0xff]   ;;  %v6244_v15 = vld [vmem:[%s6568_s28 + $0x220] sm:$0xff]   ;;  %v6246_v17 = vld [vmem:[%s6568_s28 + $0x228] sm:$0xff]   ;;  %s6371_s10 = scalar_lea.vmem %s6370_s9, 32768  ;;  %p6372_p4 = scmp.lt.s32.totalorder %s7224_s24, %s6370_s9 }
  0x22   : > { %6031 = vmatprep.mubr.msk.bf16.mxu1 %vm1122_vm2, %v6240_v11  ;;  %v6247_v18 = vld [vmem:[%s6568_s28 + $0x30] sm:$0xff]   ;;  %v6249_v20 = vld [vmem:[%s6568_s28 + $0x38] sm:$0xff]   ;;  %v6251_v22 = vld [vmem:[%s6568_s28 + $0x40] sm:$0xff]   ;;  %p6368_p2 = pneg %p6367_p1  ;;  %p6373_p5 = scmp.lt.s32.totalorder %s6371_s10, %s6365_s6 }
  0x23   : > { %v6248_v19 = vld [vmem:[%s6568_s28 + $0x230] sm:$0xff]   ;;  %v6250_v21 = vld [vmem:[%s6568_s28 + $0x238] sm:$0xff]   ;;  %v6252_v23 = vld [vmem:[%s6568_s28 + $0x240] sm:$0xff]  }
  0x24   : > { %v6253_v24 = vld [vmem:[%s6568_s28 + $0x48] sm:$0xff]   ;;  %v6255_v26 = vld [vmem:[%s6568_s28 + $0x50] sm:$0xff]   ;;  %v6257_v28 = vld [vmem:[%s6568_s28 + $0x58] sm:$0xff]   ;;  %p6374_p6 = por %p6373_p5, %p6372_p4 }
  0x25   : > { %v6254_v25 = vld [vmem:[%s6568_s28 + $0x248] sm:$0xff]   ;;  %v6256_v27 = vld [vmem:[%s6568_s28 + $0x250] sm:$0xff]   ;;  %v6258_v29 = vld [vmem:[%s6568_s28 + $0x258] sm:$0xff]  }
  0x26   : > { %v6259_v30 = vld [vmem:[%s6568_s28 + $0x60] sm:$0xff]   ;;  %v6261_v32 = vld [vmem:[%s6568_s28 + $0x68] sm:$0xff]   ;;  %v6263_v34 = vld [vmem:[%s6568_s28 + $0x70] sm:$0xff]   ;;  %p6375_p7 = pnand %p6374_p6, %p6368_p2 }
  0x27   : > { %v6260_v31 = vld [vmem:[%s6568_s28 + $0x260] sm:$0xff]   ;;  %v6262_v33 = vld [vmem:[%s6568_s28 + $0x268] sm:$0xff]   ;;  %v6264_v35 = vld [vmem:[%s6568_s28 + $0x270] sm:$0xff]  }
  0x28   : > { %5904 = vmatmul.mubr.msk.bf16.gmra.mrb[4].mxu0 %vm1122_vm2, %v6241_v12  ;;  %v6265_v36 = vld [vmem:[%s6568_s28 + $0x78] sm:$0xff]   ;;  %v6267_v38 = vld [vmem:[%s6568_s28 + $0x80] sm:$0xff]   ;;  %v6269_v40 = vld [vmem:[%s6568_s28 + $0x88] sm:$0xff]  }
  0x29   : > { %6032 = vmatmul.mubr.msk.bf16.gmra.mrb[4].mxu1 %vm1122_vm2, %v6242_v13  ;;  %5907 = vmatprep.mubr.msk.bf16.mxu0 %vm1122_vm2, %v6243_v14  ;;  %v6266_v37 = vld [vmem:[%s6568_s28 + $0x278] sm:$0xff]   ;;  %v6268_v39 = vld [vmem:[%s6568_s28 + $0x280] sm:$0xff]   ;;  %v6270_v41 = vld [vmem:[%s6568_s28 + $0x288] sm:$0xff]  }
  0x2a   : > { %6035 = vmatprep.mubr.msk.bf16.mxu1 %vm1122_vm2, %v6244_v15  ;;  %v6271_v42 = vld [vmem:[%s6568_s28 + $0x90] sm:$0xff]   ;;  %v6273_v44 = vld [vmem:[%s6568_s28 + $0x98] sm:$0xff]   ;;  %v6275_v46 = vld [vmem:[%s6568_s28 + $0xa0] sm:$0xff]  }
  0x2b   : > { %v6272_v43 = vld [vmem:[%s6568_s28 + $0x290] sm:$0xff]   ;;  %v6274_v45 = vld [vmem:[%s6568_s28 + $0x298] sm:$0xff]   ;;  %v6276_v47 = vld [vmem:[%s6568_s28 + $0x2a0] sm:$0xff]  }
  0x2c   : > { %v6277_v48 = vld [vmem:[%s6568_s28 + $0xa8] sm:$0xff]   ;;  %v6279_v50 = vld [vmem:[%s6568_s28 + $0xb0] sm:$0xff]   ;;  %v6281_v52 = vld [vmem:[%s6568_s28 + $0xb8] sm:$0xff]  }
  0x2d   : > { %v6278_v49 = vld [vmem:[%s6568_s28 + $0x2a8] sm:$0xff]   ;;  %v6280_v51 = vld [vmem:[%s6568_s28 + $0x2b0] sm:$0xff]   ;;  %v6282_v53 = vld [vmem:[%s6568_s28 + $0x2b8] sm:$0xff]  }
  0x2e   : > { %v6283_v54 = vld [vmem:[%s6568_s28 + $0xc0] sm:$0xff]   ;;  %v6285_v56 = vld [vmem:[%s6568_s28 + $0xc8] sm:$0xff]   ;;  %v6287_v58 = vld [vmem:[%s6568_s28 + $0xd0] sm:$0xff]  }
  0x2f   : > { %v6284_v55 = vld [vmem:[%s6568_s28 + $0x2c0] sm:$0xff]   ;;  %v6286_v57 = vld [vmem:[%s6568_s28 + $0x2c8] sm:$0xff]   ;;  %v6288_v59 = vld [vmem:[%s6568_s28 + $0x2d0] sm:$0xff]  }
  0x30   : > { %5908 = vmatmul.mubr.msk.bf16.gmra.mrb[8].mxu0 %vm1122_vm2, %v6245_v16  ;;  %v6289_v60 = vld [vmem:[%s6568_s28 + $0xd8] sm:$0xff]   ;;  %v6291_v62 = vld [vmem:[%s6568_s28 + $0xe0] sm:$0xff]   ;;  %v6293_v0 = vld [vmem:[%s6568_s28 + $0xe8] sm:$0xff]  }
  0x31   : > { %6036 = vmatmul.mubr.msk.bf16.gmra.mrb[8].mxu1 %vm1122_vm2, %v6246_v17  ;;  %5911 = vmatprep.mubr.msk.bf16.mxu0 %vm1122_vm2, %v6247_v18  ;;  %v6290_v61 = vld [vmem:[%s6568_s28 + $0x2d8] sm:$0xff]   ;;  %v6292_v63 = vld [vmem:[%s6568_s28 + $0x2e0] sm:$0xff]   ;;  %v6294_v1 = vld [vmem:[%s6568_s28 + $0x2e8] sm:$0xff]  }
  0x32   : > { %6039 = vmatprep.mubr.msk.bf16.mxu1 %vm1122_vm2, %v6248_v19  ;;  %v6295_v2 = vld [vmem:[%s6568_s28 + $0xf0] sm:$0xff]   ;;  %v6297_v4 = vld [vmem:[%s6568_s28 + $0xf8] sm:$0xff]   ;;  %v6299_v6 = vld [vmem:[%s6568_s28 + $0x100] sm:$0xff]  }
  0x33   : > { %v6296_v3 = vld [vmem:[%s6568_s28 + $0x2f0] sm:$0xff]   ;;  %v6298_v5 = vld [vmem:[%s6568_s28 + $0x2f8] sm:$0xff]   ;;  %v6300_v7 = vld [vmem:[%s6568_s28 + $0x300] sm:$0xff]  }
  0x34   : > { %v6301_v8 = vld [vmem:[%s6568_s28 + $0x108] sm:$0xff]   ;;  %v6303_v10 = vld [vmem:[%s6568_s28 + $0x110] sm:$0xff]   ;;  %v6305_v12 = vld [vmem:[%s6568_s28 + $0x118] sm:$0xff]  }
  0x35   : > { %v6302_v9 = vld [vmem:[%s6568_s28 + $0x308] sm:$0xff]   ;;  %v6304_v11 = vld [vmem:[%s6568_s28 + $0x310] sm:$0xff]   ;;  %v6306_v13 = vld [vmem:[%s6568_s28 + $0x318] sm:$0xff]  }
  0x36   : > { %v6307_v14 = vld [vmem:[%s6568_s28 + $0x120] sm:$0xff]   ;;  %v6309_v16 = vld [vmem:[%s6568_s28 + $0x128] sm:$0xff]   ;;  %v6311_v18 = vld [vmem:[%s6568_s28 + $0x130] sm:$0xff]  }
  0x37   : > { %v6308_v15 = vld [vmem:[%s6568_s28 + $0x320] sm:$0xff]   ;;  %v6310_v17 = vld [vmem:[%s6568_s28 + $0x328] sm:$0xff]   ;;  %v6312_v19 = vld [vmem:[%s6568_s28 + $0x330] sm:$0xff]  }
  0x38   : > { %5912 = vmatmul.mubr.msk.bf16.gmra.mrb[12].mxu0 %vm1122_vm2, %v6249_v20  ;;  %v6313_v20 = vld [vmem:[%s6568_s28 + $0x138] sm:$0xff]  }
  0x39   : > { %6040 = vmatmul.mubr.msk.bf16.gmra.mrb[12].mxu1 %vm1122_vm2, %v6250_v21  ;;  %5915 = vmatprep.mubr.msk.bf16.mxu0 %vm1122_vm2, %v6251_v22  ;;  %v6314_v21 = vld [vmem:[%s6568_s28 + $0x338] sm:$0xff]   ;;  %v6315_v22 = vld [vmem:[%s6568_s28 + $0x140] sm:$0xff]  }
  0x3a   : > { %6043 = vmatprep.mubr.msk.bf16.mxu1 %vm1122_vm2, %v6252_v23  ;;  %v6316_v23 = vld [vmem:[%s6568_s28 + $0x340] sm:$0xff]  }
  0x40   : > { %5916 = vmatmul.mubr.msk.bf16.gmra.mrb[16].mxu0 %vm1122_vm2, %v6253_v24  ;;  %v6317_v24 = vld [vmem:[%s6568_s28 + $0x148] sm:$0xff]  }
  0x41   : > { %6044 = vmatmul.mubr.msk.bf16.gmra.mrb[16].mxu1 %vm1122_vm2, %v6254_v25  ;;  %5919 = vmatprep.mubr.msk.bf16.mxu0 %vm1122_vm2, %v6255_v26  ;;  %v6318_v25 = vld [vmem:[%s6568_s28 + $0x348] sm:$0xff]   ;;  %v6319_v26 = vld [vmem:[%s6568_s28 + $0x150] sm:$0xff]  }
  0x42   : > { %6047 = vmatprep.mubr.msk.bf16.mxu1 %vm1122_vm2, %v6256_v27  ;;  %v6320_v27 = vld [vmem:[%s6568_s28 + $0x350] sm:$0xff]  }
  0x48   : > { %5920 = vmatmul.mubr.msk.bf16.gmra.mrb[20].mxu0 %vm1122_vm2, %v6257_v28  ;;  %v6321_v28 = vld [vmem:[%s6568_s28 + $0x158] sm:$0xff]  }
  0x49   : > { %6048 = vmatmul.mubr.msk.bf16.gmra.mrb[20].mxu1 %vm1122_vm2, %v6258_v29  ;;  %5923 = vmatprep.mubr.msk.bf16.mxu0 %vm1122_vm2, %v6259_v30  ;;  %v6322_v29 = vld [vmem:[%s6568_s28 + $0x358] sm:$0xff]   ;;  %v6323_v30 = vld [vmem:[%s6568_s28 + $0x160] sm:$0xff]  }
  0x4a   : > { %6051 = vmatprep.mubr.msk.bf16.mxu1 %vm1122_vm2, %v6260_v31  ;;  %v6324_v31 = vld [vmem:[%s6568_s28 + $0x360] sm:$0xff]  }
  0x50   : > { %5924 = vmatmul.mubr.msk.bf16.gmra.mrb[24].mxu0 %vm1122_vm2, %v6261_v32  ;;  %v6325_v32 = vld [vmem:[%s6568_s28 + $0x168] sm:$0xff]  }
  0x51   : > { %6052 = vmatmul.mubr.msk.bf16.gmra.mrb[24].mxu1 %vm1122_vm2, %v6262_v33  ;;  %5927 = vmatprep.mubr.msk.bf16.mxu0 %vm1122_vm2, %v6263_v34  ;;  %v6326_v33 = vld [vmem:[%s6568_s28 + $0x368] sm:$0xff]   ;;  %v6327_v34 = vld [vmem:[%s6568_s28 + $0x170] sm:$0xff]  }
  0x52   : > { %6055 = vmatprep.mubr.msk.bf16.mxu1 %vm1122_vm2, %v6264_v35  ;;  %v6328_v35 = vld [vmem:[%s6568_s28 + $0x370] sm:$0xff]  }
  0x58   : > { %5928 = vmatmul.mubr.msk.bf16.gmra.mrb[28].mxu0 %vm1122_vm2, %v6265_v36  ;;  %v6329_v36 = vld [vmem:[%s6568_s28 + $0x178] sm:$0xff]  }
  0x59   : > { %6056 = vmatmul.mubr.msk.bf16.gmra.mrb[28].mxu1 %vm1122_vm2, %v6266_v37  ;;  %5931 = vmatprep.mubr.msk.bf16.mxu0 %vm1122_vm2, %v6267_v38  ;;  %v6330_v37 = vld [vmem:[%s6568_s28 + $0x378] sm:$0xff]   ;;  %v6331_v38 = vld [vmem:[%s6568_s28 + $0x180] sm:$0xff]  }
  0x5a   : > { %6059 = vmatprep.mubr.msk.bf16.mxu1 %vm1122_vm2, %v6268_v39  ;;  %v6332_v39 = vld [vmem:[%s6568_s28 + $0x380] sm:$0xff]  }
  0x60   : > { %5932 = vmatmul.mubr.msk.bf16.gmra.mrb[32].mxu0 %vm1122_vm2, %v6269_v40  ;;  %v6333_v40 = vld [vmem:[%s6568_s28 + $0x188] sm:$0xff]  }
  0x61   : > { %6060 = vmatmul.mubr.msk.bf16.gmra.mrb[32].mxu1 %vm1122_vm2, %v6270_v41  ;;  %5935 = vmatprep.mubr.msk.bf16.mxu0 %vm1122_vm2, %v6271_v42  ;;  %v6334_v41 = vld [vmem:[%s6568_s28 + $0x388] sm:$0xff]   ;;  %v6335_v42 = vld [vmem:[%s6568_s28 + $0x190] sm:$0xff]  }
  0x62   : > { %6063 = vmatprep.mubr.msk.bf16.mxu1 %vm1122_vm2, %v6272_v43  ;;  %v6336_v43 = vld [vmem:[%s6568_s28 + $0x390] sm:$0xff]  }
  0x68   : > { %5936 = vmatmul.mubr.msk.bf16.gmra.mrb[36].mxu0 %vm1122_vm2, %v6273_v44  ;;  %v6337_v44 = vld [vmem:[%s6568_s28 + $0x198] sm:$0xff]  }
  0x69   : > { %6064 = vmatmul.mubr.msk.bf16.gmra.mrb[36].mxu1 %vm1122_vm2, %v6274_v45  ;;  %5939 = vmatprep.mubr.msk.bf16.mxu0 %vm1122_vm2, %v6275_v46  ;;  %v6338_v45 = vld [vmem:[%s6568_s28 + $0x398] sm:$0xff]   ;;  %v6339_v46 = vld [vmem:[%s6568_s28 + $0x1a0] sm:$0xff]  }
  0x6a   : > { %6067 = vmatprep.mubr.msk.bf16.mxu1 %vm1122_vm2, %v6276_v47  ;;  %v6340_v47 = vld [vmem:[%s6568_s28 + $0x3a0] sm:$0xff]  }
  0x70   : > { %5940 = vmatmul.mubr.msk.bf16.gmra.mrb[40].mxu0 %vm1122_vm2, %v6277_v48  ;;  %v6341_v48 = vld [vmem:[%s6568_s28 + $0x1a8] sm:$0xff]  }
  0x71   : > { %6068 = vmatmul.mubr.msk.bf16.gmra.mrb[40].mxu1 %vm1122_vm2, %v6278_v49  ;;  %5943 = vmatprep.mubr.msk.bf16.mxu0 %vm1122_vm2, %v6279_v50  ;;  %v6342_v49 = vld [vmem:[%s6568_s28 + $0x3a8] sm:$0xff]   ;;  %v6343_v50 = vld [vmem:[%s6568_s28 + $0x1b0] sm:$0xff]  }
  0x72   : > { %6071 = vmatprep.mubr.msk.bf16.mxu1 %vm1122_vm2, %v6280_v51  ;;  %v6344_v51 = vld [vmem:[%s6568_s28 + $0x3b0] sm:$0xff]  }
  0x78   : > { %5944 = vmatmul.mubr.msk.bf16.gmra.mrb[44].mxu0 %vm1122_vm2, %v6281_v52  ;;  %v6791_v52 = vld [vmem:[%s7286_s2] ss:$0 sm:$0xff] }
  0x79   : > { %6072 = vmatmul.mubr.msk.bf16.gmra.mrb[44].mxu1 %vm1122_vm2, %v6282_v53  ;;  %5947 = vmatprep.mubr.msk.bf16.mxu0 %vm1122_vm2, %v6283_v54 }
  0x7a   : > { %6075 = vmatprep.mubr.msk.bf16.mxu1 %vm1122_vm2, %v6284_v55 }
  0x80   : > { %5948 = vmatmul.mubr.msk.bf16.gmra.mrb[48].mxu0 %vm1122_vm2, %v6285_v56 }
  0x81   : > { %6076 = vmatmul.mubr.msk.bf16.gmra.mrb[48].mxu1 %vm1122_vm2, %v6286_v57  ;;  %5951 = vmatprep.mubr.msk.bf16.mxu0 %vm1122_vm2, %v6287_v58  ;;  %v6345_v57 = vld [vmem:[%s6568_s28 + $0x1b8] sm:$0xff]  }
  0x82   : > { %6079 = vmatprep.mubr.msk.bf16.mxu1 %vm1122_vm2, %v6288_v59 }
  0x88   : > { %5952 = vmatmul.mubr.msk.bf16.gmra.mrb[52].mxu0 %vm1122_vm2, %v6289_v60 }
  0x89   : > { %6080 = vmatmul.mubr.msk.bf16.gmra.mrb[52].mxu1 %vm1122_vm2, %v6290_v61  ;;  %5955 = vmatprep.mubr.msk.bf16.mxu0 %vm1122_vm2, %v6291_v62  ;;  %v6346_v62 = vld [vmem:[%s6568_s28 + $0x3b8] sm:$0xff]  }
  0x8a   : > { %6083 = vmatprep.mubr.msk.bf16.mxu1 %vm1122_vm2, %v6292_v63  ;;  %v6347_v63 = vld [vmem:[%s6568_s28 + $0x1c0] sm:$0xff]  }
  0x90   : > { %5956 = vmatmul.mubr.msk.bf16.gmra.mrb[56].mxu0 %vm1122_vm2, %v6293_v0 }
  0x91   : > { %6084 = vmatmul.mubr.msk.bf16.gmra.mrb[56].mxu1 %vm1122_vm2, %v6294_v1  ;;  %5959 = vmatprep.mubr.msk.bf16.mxu0 %vm1122_vm2, %v6295_v2 }
  0x92   : > { %6087 = vmatprep.mubr.msk.bf16.mxu1 %vm1122_vm2, %v6296_v3 }
  0x98   : > { %5960 = vmatmul.mubr.msk.bf16.gmra.mrb[60].mxu0 %vm1122_vm2, %v6297_v4  ;;  %v6348_v4 = vld [vmem:[%s6568_s28 + $0x3c0] sm:$0xff]  }
  0x99   : > { %6088 = vmatmul.mubr.msk.bf16.gmra.mrb[60].mxu1 %vm1122_vm2, %v6298_v5  ;;  %5963 = vmatprep.mubr.msk.bf16.mxu0 %vm1122_vm2, %v6299_v6 }
  0x9a   : > { %6091 = vmatprep.mubr.msk.bf16.mxu1 %vm1122_vm2, %v6300_v7 }
  0xa0   : > { %5964 = vmatmul.mubr.msk.bf16.gmra.mrb[64].mxu0 %vm1122_vm2, %v6301_v8 }
  0xa1   : > { %6092 = vmatmul.mubr.msk.bf16.gmra.mrb[64].mxu1 %vm1122_vm2, %v6302_v9  ;;  %5967 = vmatprep.mubr.msk.bf16.mxu0 %vm1122_vm2, %v6303_v10 }
  0xa2   : > { %6095 = vmatprep.mubr.msk.bf16.mxu1 %vm1122_vm2, %v6304_v11 }
  0xa8   : > { %5968 = vmatmul.mubr.msk.bf16.gmra.mrb[68].mxu0 %vm1122_vm2, %v6305_v12 }
  0xa9   : > { %6096 = vmatmul.mubr.msk.bf16.gmra.mrb[68].mxu1 %vm1122_vm2, %v6306_v13  ;;  %5971 = vmatprep.mubr.msk.bf16.mxu0 %vm1122_vm2, %v6307_v14 }
  0xaa   : > { %6099 = vmatprep.mubr.msk.bf16.mxu1 %vm1122_vm2, %v6308_v15 }
  0xb0   : > { %5972 = vmatmul.mubr.msk.bf16.gmra.mrb[72].mxu0 %vm1122_vm2, %v6309_v16 }
  0xb1   : > { %6100 = vmatmul.mubr.msk.bf16.gmra.mrb[72].mxu1 %vm1122_vm2, %v6310_v17  ;;  %5975 = vmatprep.mubr.msk.bf16.mxu0 %vm1122_vm2, %v6311_v18 }
  0xb2   : > { %6103 = vmatprep.mubr.msk.bf16.mxu1 %vm1122_vm2, %v6312_v19 }
  0xb8   : > { %5976 = vmatmul.mubr.msk.bf16.gmra.mrb[76].mxu0 %vm1122_vm2, %v6313_v20 }
  0xb9   : > { %6104 = vmatmul.mubr.msk.bf16.gmra.mrb[76].mxu1 %vm1122_vm2, %v6314_v21  ;;  %5979 = vmatprep.mubr.msk.bf16.mxu0 %vm1122_vm2, %v6315_v22 }
  0xba   : > { %6107 = vmatprep.mubr.msk.bf16.mxu1 %vm1122_vm2, %v6316_v23 }
  0xc0   : > { %5980 = vmatmul.mubr.msk.bf16.gmra.mrb[80].mxu0 %vm1122_vm2, %v6317_v24 }
  0xc1   : > { %6108 = vmatmul.mubr.msk.bf16.gmra.mrb[80].mxu1 %vm1122_vm2, %v6318_v25  ;;  %5983 = vmatprep.mubr.msk.bf16.mxu0 %vm1122_vm2, %v6319_v26  ;;  %v6349_v25 = vld [vmem:[%s6568_s28 + $0x1c8] sm:$0xff]  }
  0xc2   : > { %6111 = vmatprep.mubr.msk.bf16.mxu1 %vm1122_vm2, %v6320_v27 }
  0xc8   : > { %5984 = vmatmul.mubr.msk.bf16.gmra.mrb[84].mxu0 %vm1122_vm2, %v6321_v28 }
  0xc9   : > { %6112 = vmatmul.mubr.msk.bf16.gmra.mrb[84].mxu1 %vm1122_vm2, %v6322_v29  ;;  %5987 = vmatprep.mubr.msk.bf16.mxu0 %vm1122_vm2, %v6323_v30  ;;  %v6350_v30 = vld [vmem:[%s6568_s28 + $0x3c8] sm:$0xff]  }
  0xca   : > { %6115 = vmatprep.mubr.msk.bf16.mxu1 %vm1122_vm2, %v6324_v31  ;;  %v6351_v31 = vld [vmem:[%s6568_s28 + $0x1d0] sm:$0xff]  }
  0xd0   : > { %5988 = vmatmul.mubr.msk.bf16.gmra.mrb[88].mxu0 %vm1122_vm2, %v6325_v32 }
  0xd1   : > { %6116 = vmatmul.mubr.msk.bf16.gmra.mrb[88].mxu1 %vm1122_vm2, %v6326_v33  ;;  %5991 = vmatprep.mubr.msk.bf16.mxu0 %vm1122_vm2, %v6327_v34 }
  0xd2   : > { %6119 = vmatprep.mubr.msk.bf16.mxu1 %vm1122_vm2, %v6328_v35 }
  0xd8   : > { %5992 = vmatmul.mubr.msk.bf16.gmra.mrb[92].mxu0 %vm1122_vm2, %v6329_v36  ;;  %v6352_v36 = vld [vmem:[%s6568_s28 + $0x3d0] sm:$0xff]  }
  0xd9   : > { %6120 = vmatmul.mubr.msk.bf16.gmra.mrb[92].mxu1 %vm1122_vm2, %v6330_v37  ;;  %5995 = vmatprep.mubr.msk.bf16.mxu0 %vm1122_vm2, %v6331_v38 }
  0xda   : > { %6123 = vmatprep.mubr.msk.bf16.mxu1 %vm1122_vm2, %v6332_v39 }
  0xe0   : > { %5996 = vmatmul.mubr.msk.bf16.gmra.mrb[96].mxu0 %vm1122_vm2, %v6333_v40 }
  0xe1   : > { %6124 = vmatmul.mubr.msk.bf16.gmra.mrb[96].mxu1 %vm1122_vm2, %v6334_v41  ;;  %5999 = vmatprep.mubr.msk.bf16.mxu0 %vm1122_vm2, %v6335_v42 }
  0xe2   : > { %6127 = vmatprep.mubr.msk.bf16.mxu1 %vm1122_vm2, %v6336_v43 }
  0xe8   : > { %6000 = vmatmul.mubr.msk.bf16.gmra.mrb[100].mxu0 %vm1122_vm2, %v6337_v44 }
  0xe9   : > { %6128 = vmatmul.mubr.msk.bf16.gmra.mrb[100].mxu1 %vm1122_vm2, %v6338_v45  ;;  %6003 = vmatprep.mubr.msk.bf16.mxu0 %vm1122_vm2, %v6339_v46 }
  0xea   : > { %6131 = vmatprep.mubr.msk.bf16.mxu1 %vm1122_vm2, %v6340_v47 }
  0xf0   : > { %6004 = vmatmul.mubr.msk.bf16.gmra.mrb[104].mxu0 %vm1122_vm2, %v6341_v48 }
  0xf1   : > { %6132 = vmatmul.mubr.msk.bf16.gmra.mrb[104].mxu1 %vm1122_vm2, %v6342_v49  ;;  %6007 = vmatprep.mubr.msk.bf16.mxu0 %vm1122_vm2, %v6343_v50 }
  0xf2   : > { %6135 = vmatprep.mubr.msk.bf16.mxu1 %vm1122_vm2, %v6344_v51 }
  0xf3   : > { %v5901_v53 = vpop.f32.mrb[0].mxu0 }
  0xf4   : > { %v1557_v54 = vadd.f32 %v5901_v53, %v6791_v52  ;;  %v6029_v55 = vpop.f32.mrb[0].mxu1  ;;  %v1548_v56 = vpop.f32.mrb[1].mxu0 }
  0xf5   : > { %v2069_v58 = vadd.f32 %v6029_v55, %v6791_v52  ;;  %v1549_v59 = vadd.f32 %v6791_v52, %v1548_v56  ;;  %v2060_v60 = vpop.f32.mrb[1].mxu1  ;;  %v5902_v61 = vpop.f32.mrb[2].mxu0 }
  0xf6   : > { %v2061_v0 = vadd.f32 %v6791_v52, %v2060_v60  ;;  %v1560_v1 = vadd.f32 %v5902_v61, %v6791_v52  ;;  %v6030_v2 = vpop.f32.mrb[2].mxu1  ;;  %v1551_v3 = vpop.f32.mrb[3].mxu0  ;;  %v2573_v8 = vmax.f32 %v1557_v54, 0.0 }
  0xf7   : > { %v2072_v5 = vadd.f32 %v6030_v2, %v6791_v52  ;;  %v1552_v6 = vadd.f32 %v6791_v52, %v1551_v3  ;;  %v2063_v7 = vpop.f32.mrb[3].mxu1  ;;  %v2701_v11 = vmax.f32 %v2069_v58, 0.0  ;;  %v2571_v12 = vmax.f32 %v1549_v59, 0.0  ;;  %v6353_v58 = vld [vmem:[%s6568_s28 + $0x1d8] sm:$0xff]  }
  0xf8   : > { %v2574_v9 = vmax.f32 %v1560_v1, 0.0  ;;  %v2064_v10 = vadd.f32 %v6791_v52, %v2063_v7  ;;  %6008 = vmatmul.mubr.msk.bf16.gmra.mrb[108].mxu0 %vm1122_vm2, %v6345_v57  ;;  %v2699_v15 = vmax.f32 %v2061_v0, 0.0  ;;  %v6355_v0 = vld [vmem:[%s6568_s28 + $0x1e0] sm:$0xff]  }
  0xf9   : > { %v2702_v13 = vmax.f32 %v2072_v5, 0.0  ;;  %v2572_v14 = vmax.f32 %v1552_v6, 0.0  ;;  %6136 = vmatmul.mubr.msk.bf16.gmra.mrb[108].mxu1 %vm1122_vm2, %v6346_v62  ;;  %6011 = vmatprep.mubr.msk.bf16.mxu0 %vm1122_vm2, %v6347_v63  ;;  %v6354_v63 = vld [vmem:[%s6568_s28 + $0x3d8] sm:$0xff]   ;;  %v6356_v5 = vld [vmem:[%s6568_s28 + $0x3e0] sm:$0xff]  }
  0xfa   : > { %v5006_v16 = vpack.c.bf16 %v2574_v9, %v2573_v8  ;;  %v2700_v17 = vmax.f32 %v2064_v10, 0.0  ;;  %6139 = vmatprep.mubr.msk.bf16.mxu1 %vm1122_vm2, %v6348_v4 }
  0xfb   : > { %v5326_v18 = vpack.c.bf16 %v2702_v13, %v2701_v11  ;;  %v5001_v19 = vpack.c.bf16 %v2572_v14, %v2571_v12  ;;  %v5905_v20 = vpop.f32.mrb[4].mxu0 }
  0xfc   : > { %5638 = vst [vmem:[%s6814_s7 + $0x8] sm:$0xff] %v5006_v16   ;;  %v5321_v21 = vpack.c.bf16 %v2700_v17, %v2699_v15  ;;  %v1573_v22 = vadd.f32 %v5905_v20, %v6791_v52  ;;  %v6033_v23 = vpop.f32.mrb[4].mxu1  ;;  %v1564_v24 = vpop.f32.mrb[5].mxu0 }
  0xfd   : > { %5702 = vst [vmem:[%s6814_s7 + $0x208] sm:$0xff] %v5326_v18   ;;  %5002 = vst [vmem:[%s6814_s7] sm:$0xff] %v5001_v19   ;;  %v2085_v26 = vadd.f32 %v6033_v23, %v6791_v52  ;;  %v1565_v27 = vadd.f32 %v6791_v52, %v1564_v24  ;;  %v2076_v28 = vpop.f32.mrb[5].mxu1  ;;  %v5906_v29 = vpop.f32.mrb[6].mxu0 }
  0xfe   : > { %5701 = vst [vmem:[%s6814_s7 + $0x200] sm:$0xff] %v5321_v21   ;;  %v2077_v32 = vadd.f32 %v6791_v52, %v2076_v28  ;;  %v1576_v33 = vadd.f32 %v5906_v29, %v6791_v52  ;;  %v6034_v34 = vpop.f32.mrb[6].mxu1  ;;  %v1567_v35 = vpop.f32.mrb[7].mxu0  ;;  %v2577_v40 = vmax.f32 %v1573_v22, 0.0 }
  0xff   : > { %v2088_v37 = vadd.f32 %v6034_v34, %v6791_v52  ;;  %v1568_v38 = vadd.f32 %v6791_v52, %v1567_v35  ;;  %v2079_v39 = vpop.f32.mrb[7].mxu1  ;;  %v2705_v43 = vmax.f32 %v2085_v26, 0.0  ;;  %v2575_v44 = vmax.f32 %v1565_v27, 0.0  ;;  %v6357_v26 = vld [vmem:[%s6568_s28 + $0x1e8] sm:$0xff]  }
 0x100   : > { %v2578_v41 = vmax.f32 %v1576_v33, 0.0  ;;  %v2080_v42 = vadd.f32 %v6791_v52, %v2079_v39  ;;  %6012 = vmatmul.mubr.msk.bf16.gmra.mrb[112].mxu0 %vm1122_vm2, %v6349_v25  ;;  %v2703_v47 = vmax.f32 %v2077_v32, 0.0  ;;  %v6359_v32 = vld [vmem:[%s6568_s28 + $0x1f0] sm:$0xff]  }
 0x101   : > { %v2706_v45 = vmax.f32 %v2088_v37, 0.0  ;;  %v2576_v46 = vmax.f32 %v1568_v38, 0.0  ;;  %6140 = vmatmul.mubr.msk.bf16.gmra.mrb[112].mxu1 %vm1122_vm2, %v6350_v30  ;;  %6015 = vmatprep.mubr.msk.bf16.mxu0 %vm1122_vm2, %v6351_v31  ;;  %v6358_v31 = vld [vmem:[%s6568_s28 + $0x3e8] sm:$0xff]   ;;  %v6360_v37 = vld [vmem:[%s6568_s28 + $0x3f0] sm:$0xff]  }
 0x102   : > { %v5016_v48 = vpack.c.bf16 %v2578_v41, %v2577_v40  ;;  %v2704_v49 = vmax.f32 %v2080_v42, 0.0  ;;  %6143 = vmatprep.mubr.msk.bf16.mxu1 %vm1122_vm2, %v6352_v36 }
 0x103   : > { %v5336_v50 = vpack.c.bf16 %v2706_v45, %v2705_v43  ;;  %v5011_v51 = vpack.c.bf16 %v2576_v46, %v2575_v44  ;;  %v5909_v53 = vpop.f32.mrb[8].mxu0 }
 0x104   : > { %5640 = vst [vmem:[%s6814_s7 + $0x18] sm:$0xff] %v5016_v48   ;;  %v5331_v54 = vpack.c.bf16 %v2704_v49, %v2703_v47  ;;  %v1589_v55 = vadd.f32 %v5909_v53, %v6791_v52  ;;  %v6037_v56 = vpop.f32.mrb[8].mxu1  ;;  %v1580_v57 = vpop.f32.mrb[9].mxu0 }
 0x105   : > { %5704 = vst [vmem:[%s6814_s7 + $0x218] sm:$0xff] %v5336_v50   ;;  %5639 = vst [vmem:[%s6814_s7 + $0x10] sm:$0xff] %v5011_v51   ;;  %v2101_v59 = vadd.f32 %v6037_v56, %v6791_v52  ;;  %v1581_v60 = vadd.f32 %v6791_v52, %v1580_v57  ;;  %v2092_v61 = vpop.f32.mrb[9].mxu1  ;;  %v5910_v62 = vpop.f32.mrb[10].mxu0 }
 0x106   : > { %5703 = vst [vmem:[%s6814_s7 + $0x210] sm:$0xff] %v5331_v54   ;;  %v2093_v1 = vadd.f32 %v6791_v52, %v2092_v61  ;;  %v1592_v2 = vadd.f32 %v5910_v62, %v6791_v52  ;;  %v6038_v3 = vpop.f32.mrb[10].mxu1  ;;  %v1583_v4 = vpop.f32.mrb[11].mxu0  ;;  %v2581_v9 = vmax.f32 %v1589_v55, 0.0 }
 0x107   : > { %v2104_v6 = vadd.f32 %v6038_v3, %v6791_v52  ;;  %v1584_v7 = vadd.f32 %v6791_v52, %v1583_v4  ;;  %v2095_v8 = vpop.f32.mrb[11].mxu1  ;;  %v2709_v12 = vmax.f32 %v2101_v59, 0.0  ;;  %v2579_v13 = vmax.f32 %v1581_v60, 0.0  ;;  %v6361_v59 = vld [vmem:[%s6568_s28 + $0x1f8] sm:$0xff]  }
 0x108   : > { %v2582_v10 = vmax.f32 %v1592_v2, 0.0  ;;  %v2096_v11 = vadd.f32 %v6791_v52, %v2095_v8  ;;  %6016 = vmatmul.mubr.msk.bf16.gmra.mrb[116].mxu0 %vm1122_vm2, %v6353_v58  ;;  %v2707_v16 = vmax.f32 %v2093_v1, 0.0 }
 0x109   : > { %v2710_v14 = vmax.f32 %v2104_v6, 0.0  ;;  %v2580_v15 = vmax.f32 %v1584_v7, 0.0  ;;  %6144 = vmatmul.mubr.msk.bf16.gmra.mrb[116].mxu1 %vm1122_vm2, %v6354_v63  ;;  %6019 = vmatprep.mubr.msk.bf16.mxu0 %vm1122_vm2, %v6355_v0  ;;  %v6362_v0 = vld [vmem:[%s6568_s28 + $0x3f8] sm:$0xff]  }
 0x10a   : > { %v5026_v17 = vpack.c.bf16 %v2582_v10, %v2581_v9  ;;  %v2708_v18 = vmax.f32 %v2096_v11, 0.0  ;;  %6147 = vmatprep.mubr.msk.bf16.mxu1 %vm1122_vm2, %v6356_v5 }
 0x10b   : > { %v5346_v19 = vpack.c.bf16 %v2710_v14, %v2709_v12  ;;  %v5021_v20 = vpack.c.bf16 %v2580_v15, %v2579_v13  ;;  %v5913_v21 = vpop.f32.mrb[12].mxu0 }
 0x10c   : > { %5642 = vst [vmem:[%s6814_s7 + $0x28] sm:$0xff] %v5026_v17   ;;  %v5341_v22 = vpack.c.bf16 %v2708_v18, %v2707_v16  ;;  %v1605_v23 = vadd.f32 %v5913_v21, %v6791_v52  ;;  %v6041_v24 = vpop.f32.mrb[12].mxu1  ;;  %v1596_v25 = vpop.f32.mrb[13].mxu0 }
 0x10d   : > { %5706 = vst [vmem:[%s6814_s7 + $0x228] sm:$0xff] %v5346_v19   ;;  %5641 = vst [vmem:[%s6814_s7 + $0x20] sm:$0xff] %v5021_v20   ;;  %v2117_v27 = vadd.f32 %v6041_v24, %v6791_v52  ;;  %v1597_v28 = vadd.f32 %v6791_v52, %v1596_v25  ;;  %v2108_v29 = vpop.f32.mrb[13].mxu1  ;;  %v5914_v30 = vpop.f32.mrb[14].mxu0 }
 0x10e   : > { %5705 = vst [vmem:[%s6814_s7 + $0x220] sm:$0xff] %v5341_v22   ;;  %v2109_v33 = vadd.f32 %v6791_v52, %v2108_v29  ;;  %v1608_v34 = vadd.f32 %v5914_v30, %v6791_v52  ;;  %v6042_v35 = vpop.f32.mrb[14].mxu1  ;;  %v1599_v36 = vpop.f32.mrb[15].mxu0  ;;  %v2585_v41 = vmax.f32 %v1605_v23, 0.0 }
 0x10f   : > { %v2120_v38 = vadd.f32 %v6042_v35, %v6791_v52  ;;  %v1600_v39 = vadd.f32 %v6791_v52, %v1599_v36  ;;  %v2111_v40 = vpop.f32.mrb[15].mxu1  ;;  %v2713_v44 = vmax.f32 %v2117_v27, 0.0  ;;  %v2583_v45 = vmax.f32 %v1597_v28, 0.0 }
 0x110   : > { %v2586_v42 = vmax.f32 %v1608_v34, 0.0  ;;  %v2112_v43 = vadd.f32 %v6791_v52, %v2111_v40  ;;  %6020 = vmatmul.mubr.msk.bf16.gmra.mrb[120].mxu0 %vm1122_vm2, %v6357_v26  ;;  %v2711_v48 = vmax.f32 %v2109_v33, 0.0 }
 0x111   : > { %v2714_v46 = vmax.f32 %v2120_v38, 0.0  ;;  %v2584_v47 = vmax.f32 %v1600_v39, 0.0  ;;  %6148 = vmatmul.mubr.msk.bf16.gmra.mrb[120].mxu1 %vm1122_vm2, %v6358_v31  ;;  %6023 = vmatprep.mubr.msk.bf16.mxu0 %vm1122_vm2, %v6359_v32 }
 0x112   : > { %v5036_v49 = vpack.c.bf16 %v2586_v42, %v2585_v41  ;;  %v2712_v50 = vmax.f32 %v2112_v43, 0.0  ;;  %6151 = vmatprep.mubr.msk.bf16.mxu1 %vm1122_vm2, %v6360_v37 }
 0x113   : > { %v5356_v51 = vpack.c.bf16 %v2714_v46, %v2713_v44  ;;  %v5031_v53 = vpack.c.bf16 %v2584_v47, %v2583_v45  ;;  %v5917_v54 = vpop.f32.mrb[16].mxu0 }
 0x114   : > { %5644 = vst [vmem:[%s6814_s7 + $0x38] sm:$0xff] %v5036_v49   ;;  %v5351_v55 = vpack.c.bf16 %v2712_v50, %v2711_v48  ;;  %v1621_v56 = vadd.f32 %v5917_v54, %v6791_v52  ;;  %v6045_v57 = vpop.f32.mrb[16].mxu1  ;;  %v1612_v58 = vpop.f32.mrb[17].mxu0 }
 0x115   : > { %5708 = vst [vmem:[%s6814_s7 + $0x238] sm:$0xff] %v5356_v51   ;;  %5643 = vst [vmem:[%s6814_s7 + $0x30] sm:$0xff] %v5031_v53   ;;  %v2133_v60 = vadd.f32 %v6045_v57, %v6791_v52  ;;  %v1613_v61 = vadd.f32 %v6791_v52, %v1612_v58  ;;  %v2124_v62 = vpop.f32.mrb[17].mxu1  ;;  %v5918_v63 = vpop.f32.mrb[18].mxu0 }
 0x116   : > { %5707 = vst [vmem:[%s6814_s7 + $0x230] sm:$0xff] %v5351_v55   ;;  %v2125_v1 = vadd.f32 %v6791_v52, %v2124_v62  ;;  %v1624_v2 = vadd.f32 %v5918_v63, %v6791_v52  ;;  %v6046_v3 = vpop.f32.mrb[18].mxu1  ;;  %v1615_v4 = vpop.f32.mrb[19].mxu0  ;;  %v2589_v8 = vmax.f32 %v1621_v56, 0.0 }
 0x117   : > { %v2136_v5 = vadd.f32 %v6046_v3, %v6791_v52  ;;  %v1616_v6 = vadd.f32 %v6791_v52, %v1615_v4  ;;  %v2127_v7 = vpop.f32.mrb[19].mxu1  ;;  %v2717_v11 = vmax.f32 %v2133_v60, 0.0  ;;  %v2587_v12 = vmax.f32 %v1613_v61, 0.0 }
 0x118   : > { %v2590_v9 = vmax.f32 %v1624_v2, 0.0  ;;  %v2128_v10 = vadd.f32 %v6791_v52, %v2127_v7  ;;  %6024 = vmatmul.mubr.msk.bf16.gmra.mrb[124].mxu0 %vm1122_vm2, %v6361_v59  ;;  %v2715_v15 = vmax.f32 %v2125_v1, 0.0 }
 0x119   : > { %v2718_v13 = vmax.f32 %v2136_v5, 0.0  ;;  %v2588_v14 = vmax.f32 %v1616_v6, 0.0  ;;  %6152 = vmatmul.mubr.msk.bf16.gmra.mrb[124].mxu1 %vm1122_vm2, %v6362_v0 }
 0x11a   : > { %v5046_v16 = vpack.c.bf16 %v2590_v9, %v2589_v8  ;;  %v2716_v17 = vmax.f32 %v2128_v10, 0.0 }
 0x11b   : > { %v5366_v18 = vpack.c.bf16 %v2718_v13, %v2717_v11  ;;  %v5041_v19 = vpack.c.bf16 %v2588_v14, %v2587_v12  ;;  %v5921_v20 = vpop.f32.mrb[20].mxu0 }
 0x11c   : > { %5646 = vst [vmem:[%s6814_s7 + $0x48] sm:$0xff] %v5046_v16   ;;  %v5361_v21 = vpack.c.bf16 %v2716_v17, %v2715_v15  ;;  %v1637_v22 = vadd.f32 %v5921_v20, %v6791_v52  ;;  %v6049_v23 = vpop.f32.mrb[20].mxu1  ;;  %v1628_v24 = vpop.f32.mrb[21].mxu0 }
 0x11d   : > { %5710 = vst [vmem:[%s6814_s7 + $0x248] sm:$0xff] %v5366_v18   ;;  %5645 = vst [vmem:[%s6814_s7 + $0x40] sm:$0xff] %v5041_v19   ;;  %v2149_v25 = vadd.f32 %v6049_v23, %v6791_v52  ;;  %v1629_v26 = vadd.f32 %v6791_v52, %v1628_v24  ;;  %v2140_v27 = vpop.f32.mrb[21].mxu1  ;;  %v5922_v28 = vpop.f32.mrb[22].mxu0 }
 0x11e   : > { %5709 = vst [vmem:[%s6814_s7 + $0x240] sm:$0xff] %v5361_v21   ;;  %v2141_v29 = vadd.f32 %v6791_v52, %v2140_v27  ;;  %v1640_v30 = vadd.f32 %v5922_v28, %v6791_v52  ;;  %v6050_v31 = vpop.f32.mrb[22].mxu1  ;;  %v1631_v32 = vpop.f32.mrb[23].mxu0  ;;  %v2593_v36 = vmax.f32 %v1637_v22, 0.0 }
 0x11f   : > { %v2152_v33 = vadd.f32 %v6050_v31, %v6791_v52  ;;  %v1632_v34 = vadd.f32 %v6791_v52, %v1631_v32  ;;  %v2143_v35 = vpop.f32.mrb[23].mxu1  ;;  %v2721_v39 = vmax.f32 %v2149_v25, 0.0  ;;  %v2591_v40 = vmax.f32 %v1629_v26, 0.0 }
 0x120   : > { %v2594_v37 = vmax.f32 %v1640_v30, 0.0  ;;  %v2144_v38 = vadd.f32 %v6791_v52, %v2143_v35  ;;  %v2719_v43 = vmax.f32 %v2141_v29, 0.0 }
 0x121   : > { %v2722_v41 = vmax.f32 %v2152_v33, 0.0  ;;  %v2592_v42 = vmax.f32 %v1632_v34, 0.0 }
 0x122   : > { %v5056_v44 = vpack.c.bf16 %v2594_v37, %v2593_v36  ;;  %v2720_v45 = vmax.f32 %v2144_v38, 0.0 }
 0x123   : > { %v5376_v46 = vpack.c.bf16 %v2722_v41, %v2721_v39  ;;  %v5051_v47 = vpack.c.bf16 %v2592_v42, %v2591_v40  ;;  %v5925_v48 = vpop.f32.mrb[24].mxu0 }
 0x124   : > { %5648 = vst [vmem:[%s6814_s7 + $0x58] sm:$0xff] %v5056_v44   ;;  %v5371_v49 = vpack.c.bf16 %v2720_v45, %v2719_v43  ;;  %v1653_v50 = vadd.f32 %v5925_v48, %v6791_v52  ;;  %v6053_v51 = vpop.f32.mrb[24].mxu1  ;;  %v1644_v53 = vpop.f32.mrb[25].mxu0 }
 0x125   : > { %5712 = vst [vmem:[%s6814_s7 + $0x258] sm:$0xff] %v5376_v46   ;;  %5647 = vst [vmem:[%s6814_s7 + $0x50] sm:$0xff] %v5051_v47   ;;  %v2165_v54 = vadd.f32 %v6053_v51, %v6791_v52  ;;  %v1645_v55 = vadd.f32 %v6791_v52, %v1644_v53  ;;  %v2156_v56 = vpop.f32.mrb[25].mxu1  ;;  %v5926_v57 = vpop.f32.mrb[26].mxu0 }
 0x126   : > { %5711 = vst [vmem:[%s6814_s7 + $0x250] sm:$0xff] %v5371_v49   ;;  %v2157_v58 = vadd.f32 %v6791_v52, %v2156_v56  ;;  %v1656_v59 = vadd.f32 %v5926_v57, %v6791_v52  ;;  %v6054_v60 = vpop.f32.mrb[26].mxu1  ;;  %v1647_v61 = vpop.f32.mrb[27].mxu0  ;;  %v2597_v1 = vmax.f32 %v1653_v50, 0.0 }
 0x127   : > { %v2168_v62 = vadd.f32 %v6054_v60, %v6791_v52  ;;  %v1648_v63 = vadd.f32 %v6791_v52, %v1647_v61  ;;  %v2159_v0 = vpop.f32.mrb[27].mxu1  ;;  %v2725_v4 = vmax.f32 %v2165_v54, 0.0  ;;  %v2595_v5 = vmax.f32 %v1645_v55, 0.0 }
 0x128   : > { %v2598_v2 = vmax.f32 %v1656_v59, 0.0  ;;  %v2160_v3 = vadd.f32 %v6791_v52, %v2159_v0  ;;  %v2723_v8 = vmax.f32 %v2157_v58, 0.0 }
 0x129   : > { %v2726_v6 = vmax.f32 %v2168_v62, 0.0  ;;  %v2596_v7 = vmax.f32 %v1648_v63, 0.0 }
 0x12a   : > { %v5066_v9 = vpack.c.bf16 %v2598_v2, %v2597_v1  ;;  %v2724_v10 = vmax.f32 %v2160_v3, 0.0 }
 0x12b   : > { %v5386_v11 = vpack.c.bf16 %v2726_v6, %v2725_v4  ;;  %v5061_v12 = vpack.c.bf16 %v2596_v7, %v2595_v5  ;;  %v5929_v13 = vpop.f32.mrb[28].mxu0 }
 0x12c   : > { %5650 = vst [vmem:[%s6814_s7 + $0x68] sm:$0xff] %v5066_v9   ;;  %v5381_v14 = vpack.c.bf16 %v2724_v10, %v2723_v8  ;;  %v1669_v15 = vadd.f32 %v5929_v13, %v6791_v52  ;;  %v6057_v16 = vpop.f32.mrb[28].mxu1  ;;  %v1660_v17 = vpop.f32.mrb[29].mxu0 }
 0x12d   : > { %5714 = vst [vmem:[%s6814_s7 + $0x268] sm:$0xff] %v5386_v11   ;;  %5649 = vst [vmem:[%s6814_s7 + $0x60] sm:$0xff] %v5061_v12   ;;  %v2181_v18 = vadd.f32 %v6057_v16, %v6791_v52  ;;  %v1661_v19 = vadd.f32 %v6791_v52, %v1660_v17  ;;  %v2172_v20 = vpop.f32.mrb[29].mxu1  ;;  %v5930_v21 = vpop.f32.mrb[30].mxu0 }
 0x12e   : > { %5713 = vst [vmem:[%s6814_s7 + $0x260] sm:$0xff] %v5381_v14   ;;  %v2173_v22 = vadd.f32 %v6791_v52, %v2172_v20  ;;  %v1672_v23 = vadd.f32 %v5930_v21, %v6791_v52  ;;  %v6058_v24 = vpop.f32.mrb[30].mxu1  ;;  %v1663_v25 = vpop.f32.mrb[31].mxu0  ;;  %v2601_v29 = vmax.f32 %v1669_v15, 0.0 }
 0x12f   : > { %v2184_v26 = vadd.f32 %v6058_v24, %v6791_v52  ;;  %v1664_v27 = vadd.f32 %v6791_v52, %v1663_v25  ;;  %v2175_v28 = vpop.f32.mrb[31].mxu1  ;;  %v2729_v32 = vmax.f32 %v2181_v18, 0.0  ;;  %v2599_v33 = vmax.f32 %v1661_v19, 0.0 }
 0x130   : > { %v2602_v30 = vmax.f32 %v1672_v23, 0.0  ;;  %v2176_v31 = vadd.f32 %v6791_v52, %v2175_v28  ;;  %v2727_v36 = vmax.f32 %v2173_v22, 0.0 }
 0x131   : > { %v2730_v34 = vmax.f32 %v2184_v26, 0.0  ;;  %v2600_v35 = vmax.f32 %v1664_v27, 0.0 }
 0x132   : > { %v5076_v37 = vpack.c.bf16 %v2602_v30, %v2601_v29  ;;  %v2728_v38 = vmax.f32 %v2176_v31, 0.0 }
 0x133   : > { %v5396_v39 = vpack.c.bf16 %v2730_v34, %v2729_v32  ;;  %v5071_v40 = vpack.c.bf16 %v2600_v35, %v2599_v33  ;;  %v5933_v41 = vpop.f32.mrb[32].mxu0 }
 0x134   : > { %5652 = vst [vmem:[%s6814_s7 + $0x78] sm:$0xff] %v5076_v37   ;;  %v5391_v42 = vpack.c.bf16 %v2728_v38, %v2727_v36  ;;  %v1685_v43 = vadd.f32 %v5933_v41, %v6791_v52  ;;  %v6061_v44 = vpop.f32.mrb[32].mxu1  ;;  %v1676_v45 = vpop.f32.mrb[33].mxu0 }
 0x135   : > { %5716 = vst [vmem:[%s6814_s7 + $0x278] sm:$0xff] %v5396_v39   ;;  %5651 = vst [vmem:[%s6814_s7 + $0x70] sm:$0xff] %v5071_v40   ;;  %v2197_v46 = vadd.f32 %v6061_v44, %v6791_v52  ;;  %v1677_v47 = vadd.f32 %v6791_v52, %v1676_v45  ;;  %v2188_v48 = vpop.f32.mrb[33].mxu1  ;;  %v5934_v49 = vpop.f32.mrb[34].mxu0 }
 0x136   : > { %5715 = vst [vmem:[%s6814_s7 + $0x270] sm:$0xff] %v5391_v42   ;;  %v2189_v50 = vadd.f32 %v6791_v52, %v2188_v48  ;;  %v1688_v51 = vadd.f32 %v5934_v49, %v6791_v52  ;;  %v6062_v53 = vpop.f32.mrb[34].mxu1  ;;  %v1679_v54 = vpop.f32.mrb[35].mxu0  ;;  %v2605_v58 = vmax.f32 %v1685_v43, 0.0 }
 0x137   : > { %v2200_v55 = vadd.f32 %v6062_v53, %v6791_v52  ;;  %v1680_v56 = vadd.f32 %v6791_v52, %v1679_v54  ;;  %v2191_v57 = vpop.f32.mrb[35].mxu1  ;;  %v2733_v61 = vmax.f32 %v2197_v46, 0.0  ;;  %v2603_v62 = vmax.f32 %v1677_v47, 0.0 }
 0x138   : > { %v2606_v59 = vmax.f32 %v1688_v51, 0.0  ;;  %v2192_v60 = vadd.f32 %v6791_v52, %v2191_v57  ;;  %v2731_v1 = vmax.f32 %v2189_v50, 0.0 }
 0x139   : > { %v2734_v63 = vmax.f32 %v2200_v55, 0.0  ;;  %v2604_v0 = vmax.f32 %v1680_v56, 0.0 }
 0x13a   : > { %v5086_v2 = vpack.c.bf16 %v2606_v59, %v2605_v58  ;;  %v2732_v3 = vmax.f32 %v2192_v60, 0.0 }
 0x13b   : > { %v5406_v4 = vpack.c.bf16 %v2734_v63, %v2733_v61  ;;  %v5081_v5 = vpack.c.bf16 %v2604_v0, %v2603_v62  ;;  %v5937_v6 = vpop.f32.mrb[36].mxu0 }
 0x13c   : > { %5654 = vst [vmem:[%s6814_s7 + $0x88] sm:$0xff] %v5086_v2   ;;  %v5401_v7 = vpack.c.bf16 %v2732_v3, %v2731_v1  ;;  %v1701_v8 = vadd.f32 %v5937_v6, %v6791_v52  ;;  %v6065_v9 = vpop.f32.mrb[36].mxu1  ;;  %v1692_v10 = vpop.f32.mrb[37].mxu0 }
 0x13d   : > { %5718 = vst [vmem:[%s6814_s7 + $0x288] sm:$0xff] %v5406_v4   ;;  %5653 = vst [vmem:[%s6814_s7 + $0x80] sm:$0xff] %v5081_v5   ;;  %v2213_v11 = vadd.f32 %v6065_v9, %v6791_v52  ;;  %v1693_v12 = vadd.f32 %v6791_v52, %v1692_v10  ;;  %v2204_v13 = vpop.f32.mrb[37].mxu1  ;;  %v5938_v14 = vpop.f32.mrb[38].mxu0 }
 0x13e   : > { %5717 = vst [vmem:[%s6814_s7 + $0x280] sm:$0xff] %v5401_v7   ;;  %v2205_v15 = vadd.f32 %v6791_v52, %v2204_v13  ;;  %v1704_v16 = vadd.f32 %v5938_v14, %v6791_v52  ;;  %v6066_v17 = vpop.f32.mrb[38].mxu1  ;;  %v1695_v18 = vpop.f32.mrb[39].mxu0  ;;  %v2609_v22 = vmax.f32 %v1701_v8, 0.0 }
 0x13f   : > { %v2216_v19 = vadd.f32 %v6066_v17, %v6791_v52  ;;  %v1696_v20 = vadd.f32 %v6791_v52, %v1695_v18  ;;  %v2207_v21 = vpop.f32.mrb[39].mxu1  ;;  %v2737_v25 = vmax.f32 %v2213_v11, 0.0  ;;  %v2607_v26 = vmax.f32 %v1693_v12, 0.0 }
 0x140   : > { %v2610_v23 = vmax.f32 %v1704_v16, 0.0  ;;  %v2208_v24 = vadd.f32 %v6791_v52, %v2207_v21  ;;  %v2735_v29 = vmax.f32 %v2205_v15, 0.0 }
 0x141   : > { %v2738_v27 = vmax.f32 %v2216_v19, 0.0  ;;  %v2608_v28 = vmax.f32 %v1696_v20, 0.0 }
 0x142   : > { %v5096_v30 = vpack.c.bf16 %v2610_v23, %v2609_v22  ;;  %v2736_v31 = vmax.f32 %v2208_v24, 0.0 }
 0x143   : > { %v5416_v32 = vpack.c.bf16 %v2738_v27, %v2737_v25  ;;  %v5091_v33 = vpack.c.bf16 %v2608_v28, %v2607_v26  ;;  %v5941_v34 = vpop.f32.mrb[40].mxu0 }
 0x144   : > { %5656 = vst [vmem:[%s6814_s7 + $0x98] sm:$0xff] %v5096_v30   ;;  %v5411_v35 = vpack.c.bf16 %v2736_v31, %v2735_v29  ;;  %v1717_v36 = vadd.f32 %v5941_v34, %v6791_v52  ;;  %v6069_v37 = vpop.f32.mrb[40].mxu1  ;;  %v1708_v38 = vpop.f32.mrb[41].mxu0 }
 0x145   : > { %5720 = vst [vmem:[%s6814_s7 + $0x298] sm:$0xff] %v5416_v32   ;;  %5655 = vst [vmem:[%s6814_s7 + $0x90] sm:$0xff] %v5091_v33   ;;  %v2229_v39 = vadd.f32 %v6069_v37, %v6791_v52  ;;  %v1709_v40 = vadd.f32 %v6791_v52, %v1708_v38  ;;  %v2220_v41 = vpop.f32.mrb[41].mxu1  ;;  %v5942_v42 = vpop.f32.mrb[42].mxu0 }
 0x146   : > { %5719 = vst [vmem:[%s6814_s7 + $0x290] sm:$0xff] %v5411_v35   ;;  %v2221_v43 = vadd.f32 %v6791_v52, %v2220_v41  ;;  %v1720_v44 = vadd.f32 %v5942_v42, %v6791_v52  ;;  %v6070_v45 = vpop.f32.mrb[42].mxu1  ;;  %v1711_v46 = vpop.f32.mrb[43].mxu0  ;;  %v2613_v50 = vmax.f32 %v1717_v36, 0.0 }
 0x147   : > { %v2232_v47 = vadd.f32 %v6070_v45, %v6791_v52  ;;  %v1712_v48 = vadd.f32 %v6791_v52, %v1711_v46  ;;  %v2223_v49 = vpop.f32.mrb[43].mxu1  ;;  %v2741_v54 = vmax.f32 %v2229_v39, 0.0  ;;  %v2611_v55 = vmax.f32 %v1709_v40, 0.0 }
 0x148   : > { %v2614_v51 = vmax.f32 %v1720_v44, 0.0  ;;  %v2224_v53 = vadd.f32 %v6791_v52, %v2223_v49  ;;  %v2739_v58 = vmax.f32 %v2221_v43, 0.0 }
 0x149   : > { %v2742_v56 = vmax.f32 %v2232_v47, 0.0  ;;  %v2612_v57 = vmax.f32 %v1712_v48, 0.0 }
 0x14a   : > { %v5106_v59 = vpack.c.bf16 %v2614_v51, %v2613_v50  ;;  %v2740_v60 = vmax.f32 %v2224_v53, 0.0 }
 0x14b   : > { %v5426_v61 = vpack.c.bf16 %v2742_v56, %v2741_v54  ;;  %v5101_v62 = vpack.c.bf16 %v2612_v57, %v2611_v55  ;;  %v5945_v63 = vpop.f32.mrb[44].mxu0 }
 0x14c   : > { %5658 = vst [vmem:[%s6814_s7 + $0xa8] sm:$0xff] %v5106_v59   ;;  %v5421_v0 = vpack.c.bf16 %v2740_v60, %v2739_v58  ;;  %v1733_v1 = vadd.f32 %v5945_v63, %v6791_v52  ;;  %v6073_v2 = vpop.f32.mrb[44].mxu1  ;;  %v1724_v3 = vpop.f32.mrb[45].mxu0 }
 0x14d   : > { %5722 = vst [vmem:[%s6814_s7 + $0x2a8] sm:$0xff] %v5426_v61   ;;  %5657 = vst [vmem:[%s6814_s7 + $0xa0] sm:$0xff] %v5101_v62   ;;  %v2245_v4 = vadd.f32 %v6073_v2, %v6791_v52  ;;  %v1725_v5 = vadd.f32 %v6791_v52, %v1724_v3  ;;  %v2236_v6 = vpop.f32.mrb[45].mxu1  ;;  %v5946_v7 = vpop.f32.mrb[46].mxu0 }
 0x14e   : > { %5721 = vst [vmem:[%s6814_s7 + $0x2a0] sm:$0xff] %v5421_v0   ;;  %v2237_v8 = vadd.f32 %v6791_v52, %v2236_v6  ;;  %v1736_v9 = vadd.f32 %v5946_v7, %v6791_v52  ;;  %v6074_v10 = vpop.f32.mrb[46].mxu1  ;;  %v1727_v11 = vpop.f32.mrb[47].mxu0  ;;  %v2617_v15 = vmax.f32 %v1733_v1, 0.0 }
 0x14f   : > { %v2248_v12 = vadd.f32 %v6074_v10, %v6791_v52  ;;  %v1728_v13 = vadd.f32 %v6791_v52, %v1727_v11  ;;  %v2239_v14 = vpop.f32.mrb[47].mxu1  ;;  %v2745_v18 = vmax.f32 %v2245_v4, 0.0  ;;  %v2615_v19 = vmax.f32 %v1725_v5, 0.0 }
 0x150   : > { %v2618_v16 = vmax.f32 %v1736_v9, 0.0  ;;  %v2240_v17 = vadd.f32 %v6791_v52, %v2239_v14  ;;  %v2743_v22 = vmax.f32 %v2237_v8, 0.0 }
 0x151   : > { %v2746_v20 = vmax.f32 %v2248_v12, 0.0  ;;  %v2616_v21 = vmax.f32 %v1728_v13, 0.0 }
 0x152   : > { %v5116_v23 = vpack.c.bf16 %v2618_v16, %v2617_v15  ;;  %v2744_v24 = vmax.f32 %v2240_v17, 0.0 }
 0x153   : > { %v5436_v25 = vpack.c.bf16 %v2746_v20, %v2745_v18  ;;  %v5111_v26 = vpack.c.bf16 %v2616_v21, %v2615_v19  ;;  %v5949_v27 = vpop.f32.mrb[48].mxu0 }
 0x154   : > { %5660 = vst [vmem:[%s6814_s7 + $0xb8] sm:$0xff] %v5116_v23   ;;  %v5431_v28 = vpack.c.bf16 %v2744_v24, %v2743_v22  ;;  %v1749_v29 = vadd.f32 %v5949_v27, %v6791_v52  ;;  %v6077_v30 = vpop.f32.mrb[48].mxu1  ;;  %v1740_v31 = vpop.f32.mrb[49].mxu0 }
 0x155   : > { %5724 = vst [vmem:[%s6814_s7 + $0x2b8] sm:$0xff] %v5436_v25   ;;  %5659 = vst [vmem:[%s6814_s7 + $0xb0] sm:$0xff] %v5111_v26   ;;  %v2261_v32 = vadd.f32 %v6077_v30, %v6791_v52  ;;  %v1741_v33 = vadd.f32 %v6791_v52, %v1740_v31  ;;  %v2252_v34 = vpop.f32.mrb[49].mxu1  ;;  %v5950_v35 = vpop.f32.mrb[50].mxu0 }
 0x156   : > { %5723 = vst [vmem:[%s6814_s7 + $0x2b0] sm:$0xff] %v5431_v28   ;;  %v2253_v36 = vadd.f32 %v6791_v52, %v2252_v34  ;;  %v1752_v37 = vadd.f32 %v5950_v35, %v6791_v52  ;;  %v6078_v38 = vpop.f32.mrb[50].mxu1  ;;  %v1743_v39 = vpop.f32.mrb[51].mxu0  ;;  %v2621_v43 = vmax.f32 %v1749_v29, 0.0 }
 0x157   : > { %v2264_v40 = vadd.f32 %v6078_v38, %v6791_v52  ;;  %v1744_v41 = vadd.f32 %v6791_v52, %v1743_v39  ;;  %v2255_v42 = vpop.f32.mrb[51].mxu1  ;;  %v2749_v46 = vmax.f32 %v2261_v32, 0.0  ;;  %v2619_v47 = vmax.f32 %v1741_v33, 0.0 }
 0x158   : > { %v2622_v44 = vmax.f32 %v1752_v37, 0.0  ;;  %v2256_v45 = vadd.f32 %v6791_v52, %v2255_v42  ;;  %v2747_v50 = vmax.f32 %v2253_v36, 0.0 }
 0x159   : > { %v2750_v48 = vmax.f32 %v2264_v40, 0.0  ;;  %v2620_v49 = vmax.f32 %v1744_v41, 0.0 }
 0x15a   : > { %v5126_v51 = vpack.c.bf16 %v2622_v44, %v2621_v43  ;;  %v2748_v53 = vmax.f32 %v2256_v45, 0.0 }
 0x15b   : > { %v5446_v54 = vpack.c.bf16 %v2750_v48, %v2749_v46  ;;  %v5121_v55 = vpack.c.bf16 %v2620_v49, %v2619_v47  ;;  %v5953_v56 = vpop.f32.mrb[52].mxu0 }
 0x15c   : > { %5662 = vst [vmem:[%s6814_s7 + $0xc8] sm:$0xff] %v5126_v51   ;;  %v5441_v57 = vpack.c.bf16 %v2748_v53, %v2747_v50  ;;  %v1765_v58 = vadd.f32 %v5953_v56, %v6791_v52  ;;  %v6081_v59 = vpop.f32.mrb[52].mxu1  ;;  %v1756_v60 = vpop.f32.mrb[53].mxu0  ;;  %v7016_v50 = vld [vmem:[%s7286_s2] ss:$0 sm:$0xff] }
 0x15d   : > { %5726 = vst [vmem:[%s6814_s7 + $0x2c8] sm:$0xff] %v5446_v54   ;;  %5661 = vst [vmem:[%s6814_s7 + $0xc0] sm:$0xff] %v5121_v55   ;;  %v2277_v61 = vadd.f32 %v6081_v59, %v6791_v52  ;;  %v1757_v62 = vadd.f32 %v6791_v52, %v1756_v60  ;;  %v2268_v63 = vpop.f32.mrb[53].mxu1  ;;  %v5954_v0 = vpop.f32.mrb[54].mxu0 }
 0x15e   : > { %5725 = vst [vmem:[%s6814_s7 + $0x2c0] sm:$0xff] %v5441_v57   ;;  %v2269_v1 = vadd.f32 %v6791_v52, %v2268_v63  ;;  %v1768_v2 = vadd.f32 %v5954_v0, %v6791_v52  ;;  %v6082_v3 = vpop.f32.mrb[54].mxu1  ;;  %v1759_v4 = vpop.f32.mrb[55].mxu0  ;;  %v2625_v8 = vmax.f32 %v1765_v58, 0.0 }
 0x15f   : > { %v2280_v5 = vadd.f32 %v6082_v3, %v6791_v52  ;;  %v1760_v6 = vadd.f32 %v6791_v52, %v1759_v4  ;;  %v2271_v7 = vpop.f32.mrb[55].mxu1  ;;  %v2753_v11 = vmax.f32 %v2277_v61, 0.0  ;;  %v2623_v12 = vmax.f32 %v1757_v62, 0.0 }
 0x160   : > { %v2626_v9 = vmax.f32 %v1768_v2, 0.0  ;;  %v2272_v10 = vadd.f32 %v6791_v52, %v2271_v7  ;;  %v2751_v15 = vmax.f32 %v2269_v1, 0.0 }
 0x161   : > { %v2754_v13 = vmax.f32 %v2280_v5, 0.0  ;;  %v2624_v14 = vmax.f32 %v1760_v6, 0.0 }
 0x162   : > { %v5136_v16 = vpack.c.bf16 %v2626_v9, %v2625_v8  ;;  %v2752_v17 = vmax.f32 %v2272_v10, 0.0 }
 0x163   : > { %v5456_v18 = vpack.c.bf16 %v2754_v13, %v2753_v11  ;;  %v5131_v19 = vpack.c.bf16 %v2624_v14, %v2623_v12  ;;  %v5957_v20 = vpop.f32.mrb[56].mxu0 }
 0x164   : > { %5664 = vst [vmem:[%s6814_s7 + $0xd8] sm:$0xff] %v5136_v16   ;;  %v5451_v21 = vpack.c.bf16 %v2752_v17, %v2751_v15  ;;  %v1781_v22 = vadd.f32 %v5957_v20, %v6791_v52  ;;  %v6085_v23 = vpop.f32.mrb[56].mxu1  ;;  %v1772_v24 = vpop.f32.mrb[57].mxu0 }
 0x165   : > { %5728 = vst [vmem:[%s6814_s7 + $0x2d8] sm:$0xff] %v5456_v18   ;;  %5663 = vst [vmem:[%s6814_s7 + $0xd0] sm:$0xff] %v5131_v19   ;;  %v2293_v25 = vadd.f32 %v6085_v23, %v6791_v52  ;;  %v1773_v26 = vadd.f32 %v6791_v52, %v1772_v24  ;;  %v2284_v27 = vpop.f32.mrb[57].mxu1  ;;  %v5958_v28 = vpop.f32.mrb[58].mxu0 }
 0x166   : > { %5727 = vst [vmem:[%s6814_s7 + $0x2d0] sm:$0xff] %v5451_v21   ;;  %v2285_v29 = vadd.f32 %v6791_v52, %v2284_v27  ;;  %v1784_v30 = vadd.f32 %v5958_v28, %v6791_v52  ;;  %v6086_v31 = vpop.f32.mrb[58].mxu1  ;;  %v1775_v32 = vpop.f32.mrb[59].mxu0  ;;  %v2629_v36 = vmax.f32 %v1781_v22, 0.0 }
 0x167   : > { %v2296_v33 = vadd.f32 %v6086_v31, %v6791_v52  ;;  %v1776_v34 = vadd.f32 %v6791_v52, %v1775_v32  ;;  %v2287_v35 = vpop.f32.mrb[59].mxu1  ;;  %v2757_v39 = vmax.f32 %v2293_v25, 0.0  ;;  %v2627_v40 = vmax.f32 %v1773_v26, 0.0 }
 0x168   : > { %v2630_v37 = vmax.f32 %v1784_v30, 0.0  ;;  %v2288_v38 = vadd.f32 %v6791_v52, %v2287_v35  ;;  %v2755_v43 = vmax.f32 %v2285_v29, 0.0 }
 0x169   : > { %v2758_v41 = vmax.f32 %v2296_v33, 0.0  ;;  %v2628_v42 = vmax.f32 %v1776_v34, 0.0 }
 0x16a   : > { %v5146_v44 = vpack.c.bf16 %v2630_v37, %v2629_v36  ;;  %v2756_v45 = vmax.f32 %v2288_v38, 0.0 }
 0x16b   : > { %v5466_v46 = vpack.c.bf16 %v2758_v41, %v2757_v39  ;;  %v5141_v47 = vpack.c.bf16 %v2628_v42, %v2627_v40  ;;  %v5961_v48 = vpop.f32.mrb[60].mxu0 }
 0x16c   : > { %5666 = vst [vmem:[%s6814_s7 + $0xe8] sm:$0xff] %v5146_v44   ;;  %v5461_v49 = vpack.c.bf16 %v2756_v45, %v2755_v43  ;;  %v1797_v52 = vadd.f32 %v7016_v50, %v5961_v48  ;;  %v6089_v51 = vpop.f32.mrb[60].mxu1  ;;  %v1788_v53 = vpop.f32.mrb[61].mxu0 }
 0x16d   : > { %5730 = vst [vmem:[%s6814_s7 + $0x2e8] sm:$0xff] %v5466_v46   ;;  %5665 = vst [vmem:[%s6814_s7 + $0xe0] sm:$0xff] %v5141_v47   ;;  %v2309_v54 = vadd.f32 %v7016_v50, %v6089_v51  ;;  %v1789_v55 = vadd.f32 %v7016_v50, %v1788_v53  ;;  %v2300_v56 = vpop.f32.mrb[61].mxu1  ;;  %v5962_v57 = vpop.f32.mrb[62].mxu0 }
 0x16e   : > { %5729 = vst [vmem:[%s6814_s7 + $0x2e0] sm:$0xff] %v5461_v49   ;;  %v2301_v58 = vadd.f32 %v7016_v50, %v2300_v56  ;;  %v1800_v59 = vadd.f32 %v7016_v50, %v5962_v57  ;;  %v6090_v60 = vpop.f32.mrb[62].mxu1  ;;  %v1791_v61 = vpop.f32.mrb[63].mxu0  ;;  %v2633_v1 = vmax.f32 %v1797_v52, 0.0 }
 0x16f   : > { %v2312_v62 = vadd.f32 %v7016_v50, %v6090_v60  ;;  %v1792_v63 = vadd.f32 %v7016_v50, %v1791_v61  ;;  %v2303_v0 = vpop.f32.mrb[63].mxu1  ;;  %v2761_v4 = vmax.f32 %v2309_v54, 0.0  ;;  %v2631_v5 = vmax.f32 %v1789_v55, 0.0 }
 0x170   : > { %v2634_v2 = vmax.f32 %v1800_v59, 0.0  ;;  %v2304_v3 = vadd.f32 %v7016_v50, %v2303_v0  ;;  %v2759_v8 = vmax.f32 %v2301_v58, 0.0 }
 0x171   : > { %v2762_v6 = vmax.f32 %v2312_v62, 0.0  ;;  %v2632_v7 = vmax.f32 %v1792_v63, 0.0 }
 0x172   : > { %v5156_v9 = vpack.c.bf16 %v2634_v2, %v2633_v1  ;;  %v2760_v10 = vmax.f32 %v2304_v3, 0.0 }
 0x173   : > { %v5476_v11 = vpack.c.bf16 %v2762_v6, %v2761_v4  ;;  %v5151_v12 = vpack.c.bf16 %v2632_v7, %v2631_v5  ;;  %v5965_v13 = vpop.f32.mrb[64].mxu0 }
 0x174   : > { %5668 = vst [vmem:[%s6814_s7 + $0xf8] sm:$0xff] %v5156_v9   ;;  %v5471_v14 = vpack.c.bf16 %v2760_v10, %v2759_v8  ;;  %v1813_v15 = vadd.f32 %v7016_v50, %v5965_v13  ;;  %v6093_v16 = vpop.f32.mrb[64].mxu1  ;;  %v1804_v17 = vpop.f32.mrb[65].mxu0 }
 0x175   : > { %5732 = vst [vmem:[%s6814_s7 + $0x2f8] sm:$0xff] %v5476_v11   ;;  %5667 = vst [vmem:[%s6814_s7 + $0xf0] sm:$0xff] %v5151_v12   ;;  %v2325_v18 = vadd.f32 %v7016_v50, %v6093_v16  ;;  %v1805_v19 = vadd.f32 %v7016_v50, %v1804_v17  ;;  %v2316_v20 = vpop.f32.mrb[65].mxu1  ;;  %v5966_v21 = vpop.f32.mrb[66].mxu0 }
 0x176   : > { %5731 = vst [vmem:[%s6814_s7 + $0x2f0] sm:$0xff] %v5471_v14   ;;  %v2317_v22 = vadd.f32 %v7016_v50, %v2316_v20  ;;  %v1816_v23 = vadd.f32 %v7016_v50, %v5966_v21  ;;  %v6094_v24 = vpop.f32.mrb[66].mxu1  ;;  %v1807_v25 = vpop.f32.mrb[67].mxu0  ;;  %v2637_v29 = vmax.f32 %v1813_v15, 0.0 }
 0x177   : > { %v2328_v26 = vadd.f32 %v7016_v50, %v6094_v24  ;;  %v1808_v27 = vadd.f32 %v7016_v50, %v1807_v25  ;;  %v2319_v28 = vpop.f32.mrb[67].mxu1  ;;  %v2765_v32 = vmax.f32 %v2325_v18, 0.0  ;;  %v2635_v33 = vmax.f32 %v1805_v19, 0.0 }
 0x178   : > { %v2638_v30 = vmax.f32 %v1816_v23, 0.0  ;;  %v2320_v31 = vadd.f32 %v7016_v50, %v2319_v28  ;;  %v2763_v36 = vmax.f32 %v2317_v22, 0.0 }
 0x179   : > { %v2766_v34 = vmax.f32 %v2328_v26, 0.0  ;;  %v2636_v35 = vmax.f32 %v1808_v27, 0.0 }
 0x17a   : > { %v5166_v37 = vpack.c.bf16 %v2638_v30, %v2637_v29  ;;  %v2764_v38 = vmax.f32 %v2320_v31, 0.0 }
 0x17b   : > { %v5486_v39 = vpack.c.bf16 %v2766_v34, %v2765_v32  ;;  %v5161_v40 = vpack.c.bf16 %v2636_v35, %v2635_v33  ;;  %v5969_v41 = vpop.f32.mrb[68].mxu0 }
 0x17c   : > { %5670 = vst [vmem:[%s6814_s7 + $0x108] sm:$0xff] %v5166_v37   ;;  %v5481_v42 = vpack.c.bf16 %v2764_v38, %v2763_v36  ;;  %v1829_v43 = vadd.f32 %v7016_v50, %v5969_v41  ;;  %v6097_v44 = vpop.f32.mrb[68].mxu1  ;;  %v1820_v45 = vpop.f32.mrb[69].mxu0 }
 0x17d   : > { %5734 = vst [vmem:[%s6814_s7 + $0x308] sm:$0xff] %v5486_v39   ;;  %5669 = vst [vmem:[%s6814_s7 + $0x100] sm:$0xff] %v5161_v40   ;;  %v2341_v46 = vadd.f32 %v7016_v50, %v6097_v44  ;;  %v1821_v47 = vadd.f32 %v7016_v50, %v1820_v45  ;;  %v2332_v48 = vpop.f32.mrb[69].mxu1  ;;  %v5970_v49 = vpop.f32.mrb[70].mxu0 }
 0x17e   : > { %5733 = vst [vmem:[%s6814_s7 + $0x300] sm:$0xff] %v5481_v42   ;;  %v2333_v52 = vadd.f32 %v7016_v50, %v2332_v48  ;;  %v1832_v51 = vadd.f32 %v7016_v50, %v5970_v49  ;;  %v6098_v53 = vpop.f32.mrb[70].mxu1  ;;  %v1823_v54 = vpop.f32.mrb[71].mxu0  ;;  %v2641_v58 = vmax.f32 %v1829_v43, 0.0 }
 0x17f   : > { %v2344_v55 = vadd.f32 %v7016_v50, %v6098_v53  ;;  %v1824_v56 = vadd.f32 %v7016_v50, %v1823_v54  ;;  %v2335_v57 = vpop.f32.mrb[71].mxu1  ;;  %v2769_v61 = vmax.f32 %v2341_v46, 0.0  ;;  %v2639_v62 = vmax.f32 %v1821_v47, 0.0 }
 0x180   : > { %v2642_v59 = vmax.f32 %v1832_v51, 0.0  ;;  %v2336_v60 = vadd.f32 %v7016_v50, %v2335_v57  ;;  %v2767_v1 = vmax.f32 %v2333_v52, 0.0 }
 0x181   : > { %v2770_v63 = vmax.f32 %v2344_v55, 0.0  ;;  %v2640_v0 = vmax.f32 %v1824_v56, 0.0 }
 0x182   : > { %v5176_v2 = vpack.c.bf16 %v2642_v59, %v2641_v58  ;;  %v2768_v3 = vmax.f32 %v2336_v60, 0.0 }
 0x183   : > { %v5496_v4 = vpack.c.bf16 %v2770_v63, %v2769_v61  ;;  %v5171_v5 = vpack.c.bf16 %v2640_v0, %v2639_v62  ;;  %v5973_v6 = vpop.f32.mrb[72].mxu0 }
 0x184   : > { %5672 = vst [vmem:[%s6814_s7 + $0x118] sm:$0xff] %v5176_v2   ;;  %v5491_v7 = vpack.c.bf16 %v2768_v3, %v2767_v1  ;;  %v1845_v8 = vadd.f32 %v7016_v50, %v5973_v6  ;;  %v6101_v9 = vpop.f32.mrb[72].mxu1  ;;  %v1836_v10 = vpop.f32.mrb[73].mxu0 }
 0x185   : > { %5736 = vst [vmem:[%s6814_s7 + $0x318] sm:$0xff] %v5496_v4   ;;  %5671 = vst [vmem:[%s6814_s7 + $0x110] sm:$0xff] %v5171_v5   ;;  %v2357_v11 = vadd.f32 %v7016_v50, %v6101_v9  ;;  %v1837_v12 = vadd.f32 %v7016_v50, %v1836_v10  ;;  %v2348_v13 = vpop.f32.mrb[73].mxu1  ;;  %v5974_v14 = vpop.f32.mrb[74].mxu0 }
 0x186   : > { %5735 = vst [vmem:[%s6814_s7 + $0x310] sm:$0xff] %v5491_v7   ;;  %v2349_v15 = vadd.f32 %v7016_v50, %v2348_v13  ;;  %v1848_v16 = vadd.f32 %v7016_v50, %v5974_v14  ;;  %v6102_v17 = vpop.f32.mrb[74].mxu1  ;;  %v1839_v18 = vpop.f32.mrb[75].mxu0  ;;  %v2645_v22 = vmax.f32 %v1845_v8, 0.0 }
 0x187   : > { %v2360_v19 = vadd.f32 %v7016_v50, %v6102_v17  ;;  %v1840_v20 = vadd.f32 %v7016_v50, %v1839_v18  ;;  %v2351_v21 = vpop.f32.mrb[75].mxu1  ;;  %v2773_v25 = vmax.f32 %v2357_v11, 0.0  ;;  %v2643_v26 = vmax.f32 %v1837_v12, 0.0 }
 0x188   : > { %v2646_v23 = vmax.f32 %v1848_v16, 0.0  ;;  %v2352_v24 = vadd.f32 %v7016_v50, %v2351_v21  ;;  %v2771_v29 = vmax.f32 %v2349_v15, 0.0 }
 0x189   : > { %v2774_v27 = vmax.f32 %v2360_v19, 0.0  ;;  %v2644_v28 = vmax.f32 %v1840_v20, 0.0 }
 0x18a   : > { %v5186_v30 = vpack.c.bf16 %v2646_v23, %v2645_v22  ;;  %v2772_v31 = vmax.f32 %v2352_v24, 0.0 }
 0x18b   : > { %v5506_v32 = vpack.c.bf16 %v2774_v27, %v2773_v25  ;;  %v5181_v33 = vpack.c.bf16 %v2644_v28, %v2643_v26  ;;  %v5977_v34 = vpop.f32.mrb[76].mxu0 }
 0x18c   : > { %5674 = vst [vmem:[%s6814_s7 + $0x128] sm:$0xff] %v5186_v30   ;;  %v5501_v35 = vpack.c.bf16 %v2772_v31, %v2771_v29  ;;  %v1861_v36 = vadd.f32 %v7016_v50, %v5977_v34  ;;  %v6105_v37 = vpop.f32.mrb[76].mxu1  ;;  %v1852_v38 = vpop.f32.mrb[77].mxu0 }
 0x18d   : > { %5738 = vst [vmem:[%s6814_s7 + $0x328] sm:$0xff] %v5506_v32   ;;  %5673 = vst [vmem:[%s6814_s7 + $0x120] sm:$0xff] %v5181_v33   ;;  %v2373_v39 = vadd.f32 %v7016_v50, %v6105_v37  ;;  %v1853_v40 = vadd.f32 %v7016_v50, %v1852_v38  ;;  %v2364_v41 = vpop.f32.mrb[77].mxu1  ;;  %v5978_v42 = vpop.f32.mrb[78].mxu0 }
 0x18e   : > { %5737 = vst [vmem:[%s6814_s7 + $0x320] sm:$0xff] %v5501_v35   ;;  %v2365_v43 = vadd.f32 %v7016_v50, %v2364_v41  ;;  %v1864_v44 = vadd.f32 %v7016_v50, %v5978_v42  ;;  %v6106_v45 = vpop.f32.mrb[78].mxu1  ;;  %v1855_v46 = vpop.f32.mrb[79].mxu0  ;;  %v2649_v52 = vmax.f32 %v1861_v36, 0.0 }
 0x18f   : > { %v2376_v47 = vadd.f32 %v7016_v50, %v6106_v45  ;;  %v1856_v48 = vadd.f32 %v7016_v50, %v1855_v46  ;;  %v2367_v49 = vpop.f32.mrb[79].mxu1  ;;  %v2777_v54 = vmax.f32 %v2373_v39, 0.0  ;;  %v2647_v55 = vmax.f32 %v1853_v40, 0.0 }
 0x190   : > { %v2650_v51 = vmax.f32 %v1864_v44, 0.0  ;;  %v2368_v53 = vadd.f32 %v7016_v50, %v2367_v49  ;;  %v2775_v58 = vmax.f32 %v2365_v43, 0.0 }
 0x191   : > { %v2778_v56 = vmax.f32 %v2376_v47, 0.0  ;;  %v2648_v57 = vmax.f32 %v1856_v48, 0.0 }
 0x192   : > { %v5196_v59 = vpack.c.bf16 %v2650_v51, %v2649_v52  ;;  %v2776_v60 = vmax.f32 %v2368_v53, 0.0 }
 0x193   : > { %v5516_v61 = vpack.c.bf16 %v2778_v56, %v2777_v54  ;;  %v5191_v62 = vpack.c.bf16 %v2648_v57, %v2647_v55  ;;  %v5981_v63 = vpop.f32.mrb[80].mxu0 }
 0x194   : > { %5676 = vst [vmem:[%s6814_s7 + $0x138] sm:$0xff] %v5196_v59   ;;  %v5511_v0 = vpack.c.bf16 %v2776_v60, %v2775_v58  ;;  %v1877_v1 = vadd.f32 %v7016_v50, %v5981_v63  ;;  %v6109_v2 = vpop.f32.mrb[80].mxu1  ;;  %v1868_v3 = vpop.f32.mrb[81].mxu0 }
 0x195   : > { %5740 = vst [vmem:[%s6814_s7 + $0x338] sm:$0xff] %v5516_v61   ;;  %5675 = vst [vmem:[%s6814_s7 + $0x130] sm:$0xff] %v5191_v62   ;;  %v2389_v4 = vadd.f32 %v7016_v50, %v6109_v2  ;;  %v1869_v5 = vadd.f32 %v7016_v50, %v1868_v3  ;;  %v2380_v6 = vpop.f32.mrb[81].mxu1  ;;  %v5982_v7 = vpop.f32.mrb[82].mxu0 }
 0x196   : > { %5739 = vst [vmem:[%s6814_s7 + $0x330] sm:$0xff] %v5511_v0   ;;  %v2381_v8 = vadd.f32 %v7016_v50, %v2380_v6  ;;  %v1880_v9 = vadd.f32 %v7016_v50, %v5982_v7  ;;  %v6110_v10 = vpop.f32.mrb[82].mxu1  ;;  %v1871_v11 = vpop.f32.mrb[83].mxu0  ;;  %v2653_v15 = vmax.f32 %v1877_v1, 0.0 }
 0x197   : > { %v2392_v12 = vadd.f32 %v7016_v50, %v6110_v10  ;;  %v1872_v13 = vadd.f32 %v7016_v50, %v1871_v11  ;;  %v2383_v14 = vpop.f32.mrb[83].mxu1  ;;  %v2781_v18 = vmax.f32 %v2389_v4, 0.0  ;;  %v2651_v19 = vmax.f32 %v1869_v5, 0.0 }
 0x198   : > { %v2654_v16 = vmax.f32 %v1880_v9, 0.0  ;;  %v2384_v17 = vadd.f32 %v7016_v50, %v2383_v14  ;;  %v2779_v22 = vmax.f32 %v2381_v8, 0.0 }
 0x199   : > { %v2782_v20 = vmax.f32 %v2392_v12, 0.0  ;;  %v2652_v21 = vmax.f32 %v1872_v13, 0.0 }
 0x19a   : > { %v5206_v23 = vpack.c.bf16 %v2654_v16, %v2653_v15  ;;  %v2780_v24 = vmax.f32 %v2384_v17, 0.0 }
 0x19b   : > { %v5526_v25 = vpack.c.bf16 %v2782_v20, %v2781_v18  ;;  %v5201_v26 = vpack.c.bf16 %v2652_v21, %v2651_v19  ;;  %v5985_v27 = vpop.f32.mrb[84].mxu0 }
 0x19c   : > { %5678 = vst [vmem:[%s6814_s7 + $0x148] sm:$0xff] %v5206_v23   ;;  %v5521_v28 = vpack.c.bf16 %v2780_v24, %v2779_v22  ;;  %v1893_v29 = vadd.f32 %v7016_v50, %v5985_v27  ;;  %v6113_v30 = vpop.f32.mrb[84].mxu1  ;;  %v1884_v31 = vpop.f32.mrb[85].mxu0 }
 0x19d   : > { %5742 = vst [vmem:[%s6814_s7 + $0x348] sm:$0xff] %v5526_v25   ;;  %5677 = vst [vmem:[%s6814_s7 + $0x140] sm:$0xff] %v5201_v26   ;;  %v2405_v32 = vadd.f32 %v7016_v50, %v6113_v30  ;;  %v1885_v33 = vadd.f32 %v7016_v50, %v1884_v31  ;;  %v2396_v34 = vpop.f32.mrb[85].mxu1  ;;  %v5986_v35 = vpop.f32.mrb[86].mxu0 }
 0x19e   : > { %5741 = vst [vmem:[%s6814_s7 + $0x340] sm:$0xff] %v5521_v28   ;;  %v2397_v36 = vadd.f32 %v7016_v50, %v2396_v34  ;;  %v1896_v37 = vadd.f32 %v7016_v50, %v5986_v35  ;;  %v6114_v38 = vpop.f32.mrb[86].mxu1  ;;  %v1887_v39 = vpop.f32.mrb[87].mxu0  ;;  %v2657_v43 = vmax.f32 %v1893_v29, 0.0 }
 0x19f   : > { %v2408_v40 = vadd.f32 %v7016_v50, %v6114_v38  ;;  %v1888_v41 = vadd.f32 %v7016_v50, %v1887_v39  ;;  %v2399_v42 = vpop.f32.mrb[87].mxu1  ;;  %v2785_v46 = vmax.f32 %v2405_v32, 0.0  ;;  %v2655_v47 = vmax.f32 %v1885_v33, 0.0 }
 0x1a0   : > { %v2658_v44 = vmax.f32 %v1896_v37, 0.0  ;;  %v2400_v45 = vadd.f32 %v7016_v50, %v2399_v42  ;;  %v2783_v52 = vmax.f32 %v2397_v36, 0.0 }
 0x1a1   : > { %v2786_v48 = vmax.f32 %v2408_v40, 0.0  ;;  %v2656_v49 = vmax.f32 %v1888_v41, 0.0 }
 0x1a2   : > { %v5216_v51 = vpack.c.bf16 %v2658_v44, %v2657_v43  ;;  %v2784_v53 = vmax.f32 %v2400_v45, 0.0 }
 0x1a3   : > { %v5536_v54 = vpack.c.bf16 %v2786_v48, %v2785_v46  ;;  %v5211_v55 = vpack.c.bf16 %v2656_v49, %v2655_v47  ;;  %v5989_v56 = vpop.f32.mrb[88].mxu0 }
 0x1a4   : > { %5680 = vst [vmem:[%s6814_s7 + $0x158] sm:$0xff] %v5216_v51   ;;  %v5531_v57 = vpack.c.bf16 %v2784_v53, %v2783_v52  ;;  %v1909_v58 = vadd.f32 %v7016_v50, %v5989_v56  ;;  %v6117_v59 = vpop.f32.mrb[88].mxu1  ;;  %v1900_v60 = vpop.f32.mrb[89].mxu0 }
 0x1a5   : > { %5744 = vst [vmem:[%s6814_s7 + $0x358] sm:$0xff] %v5536_v54   ;;  %5679 = vst [vmem:[%s6814_s7 + $0x150] sm:$0xff] %v5211_v55   ;;  %v2421_v61 = vadd.f32 %v7016_v50, %v6117_v59  ;;  %v1901_v62 = vadd.f32 %v7016_v50, %v1900_v60  ;;  %v2412_v63 = vpop.f32.mrb[89].mxu1  ;;  %v5990_v0 = vpop.f32.mrb[90].mxu0 }
 0x1a6   : > { %5743 = vst [vmem:[%s6814_s7 + $0x350] sm:$0xff] %v5531_v57   ;;  %v2413_v1 = vadd.f32 %v7016_v50, %v2412_v63  ;;  %v1912_v2 = vadd.f32 %v7016_v50, %v5990_v0  ;;  %v6118_v3 = vpop.f32.mrb[90].mxu1  ;;  %v1903_v4 = vpop.f32.mrb[91].mxu0  ;;  %v2661_v8 = vmax.f32 %v1909_v58, 0.0 }
 0x1a7   : > { %v2424_v5 = vadd.f32 %v7016_v50, %v6118_v3  ;;  %v1904_v6 = vadd.f32 %v7016_v50, %v1903_v4  ;;  %v2415_v7 = vpop.f32.mrb[91].mxu1  ;;  %v2789_v11 = vmax.f32 %v2421_v61, 0.0  ;;  %v2659_v12 = vmax.f32 %v1901_v62, 0.0 }
 0x1a8   : > { %v2662_v9 = vmax.f32 %v1912_v2, 0.0  ;;  %v2416_v10 = vadd.f32 %v7016_v50, %v2415_v7  ;;  %v2787_v15 = vmax.f32 %v2413_v1, 0.0 }
 0x1a9   : > { %v2790_v13 = vmax.f32 %v2424_v5, 0.0  ;;  %v2660_v14 = vmax.f32 %v1904_v6, 0.0 }
 0x1aa   : > { %v5226_v16 = vpack.c.bf16 %v2662_v9, %v2661_v8  ;;  %v2788_v17 = vmax.f32 %v2416_v10, 0.0 }
 0x1ab   : > { %v5546_v18 = vpack.c.bf16 %v2790_v13, %v2789_v11  ;;  %v5221_v19 = vpack.c.bf16 %v2660_v14, %v2659_v12  ;;  %v5993_v20 = vpop.f32.mrb[92].mxu0 }
 0x1ac   : > { %5682 = vst [vmem:[%s6814_s7 + $0x168] sm:$0xff] %v5226_v16   ;;  %v5541_v21 = vpack.c.bf16 %v2788_v17, %v2787_v15  ;;  %v1925_v22 = vadd.f32 %v7016_v50, %v5993_v20  ;;  %v6121_v23 = vpop.f32.mrb[92].mxu1  ;;  %v1916_v24 = vpop.f32.mrb[93].mxu0 }
 0x1ad   : > { %5746 = vst [vmem:[%s6814_s7 + $0x368] sm:$0xff] %v5546_v18   ;;  %5681 = vst [vmem:[%s6814_s7 + $0x160] sm:$0xff] %v5221_v19   ;;  %v2437_v25 = vadd.f32 %v7016_v50, %v6121_v23  ;;  %v1917_v26 = vadd.f32 %v7016_v50, %v1916_v24  ;;  %v2428_v27 = vpop.f32.mrb[93].mxu1  ;;  %v5994_v28 = vpop.f32.mrb[94].mxu0 }
 0x1ae   : > { %5745 = vst [vmem:[%s6814_s7 + $0x360] sm:$0xff] %v5541_v21   ;;  %v2429_v29 = vadd.f32 %v7016_v50, %v2428_v27  ;;  %v1928_v30 = vadd.f32 %v7016_v50, %v5994_v28  ;;  %v6122_v31 = vpop.f32.mrb[94].mxu1  ;;  %v1919_v32 = vpop.f32.mrb[95].mxu0  ;;  %v2665_v36 = vmax.f32 %v1925_v22, 0.0 }
 0x1af   : > { %v2440_v33 = vadd.f32 %v7016_v50, %v6122_v31  ;;  %v1920_v34 = vadd.f32 %v7016_v50, %v1919_v32  ;;  %v2431_v35 = vpop.f32.mrb[95].mxu1  ;;  %v2793_v39 = vmax.f32 %v2437_v25, 0.0  ;;  %v2663_v40 = vmax.f32 %v1917_v26, 0.0 }
 0x1b0   : > { %v2666_v37 = vmax.f32 %v1928_v30, 0.0  ;;  %v2432_v38 = vadd.f32 %v7016_v50, %v2431_v35  ;;  %v2791_v43 = vmax.f32 %v2429_v29, 0.0 }
 0x1b1   : > { %v2794_v41 = vmax.f32 %v2440_v33, 0.0  ;;  %v2664_v42 = vmax.f32 %v1920_v34, 0.0 }
 0x1b2   : > { %v5236_v44 = vpack.c.bf16 %v2666_v37, %v2665_v36  ;;  %v2792_v45 = vmax.f32 %v2432_v38, 0.0 }
 0x1b3   : > { %v5556_v46 = vpack.c.bf16 %v2794_v41, %v2793_v39  ;;  %v5231_v47 = vpack.c.bf16 %v2664_v42, %v2663_v40  ;;  %v5997_v48 = vpop.f32.mrb[96].mxu0 }
 0x1b4   : > { %5684 = vst [vmem:[%s6814_s7 + $0x178] sm:$0xff] %v5236_v44   ;;  %v5551_v49 = vpack.c.bf16 %v2792_v45, %v2791_v43  ;;  %v1941_v52 = vadd.f32 %v7016_v50, %v5997_v48  ;;  %v6125_v51 = vpop.f32.mrb[96].mxu1  ;;  %v1932_v53 = vpop.f32.mrb[97].mxu0 }
 0x1b5   : > { %5748 = vst [vmem:[%s6814_s7 + $0x378] sm:$0xff] %v5556_v46   ;;  %5683 = vst [vmem:[%s6814_s7 + $0x170] sm:$0xff] %v5231_v47   ;;  %v2453_v54 = vadd.f32 %v7016_v50, %v6125_v51  ;;  %v1933_v55 = vadd.f32 %v7016_v50, %v1932_v53  ;;  %v2444_v56 = vpop.f32.mrb[97].mxu1  ;;  %v5998_v57 = vpop.f32.mrb[98].mxu0 }
 0x1b6   : > { %5747 = vst [vmem:[%s6814_s7 + $0x370] sm:$0xff] %v5551_v49   ;;  %v2445_v58 = vadd.f32 %v7016_v50, %v2444_v56  ;;  %v1944_v59 = vadd.f32 %v7016_v50, %v5998_v57  ;;  %v6126_v60 = vpop.f32.mrb[98].mxu1  ;;  %v1935_v61 = vpop.f32.mrb[99].mxu0  ;;  %v2669_v1 = vmax.f32 %v1941_v52, 0.0 }
 0x1b7   : > { %v2456_v62 = vadd.f32 %v7016_v50, %v6126_v60  ;;  %v1936_v63 = vadd.f32 %v7016_v50, %v1935_v61  ;;  %v2447_v0 = vpop.f32.mrb[99].mxu1  ;;  %v2797_v4 = vmax.f32 %v2453_v54, 0.0  ;;  %v2667_v5 = vmax.f32 %v1933_v55, 0.0 }
 0x1b8   : > { %v2670_v2 = vmax.f32 %v1944_v59, 0.0  ;;  %v2448_v3 = vadd.f32 %v7016_v50, %v2447_v0  ;;  %v2795_v8 = vmax.f32 %v2445_v58, 0.0 }
 0x1b9   : > { %v2798_v6 = vmax.f32 %v2456_v62, 0.0  ;;  %v2668_v7 = vmax.f32 %v1936_v63, 0.0 }
 0x1ba   : > { %v5246_v9 = vpack.c.bf16 %v2670_v2, %v2669_v1  ;;  %v2796_v10 = vmax.f32 %v2448_v3, 0.0 }
 0x1bb   : > { %v5566_v11 = vpack.c.bf16 %v2798_v6, %v2797_v4  ;;  %v5241_v12 = vpack.c.bf16 %v2668_v7, %v2667_v5  ;;  %v6001_v13 = vpop.f32.mrb[100].mxu0 }
 0x1bc   : > { %5686 = vst [vmem:[%s6814_s7 + $0x188] sm:$0xff] %v5246_v9   ;;  %v5561_v14 = vpack.c.bf16 %v2796_v10, %v2795_v8  ;;  %v1957_v15 = vadd.f32 %v7016_v50, %v6001_v13  ;;  %v6129_v16 = vpop.f32.mrb[100].mxu1  ;;  %v1948_v17 = vpop.f32.mrb[101].mxu0 }
 0x1bd   : > { %5750 = vst [vmem:[%s6814_s7 + $0x388] sm:$0xff] %v5566_v11   ;;  %5685 = vst [vmem:[%s6814_s7 + $0x180] sm:$0xff] %v5241_v12   ;;  %v2469_v18 = vadd.f32 %v7016_v50, %v6129_v16  ;;  %v1949_v19 = vadd.f32 %v7016_v50, %v1948_v17  ;;  %v2460_v20 = vpop.f32.mrb[101].mxu1  ;;  %v6002_v21 = vpop.f32.mrb[102].mxu0 }
 0x1be   : > { %5749 = vst [vmem:[%s6814_s7 + $0x380] sm:$0xff] %v5561_v14   ;;  %v2461_v22 = vadd.f32 %v7016_v50, %v2460_v20  ;;  %v1960_v23 = vadd.f32 %v7016_v50, %v6002_v21  ;;  %v6130_v24 = vpop.f32.mrb[102].mxu1  ;;  %v1951_v25 = vpop.f32.mrb[103].mxu0  ;;  %v2673_v29 = vmax.f32 %v1957_v15, 0.0 }
 0x1bf   : > { %v2472_v26 = vadd.f32 %v7016_v50, %v6130_v24  ;;  %v1952_v27 = vadd.f32 %v7016_v50, %v1951_v25  ;;  %v2463_v28 = vpop.f32.mrb[103].mxu1  ;;  %v2801_v32 = vmax.f32 %v2469_v18, 0.0  ;;  %v2671_v33 = vmax.f32 %v1949_v19, 0.0 }
 0x1c0   : > { %v2674_v30 = vmax.f32 %v1960_v23, 0.0  ;;  %v2464_v31 = vadd.f32 %v7016_v50, %v2463_v28  ;;  %v2799_v36 = vmax.f32 %v2461_v22, 0.0 }
 0x1c1   : > { %v2802_v34 = vmax.f32 %v2472_v26, 0.0  ;;  %v2672_v35 = vmax.f32 %v1952_v27, 0.0 }
 0x1c2   : > { %v5256_v37 = vpack.c.bf16 %v2674_v30, %v2673_v29  ;;  %v2800_v38 = vmax.f32 %v2464_v31, 0.0 }
 0x1c3   : > { %v5576_v39 = vpack.c.bf16 %v2802_v34, %v2801_v32  ;;  %v5251_v40 = vpack.c.bf16 %v2672_v35, %v2671_v33  ;;  %v6005_v41 = vpop.f32.mrb[104].mxu0 }
 0x1c4   : > { %5688 = vst [vmem:[%s6814_s7 + $0x198] sm:$0xff] %v5256_v37   ;;  %v5571_v42 = vpack.c.bf16 %v2800_v38, %v2799_v36  ;;  %v1973_v43 = vadd.f32 %v7016_v50, %v6005_v41  ;;  %v6133_v44 = vpop.f32.mrb[104].mxu1  ;;  %v1964_v45 = vpop.f32.mrb[105].mxu0 }
 0x1c5   : > { %5752 = vst [vmem:[%s6814_s7 + $0x398] sm:$0xff] %v5576_v39   ;;  %5687 = vst [vmem:[%s6814_s7 + $0x190] sm:$0xff] %v5251_v40   ;;  %v2485_v46 = vadd.f32 %v7016_v50, %v6133_v44  ;;  %v1965_v47 = vadd.f32 %v7016_v50, %v1964_v45  ;;  %v2476_v48 = vpop.f32.mrb[105].mxu1  ;;  %v6006_v49 = vpop.f32.mrb[106].mxu0 }
 0x1c6   : > { %5751 = vst [vmem:[%s6814_s7 + $0x390] sm:$0xff] %v5571_v42   ;;  %v2477_v52 = vadd.f32 %v7016_v50, %v2476_v48  ;;  %v1976_v51 = vadd.f32 %v7016_v50, %v6006_v49  ;;  %v6134_v53 = vpop.f32.mrb[106].mxu1  ;;  %v1967_v54 = vpop.f32.mrb[107].mxu0  ;;  %v2677_v58 = vmax.f32 %v1973_v43, 0.0 }
 0x1c7   : > { %v2488_v55 = vadd.f32 %v7016_v50, %v6134_v53  ;;  %v1968_v56 = vadd.f32 %v7016_v50, %v1967_v54  ;;  %v2479_v57 = vpop.f32.mrb[107].mxu1  ;;  %v2805_v61 = vmax.f32 %v2485_v46, 0.0  ;;  %v2675_v62 = vmax.f32 %v1965_v47, 0.0 }
 0x1c8   : > { %v2678_v59 = vmax.f32 %v1976_v51, 0.0  ;;  %v2480_v60 = vadd.f32 %v7016_v50, %v2479_v57  ;;  %v2803_v1 = vmax.f32 %v2477_v52, 0.0 }
 0x1c9   : > { %v2806_v63 = vmax.f32 %v2488_v55, 0.0  ;;  %v2676_v0 = vmax.f32 %v1968_v56, 0.0 }
 0x1ca   : > { %v5266_v2 = vpack.c.bf16 %v2678_v59, %v2677_v58  ;;  %v2804_v3 = vmax.f32 %v2480_v60, 0.0 }
 0x1cb   : > { %v5586_v4 = vpack.c.bf16 %v2806_v63, %v2805_v61  ;;  %v5261_v5 = vpack.c.bf16 %v2676_v0, %v2675_v62  ;;  %v6009_v6 = vpop.f32.mrb[108].mxu0 }
 0x1cc   : > { %5690 = vst [vmem:[%s6814_s7 + $0x1a8] sm:$0xff] %v5266_v2   ;;  %v5581_v7 = vpack.c.bf16 %v2804_v3, %v2803_v1  ;;  %v1989_v8 = vadd.f32 %v7016_v50, %v6009_v6  ;;  %v6137_v9 = vpop.f32.mrb[108].mxu1  ;;  %v1980_v10 = vpop.f32.mrb[109].mxu0 }
 0x1cd   : > { %5754 = vst [vmem:[%s6814_s7 + $0x3a8] sm:$0xff] %v5586_v4   ;;  %5689 = vst [vmem:[%s6814_s7 + $0x1a0] sm:$0xff] %v5261_v5   ;;  %v2501_v11 = vadd.f32 %v7016_v50, %v6137_v9  ;;  %v1981_v12 = vadd.f32 %v7016_v50, %v1980_v10  ;;  %v2492_v13 = vpop.f32.mrb[109].mxu1  ;;  %v6010_v14 = vpop.f32.mrb[110].mxu0 }
 0x1ce   : > { %5753 = vst [vmem:[%s6814_s7 + $0x3a0] sm:$0xff] %v5581_v7   ;;  %v2493_v15 = vadd.f32 %v7016_v50, %v2492_v13  ;;  %v1992_v16 = vadd.f32 %v7016_v50, %v6010_v14  ;;  %v6138_v17 = vpop.f32.mrb[110].mxu1  ;;  %v1983_v18 = vpop.f32.mrb[111].mxu0  ;;  %v2681_v22 = vmax.f32 %v1989_v8, 0.0 }
 0x1cf   : > { %v2504_v19 = vadd.f32 %v7016_v50, %v6138_v17  ;;  %v1984_v20 = vadd.f32 %v7016_v50, %v1983_v18  ;;  %v2495_v21 = vpop.f32.mrb[111].mxu1  ;;  %v2809_v25 = vmax.f32 %v2501_v11, 0.0  ;;  %v2679_v26 = vmax.f32 %v1981_v12, 0.0 }
 0x1d0   : > { %v2682_v23 = vmax.f32 %v1992_v16, 0.0  ;;  %v2496_v24 = vadd.f32 %v7016_v50, %v2495_v21  ;;  %v2807_v29 = vmax.f32 %v2493_v15, 0.0 }
 0x1d1   : > { %v2810_v27 = vmax.f32 %v2504_v19, 0.0  ;;  %v2680_v28 = vmax.f32 %v1984_v20, 0.0 }
 0x1d2   : > { %v5276_v30 = vpack.c.bf16 %v2682_v23, %v2681_v22  ;;  %v2808_v31 = vmax.f32 %v2496_v24, 0.0 }
 0x1d3   : > { %v5596_v32 = vpack.c.bf16 %v2810_v27, %v2809_v25  ;;  %v5271_v33 = vpack.c.bf16 %v2680_v28, %v2679_v26  ;;  %v6013_v34 = vpop.f32.mrb[112].mxu0 }
 0x1d4   : > { %5692 = vst [vmem:[%s6814_s7 + $0x1b8] sm:$0xff] %v5276_v30   ;;  %v5591_v35 = vpack.c.bf16 %v2808_v31, %v2807_v29  ;;  %v2005_v36 = vadd.f32 %v7016_v50, %v6013_v34  ;;  %v6141_v37 = vpop.f32.mrb[112].mxu1  ;;  %v1996_v38 = vpop.f32.mrb[113].mxu0 }
 0x1d5   : > { %5756 = vst [vmem:[%s6814_s7 + $0x3b8] sm:$0xff] %v5596_v32   ;;  %5691 = vst [vmem:[%s6814_s7 + $0x1b0] sm:$0xff] %v5271_v33   ;;  %v2517_v39 = vadd.f32 %v7016_v50, %v6141_v37  ;;  %v1997_v40 = vadd.f32 %v7016_v50, %v1996_v38  ;;  %v2508_v41 = vpop.f32.mrb[113].mxu1  ;;  %v6014_v42 = vpop.f32.mrb[114].mxu0 }
 0x1d6   : > { %5755 = vst [vmem:[%s6814_s7 + $0x3b0] sm:$0xff] %v5591_v35   ;;  %v2509_v43 = vadd.f32 %v7016_v50, %v2508_v41  ;;  %v2008_v44 = vadd.f32 %v7016_v50, %v6014_v42  ;;  %v6142_v45 = vpop.f32.mrb[114].mxu1  ;;  %v1999_v46 = vpop.f32.mrb[115].mxu0  ;;  %v2685_v52 = vmax.f32 %v2005_v36, 0.0 }
 0x1d7   : > { %v2520_v47 = vadd.f32 %v7016_v50, %v6142_v45  ;;  %v2000_v48 = vadd.f32 %v7016_v50, %v1999_v46  ;;  %v2511_v49 = vpop.f32.mrb[115].mxu1  ;;  %v2813_v54 = vmax.f32 %v2517_v39, 0.0  ;;  %v2683_v55 = vmax.f32 %v1997_v40, 0.0 }
 0x1d8   : > { %v2686_v51 = vmax.f32 %v2008_v44, 0.0  ;;  %v2512_v53 = vadd.f32 %v7016_v50, %v2511_v49  ;;  %v2811_v58 = vmax.f32 %v2509_v43, 0.0 }
 0x1d9   : > { %v2814_v56 = vmax.f32 %v2520_v47, 0.0  ;;  %v2684_v57 = vmax.f32 %v2000_v48, 0.0 }
 0x1da   : > { %v5286_v59 = vpack.c.bf16 %v2686_v51, %v2685_v52  ;;  %v2812_v60 = vmax.f32 %v2512_v53, 0.0 }
 0x1db   : > { %v5606_v61 = vpack.c.bf16 %v2814_v56, %v2813_v54  ;;  %v5281_v62 = vpack.c.bf16 %v2684_v57, %v2683_v55  ;;  %v6017_v63 = vpop.f32.mrb[116].mxu0 }
 0x1dc   : > { %5694 = vst [vmem:[%s6814_s7 + $0x1c8] sm:$0xff] %v5286_v59   ;;  %v5601_v0 = vpack.c.bf16 %v2812_v60, %v2811_v58  ;;  %v2021_v1 = vadd.f32 %v7016_v50, %v6017_v63  ;;  %v6145_v2 = vpop.f32.mrb[116].mxu1  ;;  %v2012_v3 = vpop.f32.mrb[117].mxu0 }
 0x1dd   : > { %5758 = vst [vmem:[%s6814_s7 + $0x3c8] sm:$0xff] %v5606_v61   ;;  %5693 = vst [vmem:[%s6814_s7 + $0x1c0] sm:$0xff] %v5281_v62   ;;  %v2533_v4 = vadd.f32 %v7016_v50, %v6145_v2  ;;  %v2013_v5 = vadd.f32 %v7016_v50, %v2012_v3  ;;  %v2524_v6 = vpop.f32.mrb[117].mxu1  ;;  %v6018_v7 = vpop.f32.mrb[118].mxu0 }
 0x1de   : > { %5757 = vst [vmem:[%s6814_s7 + $0x3c0] sm:$0xff] %v5601_v0   ;;  %v2525_v8 = vadd.f32 %v7016_v50, %v2524_v6  ;;  %v2024_v9 = vadd.f32 %v7016_v50, %v6018_v7  ;;  %v6146_v10 = vpop.f32.mrb[118].mxu1  ;;  %v2015_v11 = vpop.f32.mrb[119].mxu0  ;;  %v2689_v15 = vmax.f32 %v2021_v1, 0.0 }
 0x1df   : > { %v2536_v12 = vadd.f32 %v7016_v50, %v6146_v10  ;;  %v2016_v13 = vadd.f32 %v7016_v50, %v2015_v11  ;;  %v2527_v14 = vpop.f32.mrb[119].mxu1  ;;  %v2817_v18 = vmax.f32 %v2533_v4, 0.0  ;;  %v2687_v19 = vmax.f32 %v2013_v5, 0.0 }
 0x1e0   : > { %v2690_v16 = vmax.f32 %v2024_v9, 0.0  ;;  %v2528_v17 = vadd.f32 %v7016_v50, %v2527_v14  ;;  %v2815_v22 = vmax.f32 %v2525_v8, 0.0 }
 0x1e1   : > { %v2818_v20 = vmax.f32 %v2536_v12, 0.0  ;;  %v2688_v21 = vmax.f32 %v2016_v13, 0.0 }
 0x1e2   : > { %v5296_v23 = vpack.c.bf16 %v2690_v16, %v2689_v15  ;;  %v2816_v24 = vmax.f32 %v2528_v17, 0.0 }
 0x1e3   : > { %v5616_v25 = vpack.c.bf16 %v2818_v20, %v2817_v18  ;;  %v5291_v26 = vpack.c.bf16 %v2688_v21, %v2687_v19  ;;  %v6021_v27 = vpop.f32.mrb[120].mxu0 }
 0x1e4   : > { %5696 = vst [vmem:[%s6814_s7 + $0x1d8] sm:$0xff] %v5296_v23   ;;  %v5611_v28 = vpack.c.bf16 %v2816_v24, %v2815_v22  ;;  %v2037_v29 = vadd.f32 %v7016_v50, %v6021_v27  ;;  %v6149_v30 = vpop.f32.mrb[120].mxu1  ;;  %v2028_v31 = vpop.f32.mrb[121].mxu0 }
 0x1e5   : > { %5760 = vst [vmem:[%s6814_s7 + $0x3d8] sm:$0xff] %v5616_v25   ;;  %5695 = vst [vmem:[%s6814_s7 + $0x1d0] sm:$0xff] %v5291_v26   ;;  %v2549_v32 = vadd.f32 %v7016_v50, %v6149_v30  ;;  %v2029_v33 = vadd.f32 %v7016_v50, %v2028_v31  ;;  %v2540_v34 = vpop.f32.mrb[121].mxu1  ;;  %v6022_v35 = vpop.f32.mrb[122].mxu0 }
 0x1e6   : > { %5759 = vst [vmem:[%s6814_s7 + $0x3d0] sm:$0xff] %v5611_v28   ;;  %v2541_v36 = vadd.f32 %v7016_v50, %v2540_v34  ;;  %v2040_v37 = vadd.f32 %v7016_v50, %v6022_v35  ;;  %v6150_v38 = vpop.f32.mrb[122].mxu1  ;;  %v2031_v39 = vpop.f32.mrb[123].mxu0  ;;  %v2693_v43 = vmax.f32 %v2037_v29, 0.0 }
 0x1e7   : > { %v2552_v40 = vadd.f32 %v7016_v50, %v6150_v38  ;;  %v2032_v41 = vadd.f32 %v7016_v50, %v2031_v39  ;;  %v2543_v42 = vpop.f32.mrb[123].mxu1  ;;  %v2821_v46 = vmax.f32 %v2549_v32, 0.0  ;;  %v2691_v47 = vmax.f32 %v2029_v33, 0.0 }
 0x1e8   : > { %v2694_v44 = vmax.f32 %v2040_v37, 0.0  ;;  %v2544_v45 = vadd.f32 %v7016_v50, %v2543_v42  ;;  %v2819_v52 = vmax.f32 %v2541_v36, 0.0  ;;  %v6364_v50 = vld [vmem:[%s7286_s2] ss:$0 sm:$0xff] }
 0x1e9   : > { %v2822_v48 = vmax.f32 %v2552_v40, 0.0  ;;  %v2692_v49 = vmax.f32 %v2032_v41, 0.0 }
 0x1ea   : > { %v5306_v51 = vpack.c.bf16 %v2694_v44, %v2693_v43  ;;  %v2820_v53 = vmax.f32 %v2544_v45, 0.0 }
 0x1eb   : > { %v5626_v54 = vpack.c.bf16 %v2822_v48, %v2821_v46  ;;  %v5301_v55 = vpack.c.bf16 %v2692_v49, %v2691_v47  ;;  %v6025_v56 = vpop.f32.mrb[124].mxu0 }
 0x1ec   : > { %5698 = vst [vmem:[%s6814_s7 + $0x1e8] sm:$0xff] %v5306_v51   ;;  %v5621_v57 = vpack.c.bf16 %v2820_v53, %v2819_v52  ;;  %v2053_v58 = vadd.f32 %v6364_v50, %v6025_v56  ;;  %v6153_v59 = vpop.f32.mrb[124].mxu1  ;;  %v2044_v60 = vpop.f32.mrb[125].mxu0 }
 0x1ed   : > { %5762 = vst [vmem:[%s6814_s7 + $0x3e8] sm:$0xff] %v5626_v54   ;;  %5697 = vst [vmem:[%s6814_s7 + $0x1e0] sm:$0xff] %v5301_v55   ;;  %v2565_v61 = vadd.f32 %v6364_v50, %v6153_v59  ;;  %v2045_v62 = vadd.f32 %v6364_v50, %v2044_v60  ;;  %v2556_v63 = vpop.f32.mrb[125].mxu1  ;;  %v6026_v0 = vpop.f32.mrb[126].mxu0 }
 0x1ee   : > { %5761 = vst [vmem:[%s6814_s7 + $0x3e0] sm:$0xff] %v5621_v57   ;;  %v2557_v1 = vadd.f32 %v6364_v50, %v2556_v63  ;;  %v2056_v2 = vadd.f32 %v6364_v50, %v6026_v0  ;;  %v6154_v3 = vpop.f32.mrb[126].mxu1  ;;  %v2047_v4 = vpop.f32.mrb[127].mxu0  ;;  %v2697_v8 = vmax.f32 %v2053_v58, 0.0 }
 0x1ef   : > { %v2568_v5 = vadd.f32 %v6364_v50, %v6154_v3  ;;  %v2048_v6 = vadd.f32 %v6364_v50, %v2047_v4  ;;  %v2559_v7 = vpop.f32.mrb[127].mxu1  ;;  %v2825_v11 = vmax.f32 %v2565_v61, 0.0  ;;  %v2695_v12 = vmax.f32 %v2045_v62, 0.0 }
 0x1f0   : > { %v2698_v9 = vmax.f32 %v2056_v2, 0.0  ;;  %v2560_v10 = vadd.f32 %v6364_v50, %v2559_v7  ;;  %v2823_v15 = vmax.f32 %v2557_v1, 0.0 }
 0x1f1   : > { %v2826_v13 = vmax.f32 %v2568_v5, 0.0  ;;  %v2696_v14 = vmax.f32 %v2048_v6, 0.0 }
 0x1f2   : > { %v5316_v16 = vpack.c.bf16 %v2698_v9, %v2697_v8  ;;  %v2824_v17 = vmax.f32 %v2560_v10, 0.0 }
 0x1f3   : > { %v5636_v18 = vpack.c.bf16 %v2826_v13, %v2825_v11  ;;  %v5311_v19 = vpack.c.bf16 %v2696_v14, %v2695_v12 }
 0x1f4   : > { %5700 = vst [vmem:[%s6814_s7 + $0x1f8] sm:$0xff] %v5316_v16   ;;  %v5631_v20 = vpack.c.bf16 %v2824_v17, %v2823_v15 }
 0x1f5   : > { %5764 = vst [vmem:[%s6814_s7 + $0x3f8] sm:$0xff] %v5636_v18   ;;  %5699 = vst [vmem:[%s6814_s7 + $0x1f0] sm:$0xff] %v5311_v19  }
 0x1f6   : > { %5763 = vst [vmem:[%s6814_s7 + $0x3f0] sm:$0xff] %v5631_v20  }
 0x1f7   : > { %6378 = shalt.err (!%p6375_p7)
}
 0x1f8   : > { %s6379_s5 = scalar_lea.hbm %s7222_s29, 16384  ;;  %s6383_s20 = scalar_lea.hbm %s7287_s3, 65536 }
 0x1f9   : > { %p6380_p9 = scmp.ne.s32.totalorder %s7222_s29, %s6379_s5  ;;  %p6384_p12 = scmp.lt.u32.totalorder %s7222_s29, %s7287_s3 }
 0x1fa   : > { %p6385_p13 = scmp.lt.u32.totalorder %s6383_s20, %s6379_s5  ;;  %p6387_p1 = scmp.lt.u32.totalorder %s6379_s5, %s7222_s29 }
 0x1fb   : > { %p6381_p10 = pnand %p6380_p9, %p6536_p3 }
 0x1fc   : > { %p6386_p0 = por %p6385_p13, %p6384_p12 }
 0x1fd   : > { %p6382_p11 = pneg %p6381_p10 }
 0x1fe   : > { %p6388_p2 = por %p6387_p1, %p6386_p0 }
 0x200   : > { %p6389_p4 = pnand %p6388_p2, %p6382_p11 }
 0x202   : > { %6392 = shalt.err (!%p6389_p4)
}
 0x203   : > { %s6463_s16 = smov 64   ;;  %s6464_s27 = smov 4  }
 0x204   : > { %6159 = dma.vmem_to_hbm [thread:$0]  (%p6536_p3), %s7224_s24, 16384, %s7222_s29, %s7232_s4, %s6463_s16, %s6463_s16, %s6464_s27  }
 0x205 PF: > { %p6165_p5 = scmp.ge.s32.totalorder %s6459_s19, 2  ;;  %s4139_s28 = sand.u32 1, %s6431_s12  }
 0x206   : > { %s4140_s6 = scalar_lea.sflag [#allocation3], %s4139_s28 }
 0x207   : > { %p6162_p6 = pnand %p6165_p5, %p6545_p8 }
 0x209   : > { %6426 = dma.done.wait (!%p6162_p6), %s4140_s6, 16384  }
 0x20a   : > { %6428 = vsyncadd (!%p6162_p6), %s4140_s6, 4294950912  ;;  %s16_s19 = sadd.s32 1, %s6459_s19   ;;  %s7290_s12 = smov %s6435_s13 }
 0x20b   : > { %p13_p7 = scmp.ge.s32.totalorder %s16_s19, 6   ;;  %s7291_s13 = smov %s6439_s14 }
 0x20c   : > { %s7292_s14 = smov %s6554_s30  ;;  %s7293_s15 = smov %s6451_s17 }
 0x20d   : > { %s7294_s16 = smov %s6455_s18  ;;  %s7295_s17 = smov %s7298_s22 }
 0x20e   : > { %s7296_s18 = smov %s7302_s23  ;;  %15 = sbr.rel (!%p13_p7) target bundleno = 5 (0x5), region = 67 }
 0x215   :  { %4145 = vsyncpa [#allocation3], 1 }
 0x216   :  { %4147 = vsyncpa [#allocation3 + $0x1], 1 }

</bundles_post_ra>
